<compile_context>
chip_gen: v7x
topology: tpu7x:2x2x1
jax: 0.10.0
libtpu: 0.0.40
codegen_flags: <defaults>
</compile_context>

<pallas_src>
import functools

import jax
import jax.numpy as jnp
from jax.experimental import pallas as pl
from jax.experimental.pallas import tpu as pltpu


# --------------------------- per-direction gate update ------------------------------
def _gate_update(g4, c_prev, H):
    """g4: (B, 4H) pre-activation gates in (i, f, o, g) column order."""
    s = jax.nn.sigmoid(g4[:, :3 * H])          # i, f, o in ONE EUP pass (3H lanes)
    g = jnp.tanh(g4[:, 3 * H:])                # g in one EUP pass (H lanes)
    c_new = s[:, H:2 * H] * c_prev + s[:, :H] * g
    h_new = s[:, 2 * H:3 * H] * jnp.tanh(c_new)
    return h_new, c_new


# --------------------- fused bidirectional LSTM layer kernel ------------------------
def _bilstm_layer_kernel(x_ref, w_ih_ref, b_ref, w_hh_ref, o_ref, gin_ref,
                         *, seq_len, batch):
    # x_ref    : (T*B, D_in)  time-major rows (row t*B + b)
    # w_ih_ref : (D_in, 8H)   [fwd (i,f,o,g) | bwd (i,f,o,g)] input weights
    # b_ref    : (1, 8H)      fused b_ih + b_hh, same column order
    # w_hh_ref : (2H, 8H)     block-diagonal recurrent weights
    # o_ref    : (T*B, 2H)    output: lanes 0:H fwd, H:2H bwd (PyTorch layout)
    # gin_ref  : (T*B, 8H)    VMEM scratch for the hoisted input projection
    T, B = seq_len, batch
    H2 = o_ref.shape[-1]
    H = H2 // 2
    G = 4 * H

    # ---- Prologue: input projection for BOTH directions, one lane-dense MXU GEMM. ----
    gin_ref[...] = (jnp.dot(x_ref[...], w_ih_ref[...],
                            preferred_element_type=jnp.float32) + b_ref[...])

    whh = w_hh_ref[...]                        # resident across the whole recurrence

    h = jnp.zeros((B, H2), jnp.float32)        # [h_fwd | h_bwd], carried in vregs
    c_f = jnp.zeros((B, H), jnp.float32)
    c_b = jnp.zeros((B, H), jnp.float32)

    # Static, fully-unrolled time loop (T=8): every address below is a compile-time
    # constant -> immediate-addressed vld/vst, no per-step scalar select math.
    for t in range(T):
        tb = T - 1 - t                         # backward direction's time index
        # ONE MXU push per step covering both directions (block-diagonal W_hh).
        rec = jnp.dot(h, whh, preferred_element_type=jnp.float32)     # (B, 8H)
        g_f = gin_ref[t * B:(t + 1) * B, 0:G] + rec[:, 0:G]
        g_b = gin_ref[tb * B:(tb + 1) * B, G:2 * G] + rec[:, G:2 * G]
        h_f, c_f = _gate_update(g_f, c_f, H)
        h_b, c_b = _gate_update(g_b, c_b, H)
        # Shared output buffer: fwd half at time t, bwd half at time T-1-t.
        o_ref[t * B:(t + 1) * B, 0:H] = h_f
        o_ref[tb * B:(tb + 1) * B, H:H2] = h_b
        h = jnp.concatenate([h_f, h_b], axis=-1)


def bilstm_layer(x2d, T, B, w_ih, b, w_hh):
    """x2d: (T*B, D_in) time-major -> (T*B, 2H) time-major, [fwd | bwd] lanes."""
    H2 = w_hh.shape[0]
    H = H2 // 2
    kernel = functools.partial(_bilstm_layer_kernel, seq_len=T, batch=B)
    return pl.pallas_call(
        kernel,
        out_shape=jax.ShapeDtypeStruct((T * B, H2), jnp.float32),
        in_specs=[pl.BlockSpec(memory_space=pltpu.MemorySpace.VMEM)] * 4,
        out_specs=pl.BlockSpec(memory_space=pltpu.MemorySpace.VMEM),
        scratch_shapes=[pltpu.VMEM((T * B, 8 * H), jnp.float32)],
    )(x2d, w_ih, b, w_hh)


# ------------------------------------ fc kernel -------------------------------------
def _fc_kernel(x_ref, w_ref, b_ref, o_ref, *, batch):
    # x_ref: (T*B, 2H) time-major rows; o_ref: (B*T, O_pad) batch-first rows.
    # The time-major -> batch-first permutation is done here by the strided VMEM row
    # loads; every store is a contiguous, lane-dense (T, 128) slab (unmasked vst).
    TB = x_ref.shape[0]
    T = TB // batch
    w = w_ref[...]
    bias = b_ref[...]
    for bi in range(batch):
        xb = x_ref[pl.ds(bi, T, stride=batch), :]                     # batch bi's rows
        yb = jnp.dot(xb, w, preferred_element_type=jnp.float32) + bias
        o_ref[bi * T:(bi + 1) * T, :] = yb


def fc_apply(h2d, B, w, bias):
    TB = h2d.shape[0]
    O = w.shape[-1]
    return pl.pallas_call(
        functools.partial(_fc_kernel, batch=B),
        out_shape=jax.ShapeDtypeStruct((TB, O), jnp.float32),
        in_specs=[pl.BlockSpec(memory_space=pltpu.MemorySpace.VMEM)] * 3,
        out_specs=pl.BlockSpec(memory_space=pltpu.MemorySpace.VMEM),
    )(h2d, w, bias)


# ----------------------------------- parameters -------------------------------------
def init_params(key, word_size, d_model, hid_dim, n_layers, output_size):
    H = hid_dim
    params = {}
    k_emb, k_lstm, k_fc = jax.random.split(key, 3)

    emb = 0.02 * jax.random.normal(k_emb, (word_size, d_model), jnp.float32)
    emb = emb.at[0].set(0.0)                               # padding_idx=0 -> zero row
    params["embedding"] = emb

    # Gate-row permutation: PyTorch order (i, f, g, o) -> kernel order (i, f, o, g).
    perm = jnp.concatenate([jnp.arange(0, H), jnp.arange(H, 2 * H),
                            jnp.arange(3 * H, 4 * H), jnp.arange(2 * H, 3 * H)])

    bound = 1.0 / float(H) ** 0.5
    keys = jax.random.split(k_lstm, n_layers * 8)
    ki = 0
    layers = []
    for l in range(n_layers):
        in_dim = d_model if l == 0 else 2 * H
        w_ih_cols, b_cols = [], []
        w_hh_packed = jnp.zeros((2 * H, 8 * H), jnp.float32)
        for d in range(2):                                 # 0 = forward, 1 = backward
            w_ih = jax.random.uniform(keys[ki], (4 * H, in_dim),
                                      minval=-bound, maxval=bound); ki += 1
            w_hh = jax.random.uniform(keys[ki], (4 * H, H),
                                      minval=-bound, maxval=bound); ki += 1
            b_ih = jax.random.uniform(keys[ki], (4 * H,),
                                      minval=-bound, maxval=bound); ki += 1
            b_hh = jax.random.uniform(keys[ki], (4 * H,),
                                      minval=-bound, maxval=bound); ki += 1
            w_ih_cols.append(w_ih[perm].T)                 # (in_dim, 4H), (i,f,o,g)
            b_cols.append((b_ih + b_hh)[perm][None, :])    # (1, 4H), fused biases
            # Block-diagonal packing: h_fwd rows only feed fwd gate columns, etc.
            w_hh_packed = w_hh_packed.at[d * H:(d + 1) * H,
                                         d * 4 * H:(d + 1) * 4 * H].set(w_hh[perm].T)
        layers.append(dict(
            w_ih=jnp.concatenate(w_ih_cols, axis=-1),      # (in_dim, 8H): [fwd | bwd]
            b=jnp.concatenate(b_cols, axis=-1),            # (1, 8H)
            w_hh=w_hh_packed,                              # (2H, 8H)
        ))
    params["lstm"] = layers

    kw, kb = jax.random.split(k_fc)
    fc_bound = 1.0 / float(2 * H) ** 0.5
    o_pad = ((output_size + 127) // 128) * 128             # lane-dense fc output stores
    fc_w = jax.random.uniform(kw, (output_size, 2 * H),
                              minval=-fc_bound, maxval=fc_bound).T     # (2H, O)
    fc_b = jax.random.uniform(kb, (output_size,),
                              minval=-fc_bound, maxval=fc_bound)
    params["fc_w"] = jnp.zeros((2 * H, o_pad),
                               jnp.float32).at[:, :output_size].set(fc_w)
    params["fc_b"] = jnp.zeros((1, o_pad),
                               jnp.float32).at[0, :output_size].set(fc_b)
    return params


# ------------------------------------- forward --------------------------------------
def bilstm_forward(params, x_ids, output_size):
    """x_ids: (B, T) int32 token ids -> (B*T, output_size) f32 (== out.view(-1, O))."""
    B, T = x_ids.shape
    # Embedding gather stays in XLA; transposing the tiny id matrix makes the gather
    # emit time-major rows directly (no activation transpose anywhere in the wrapper).
    # TODO(synk): embedding lookup (gather) kept in XLA rather than a Pallas kernel.
    h2d = jnp.take(params["embedding"], x_ids.T.reshape(-1), axis=0)   # (T*B, D)
    for layer in params["lstm"]:
        h2d = bilstm_layer(h2d, T, B, layer["w_ih"], layer["b"], layer["w_hh"])
        # TODO(synk): PyTorch inter-layer LSTM dropout is train-only; inference here.
    logits = fc_apply(h2d, B, params["fc_w"], params["fc_b"])          # (B*T, O_pad)
    return logits[:, :output_size]


if __name__ == "__main__":
    parameter = dict(word_size=50, d_model=16, hid_dim=32, n_layers=2,
                     dropout=0.1, output_size=5)
    B, T = 2, 8

    key = jax.random.PRNGKey(0)
    k_param, k_data = jax.random.split(key)
    params = init_params(k_param, parameter["word_size"], parameter["d_model"],
                         parameter["hid_dim"], parameter["n_layers"],
                         parameter["output_size"])
    x_ids = jax.random.randint(k_data, (B, T), 0, parameter["word_size"],
                               dtype=jnp.int32)

    fwd = jax.jit(functools.partial(bilstm_forward,
                                    output_size=parameter["output_size"]))
    out = jax.block_until_ready(fwd(params, x_ids))
    assert out.shape == (B * T, parameter["output_size"])
    assert bool(jnp.all(jnp.isfinite(out)))
    print("KERNEL_OK")
</pallas_src>

<mosaic_0001>
module attributes {stable_mosaic.version = 11 : i64} {
  func.func @_fc_kernel(%arg0: memref<16x64xf32, #tpu.memory_space<vmem>>, %arg1: memref<64x128xf32, #tpu.memory_space<vmem>>, %arg2: memref<1x128xf32, #tpu.memory_space<vmem>>, %arg3: memref<16x128xf32, #tpu.memory_space<vmem>>) attributes {dimension_semantics = [], scalar_prefetch = 0 : i64, scratch_operands = 0 : i64, tpu.core_type = #tpu.core_type<tc>} {
    %c0 = arith.constant 0 : index
    %c0_0 = arith.constant 0 : index
    %0 = vector.load %arg1[%c0, %c0_0] : memref<64x128xf32, #tpu.memory_space<vmem>>, vector<64x128xf32>
    %c0_1 = arith.constant 0 : index
    %c0_2 = arith.constant 0 : index
    %1 = vector.load %arg2[%c0_1, %c0_2] : memref<1x128xf32, #tpu.memory_space<vmem>>, vector<1x128xf32>
    %c0_3 = arith.constant 0 : index
    %c0_4 = arith.constant 0 : index
    %2 = tpu.strided_load %arg0[%c0_3, %c0_4] {strides = array<i32: 2, 1>} : memref<16x64xf32, #tpu.memory_space<vmem>>, vector<8x64xf32>
    %cst = arith.constant dense<0.000000e+00> : vector<8x128xf32>
    %3 = tpu.matmul %2, %0, %cst {dimension_numbers = #tpu.dot_dimension_numbers<[1], [0], [0], [1], [0, 0, 1, 1], [], []>} : vector<8x64xf32>, vector<64x128xf32>, vector<8x128xf32> -> vector<8x128xf32>
    %4 = vector.broadcast %1 : vector<1x128xf32> to vector<8x128xf32>
    %5 = arith.addf %3, %4 : vector<8x128xf32>
    %c0_5 = arith.constant 0 : index
    %c0_6 = arith.constant 0 : index
    %6 = vector.load %arg3[%c0_5, %c0_6] : memref<16x128xf32, #tpu.memory_space<vmem>>, vector<8x128xf32>
    tpu.vector_store %arg3[%c0_5, %c0_6], %5 {strides = array<i32>} : memref<16x128xf32, #tpu.memory_space<vmem>>, vector<8x128xf32>,
    %c1 = arith.constant 1 : index
    %c0_7 = arith.constant 0 : index
    %7 = tpu.strided_load %arg0[%c1, %c0_7] {strides = array<i32: 2, 1>} : memref<16x64xf32, #tpu.memory_space<vmem>>, vector<8x64xf32>
    %cst_8 = arith.constant dense<0.000000e+00> : vector<8x128xf32>
    %8 = tpu.matmul %7, %0, %cst_8 {dimension_numbers = #tpu.dot_dimension_numbers<[1], [0], [0], [1], [0, 0, 1, 1], [], []>} : vector<8x64xf32>, vector<64x128xf32>, vector<8x128xf32> -> vector<8x128xf32>
    %9 = vector.broadcast %1 : vector<1x128xf32> to vector<8x128xf32>
    %10 = arith.addf %8, %9 : vector<8x128xf32>
    %c8 = arith.constant 8 : index
    %c0_9 = arith.constant 0 : index
    %11 = vector.load %arg3[%c8, %c0_9] : memref<16x128xf32, #tpu.memory_space<vmem>>, vector<8x128xf32>
    tpu.vector_store %arg3[%c8, %c0_9], %10 {strides = array<i32>} : memref<16x128xf32, #tpu.memory_space<vmem>>, vector<8x128xf32>,
    return
  }
}

module attributes {stable_mosaic.version = 11 : i64} {
  func.func @_bilstm_layer_kernel(%arg0: memref<16x64xf32, #tpu.memory_space<vmem>>, %arg1: memref<64x256xf32, #tpu.memory_space<vmem>>, %arg2: memref<1x256xf32, #tpu.memory_space<vmem>>, %arg3: memref<64x256xf32, #tpu.memory_space<vmem>>, %arg4: memref<16x64xf32, #tpu.memory_space<vmem>>, %arg5: memref<16x256xf32, #tpu.memory_space<vmem>>) attributes {dimension_semantics = [], scalar_prefetch = 0 : i64, scratch_operands = 1 : i64, tpu.core_type = #tpu.core_type<tc>} {
    %c0 = arith.constant 0 : index
    %c0_0 = arith.constant 0 : index
    %0 = vector.load %arg0[%c0, %c0_0] : memref<16x64xf32, #tpu.memory_space<vmem>>, vector<16x64xf32>
    %c0_1 = arith.constant 0 : index
    %c0_2 = arith.constant 0 : index
    %1 = vector.load %arg1[%c0_1, %c0_2] : memref<64x256xf32, #tpu.memory_space<vmem>>, vector<64x256xf32>
    %cst = arith.constant dense<0.000000e+00> : vector<16x256xf32>
    %2 = tpu.matmul %0, %1, %cst {dimension_numbers = #tpu.dot_dimension_numbers<[1], [0], [0], [1], [0, 0, 1, 1], [], []>} : vector<16x64xf32>, vector<64x256xf32>, vector<16x256xf32> -> vector<16x256xf32>
    %c0_3 = arith.constant 0 : index
    %c0_4 = arith.constant 0 : index
    %3 = vector.load %arg2[%c0_3, %c0_4] : memref<1x256xf32, #tpu.memory_space<vmem>>, vector<1x256xf32>
    %4 = vector.broadcast %3 : vector<1x256xf32> to vector<16x256xf32>
    %5 = arith.addf %2, %4 : vector<16x256xf32>
    %c0_5 = arith.constant 0 : index
    %c0_6 = arith.constant 0 : index
    %6 = vector.load %arg5[%c0_5, %c0_6] : memref<16x256xf32, #tpu.memory_space<vmem>>, vector<16x256xf32>
    tpu.vector_store %arg5[%c0_5, %c0_6], %5 {strides = array<i32>} : memref<16x256xf32, #tpu.memory_space<vmem>>, vector<16x256xf32>,
    %c0_7 = arith.constant 0 : index
    %c0_8 = arith.constant 0 : index
    %7 = vector.load %arg3[%c0_7, %c0_8] : memref<64x256xf32, #tpu.memory_space<vmem>>, vector<64x256xf32>
    %cst_9 = arith.constant 0.000000e+00 : f32
    %8 = vector.broadcast %cst_9 : f32 to vector<2x64xf32>
    %cst_10 = arith.constant 0.000000e+00 : f32
    %9 = vector.broadcast %cst_10 : f32 to vector<2x32xf32>
    %cst_11 = arith.constant 0.000000e+00 : f32
    %10 = vector.broadcast %cst_11 : f32 to vector<2x32xf32>
    %cst_12 = arith.constant dense<0.000000e+00> : vector<2x256xf32>
    %11 = tpu.matmul %8, %7, %cst_12 {dimension_numbers = #tpu.dot_dimension_numbers<[1], [0], [0], [1], [0, 0, 1, 1], [], []>} : vector<2x64xf32>, vector<64x256xf32>, vector<2x256xf32> -> vector<2x256xf32>
    %c0_13 = arith.constant 0 : index
    %c0_14 = arith.constant 0 : index
    %12 = vector.load %arg5[%c0_13, %c0_14] : memref<16x256xf32, #tpu.memory_space<vmem>>, vector<2x128xf32>
    %13 = vector.extract_strided_slice %11 {offsets = [0, 0], sizes = [2, 128], strides = [1, 1]} : vector<2x256xf32> to vector<2x128xf32>
    %14 = arith.addf %12, %13 : vector<2x128xf32>
    %c14 = arith.constant 14 : index
    %c128 = arith.constant 128 : index
    %15 = vector.load %arg5[%c14, %c128] : memref<16x256xf32, #tpu.memory_space<vmem>>, vector<2x128xf32>
    %16 = vector.extract_strided_slice %11 {offsets = [0, 128], sizes = [2, 128], strides = [1, 1]} : vector<2x256xf32> to vector<2x128xf32>
    %17 = arith.addf %15, %16 : vector<2x128xf32>
    %18 = vector.extract_strided_slice %14 {offsets = [0, 0], sizes = [2, 96], strides = [1, 1]} : vector<2x128xf32> to vector<2x96xf32>
    %19 = arith.negf %18 : vector<2x96xf32>
    %20 = math.exp %19 : vector<2x96xf32>
    %cst_15 = arith.constant 1.000000e+00 : f32
    %21 = vector.broadcast %cst_15 : f32 to vector<2x96xf32>
    %22 = arith.addf %21, %20 : vector<2x96xf32>
    %23 = arith.divf %21, %22 : vector<2x96xf32>
    %24 = vector.extract_strided_slice %14 {offsets = [0, 96], sizes = [2, 32], strides = [1, 1]} : vector<2x128xf32> to vector<2x32xf32>
    %25 = math.tanh %24 : vector<2x32xf32>
    %26 = vector.extract_strided_slice %23 {offsets = [0, 32], sizes = [2, 32], strides = [1, 1]} : vector<2x96xf32> to vector<2x32xf32>
    %27 = arith.mulf %26, %9 : vector<2x32xf32>
    %28 = vector.extract_strided_slice %23 {offsets = [0, 0], sizes = [2, 32], strides = [1, 1]} : vector<2x96xf32> to vector<2x32xf32>
    %29 = arith.mulf %28, %25 : vector<2x32xf32>
    %30 = arith.addf %27, %29 : vector<2x32xf32>
    %31 = vector.extract_strided_slice %23 {offsets = [0, 64], sizes = [2, 32], strides = [1, 1]} : vector<2x96xf32> to vector<2x32xf32>
    %32 = math.tanh %30 : vector<2x32xf32>
    %33 = arith.mulf %31, %32 : vector<2x32xf32>
    %34 = vector.extract_strided_slice %17 {offsets = [0, 0], sizes = [2, 96], strides = [1, 1]} : vector<2x128xf32> to vector<2x96xf32>
    %35 = arith.negf %34 : vector<2x96xf32>
    %36 = math.exp %35 : vector<2x96xf32>
    %cst_16 = arith.constant 1.000000e+00 : f32
    %37 = vector.broadcast %cst_16 : f32 to vector<2x96xf32>
    %38 = arith.addf %37, %36 : vector<2x96xf32>
    %39 = arith.divf %37, %38 : vector<2x96xf32>
    %40 = vector.extract_strided_slice %17 {offsets = [0, 96], sizes = [2, 32], strides = [1, 1]} : vector<2x128xf32> to vector<2x32xf32>
    %41 = math.tanh %40 : vector<2x32xf32>
    %42 = vector.extract_strided_slice %39 {offsets = [0, 32], sizes = [2, 32], strides = [1, 1]} : vector<2x96xf32> to vector<2x32xf32>
    %43 = arith.mulf %42, %10 : vector<2x32xf32>
    %44 = vector.extract_strided_slice %39 {offsets = [0, 0], sizes = [2, 32], strides = [1, 1]} : vector<2x96xf32> to vector<2x32xf32>
    %45 = arith.mulf %44, %41 : vector<2x32xf32>
    %46 = arith.addf %43, %45 : vector<2x32xf32>
    %47 = vector.extract_strided_slice %39 {offsets = [0, 64], sizes = [2, 32], strides = [1, 1]} : vector<2x96xf32> to vector<2x32xf32>
    %48 = math.tanh %46 : vector<2x32xf32>
    %49 = arith.mulf %47, %48 : vector<2x32xf32>
    %c0_17 = arith.constant 0 : index
    %c0_18 = arith.constant 0 : index
    %50 = vector.load %arg4[%c0_17, %c0_18] : memref<16x64xf32, #tpu.memory_space<vmem>>, vector<2x32xf32>
    tpu.vector_store %arg4[%c0_17, %c0_18], %33 {strides = array<i32>} : memref<16x64xf32, #tpu.memory_space<vmem>>, vector<2x32xf32>,
    %c14_19 = arith.constant 14 : index
    %c32 = arith.constant 32 : index
    %51 = vector.load %arg4[%c14_19, %c32] : memref<16x64xf32, #tpu.memory_space<vmem>>, vector<2x32xf32>
    tpu.vector_store %arg4[%c14_19, %c32], %49 {strides = array<i32>} : memref<16x64xf32, #tpu.memory_space<vmem>>, vector<2x32xf32>,
    %52 = tpu.concatenate %33, %49 in 1 : vector<2x32xf32>, vector<2x32xf32> -> vector<2x64xf32>
    %cst_20 = arith.constant dense<0.000000e+00> : vector<2x256xf32>
    %53 = tpu.matmul %52, %7, %cst_20 {dimension_numbers = #tpu.dot_dimension_numbers<[1], [0], [0], [1], [0, 0, 1, 1], [], []>} : vector<2x64xf32>, vector<64x256xf32>, vector<2x256xf32> -> vector<2x256xf32>
    %c2 = arith.constant 2 : index
    %c0_21 = arith.constant 0 : index
    %54 = vector.load %arg5[%c2, %c0_21] : memref<16x256xf32, #tpu.memory_space<vmem>>, vector<2x128xf32>
    %55 = vector.extract_strided_slice %53 {offsets = [0, 0], sizes = [2, 128], strides = [1, 1]} : vector<2x256xf32> to vector<2x128xf32>
    %56 = arith.addf %54, %55 : vector<2x128xf32>
    %c12 = arith.constant 12 : index
    %c128_22 = arith.constant 128 : index
    %57 = vector.load %arg5[%c12, %c128_22] : memref<16x256xf32, #tpu.memory_space<vmem>>, vector<2x128xf32>
    %58 = vector.extract_strided_slice %53 {offsets = [0, 128], sizes = [2, 128], strides = [1, 1]} : vector<2x256xf32> to vector<2x128xf32>
    %59 = arith.addf %57, %58 : vector<2x128xf32>
    %60 = vector.extract_strided_slice %56 {offsets = [0, 0], sizes = [2, 96], strides = [1, 1]} : vector<2x128xf32> to vector<2x96xf32>
    %61 = arith.negf %60 : vector<2x96xf32>
    %62 = math.exp %61 : vector<2x96xf32>
    %cst_23 = arith.constant 1.000000e+00 : f32
    %63 = vector.broadcast %cst_23 : f32 to vector<2x96xf32>
    %64 = arith.addf %63, %62 : vector<2x96xf32>
    %65 = arith.divf %63, %64 : vector<2x96xf32>
    %66 = vector.extract_strided_slice %56 {offsets = [0, 96], sizes = [2, 32], strides = [1, 1]} : vector<2x128xf32> to vector<2x32xf32>
    %67 = math.tanh %66 : vector<2x32xf32>
    %68 = vector.extract_strided_slice %65 {offsets = [0, 32], sizes = [2, 32], strides = [1, 1]} : vector<2x96xf32> to vector<2x32xf32>
    %69 = arith.mulf %68, %30 : vector<2x32xf32>
    %70 = vector.extract_strided_slice %65 {offsets = [0, 0], sizes = [2, 32], strides = [1, 1]} : vector<2x96xf32> to vector<2x32xf32>
    %71 = arith.mulf %70, %67 : vector<2x32xf32>
    %72 = arith.addf %69, %71 : vector<2x32xf32>
    %73 = vector.extract_strided_slice %65 {offsets = [0, 64], sizes = [2, 32], strides = [1, 1]} : vector<2x96xf32> to vector<2x32xf32>
    %74 = math.tanh %72 : vector<2x32xf32>
    %75 = arith.mulf %73, %74 : vector<2x32xf32>
    %76 = vector.extract_strided_slice %59 {offsets = [0, 0], sizes = [2, 96], strides = [1, 1]} : vector<2x128xf32> to vector<2x96xf32>
    %77 = arith.negf %76 : vector<2x96xf32>
    %78 = math.exp %77 : vector<2x96xf32>
    %cst_24 = arith.constant 1.000000e+00 : f32
    %79 = vector.broadcast %cst_24 : f32 to vector<2x96xf32>
    %80 = arith.addf %79, %78 : vector<2x96xf32>
    %81 = arith.divf %79, %80 : vector<2x96xf32>
    %82 = vector.extract_strided_slice %59 {offsets = [0, 96], sizes = [2, 32], strides = [1, 1]} : vector<2x128xf32> to vector<2x32xf32>
    %83 = math.tanh %82 : vector<2x32xf32>
    %84 = vector.extract_strided_slice %81 {offsets = [0, 32], sizes = [2, 32], strides = [1, 1]} : vector<2x96xf32> to vector<2x32xf32>
    %85 = arith.mulf %84, %46 : vector<2x32xf32>
    %86 = vector.extract_strided_slice %81 {offsets = [0, 0], sizes = [2, 32], strides = [1, 1]} : vector<2x96xf32> to vector<2x32xf32>
    %87 = arith.mulf %86, %83 : vector<2x32xf32>
    %88 = arith.addf %85, %87 : vector<2x32xf32>
    %89 = vector.extract_strided_slice %81 {offsets = [0, 64], sizes = [2, 32], strides = [1, 1]} : vector<2x96xf32> to vector<2x32xf32>
    %90 = math.tanh %88 : vector<2x32xf32>
    %91 = arith.mulf %89, %90 : vector<2x32xf32>
    %c2_25 = arith.constant 2 : index
    %c0_26 = arith.constant 0 : index
    %92 = vector.load %arg4[%c2_25, %c0_26] : memref<16x64xf32, #tpu.memory_space<vmem>>, vector<2x32xf32>
    tpu.vector_store %arg4[%c2_25, %c0_26], %75 {strides = array<i32>} : memref<16x64xf32, #tpu.memory_space<vmem>>, vector<2x32xf32>,
    %c12_27 = arith.constant 12 : index
    %c32_28 = arith.constant 32 : index
    %93 = vector.load %arg4[%c12_27, %c32_28] : memref<16x64xf32, #tpu.memory_space<vmem>>, vector<2x32xf32>
    tpu.vector_store %arg4[%c12_27, %c32_28], %91 {strides = array<i32>} : memref<16x64xf32, #tpu.memory_space<vmem>>, vector<2x32xf32>,
    %94 = tpu.concatenate %75, %91 in 1 : vector<2x32xf32>, vector<2x32xf32> -> vector<2x64xf32>
    %cst_29 = arith.constant dense<0.000000e+00> : vector<2x256xf32>
    %95 = tpu.matmul %94, %7, %cst_29 {dimension_numbers = #tpu.dot_dimension_numbers<[1], [0], [0], [1], [0, 0, 1, 1], [], []>} : vector<2x64xf32>, vector<64x256xf32>, vector<2x256xf32> -> vector<2x256xf32>
    %c4 = arith.constant 4 : index
    %c0_30 = arith.constant 0 : index
    %96 = vector.load %arg5[%c4, %c0_30] : memref<16x256xf32, #tpu.memory_space<vmem>>, vector<2x128xf32>
    %97 = vector.extract_strided_slice %95 {offsets = [0, 0], sizes = [2, 128], strides = [1, 1]} : vector<2x256xf32> to vector<2x128xf32>
    %98 = arith.addf %96, %97 : vector<2x128xf32>
    %c10 = arith.constant 10 : index
    %c128_31 = arith.constant 128 : index
    %99 = vector.load %arg5[%c10, %c128_31] : memref<16x256xf32, #tpu.memory_space<vmem>>, vector<2x128xf32>
    %100 = vector.extract_strided_slice %95 {offsets = [0, 128], sizes = [2, 128], strides = [1, 1]} : vector<2x256xf32> to vector<2x128xf32>
    %101 = arith.addf %99, %100 : vector<2x128xf32>
    %102 = vector.extract_strided_slice %98 {offsets = [0, 0], sizes = [2, 96], strides = [1, 1]} : vector<2x128xf32> to vector<2x96xf32>
    %103 = arith.negf %102 : vector<2x96xf32>
    %104 = math.exp %103 : vector<2x96xf32>
    %cst_32 = arith.constant 1.000000e+00 : f32
    %105 = vector.broadcast %cst_32 : f32 to vector<2x96xf32>
    %106 = arith.addf %105, %104 : vector<2x96xf32>
    %107 = arith.divf %105, %106 : vector<2x96xf32>
    %108 = vector.extract_strided_slice %98 {offsets = [0, 96], sizes = [2, 32], strides = [1, 1]} : vector<2x128xf32> to vector<2x32xf32>
    %109 = math.tanh %108 : vector<2x32xf32>
    %110 = vector.extract_strided_slice %107 {offsets = [0, 32], sizes = [2, 32], strides = [1, 1]} : vector<2x96xf32> to vector<2x32xf32>
    %111 = arith.mulf %110, %72 : vector<2x32xf32>
    %112 = vector.extract_strided_slice %107 {offsets = [0, 0], sizes = [2, 32], strides = [1, 1]} : vector<2x96xf32> to vector<2x32xf32>
    %113 = arith.mulf %112, %109 : vector<2x32xf32>
    %114 = arith.addf %111, %113 : vector<2x32xf32>
    %115 = vector.extract_strided_slice %107 {offsets = [0, 64], sizes = [2, 32], strides = [1, 1]} : vector<2x96xf32> to vector<2x32xf32>
    %116 = math.tanh %114 : vector<2x32xf32>
    %117 = arith.mulf %115, %116 : vector<2x32xf32>
    %118 = vector.extract_strided_slice %101 {offsets = [0, 0], sizes = [2, 96], strides = [1, 1]} : vector<2x128xf32> to vector<2x96xf32>
    %119 = arith.negf %118 : vector<2x96xf32>
    %120 = math.exp %119 : vector<2x96xf32>
    %cst_33 = arith.constant 1.000000e+00 : f32
    %121 = vector.broadcast %cst_33 : f32 to vector<2x96xf32>
    %122 = arith.addf %121, %120 : vector<2x96xf32>
    %123 = arith.divf %121, %122 : vector<2x96xf32>
    %124 = vector.extract_strided_slice %101 {offsets = [0, 96], sizes = [2, 32], strides = [1, 1]} : vector<2x128xf32> to vector<2x32xf32>
    %125 = math.tanh %124 : vector<2x32xf32>
    %126 = vector.extract_strided_slice %123 {offsets = [0, 32], sizes = [2, 32], strides = [1, 1]} : vector<2x96xf32> to vector<2x32xf32>
    %127 = arith.mulf %126, %88 : vector<2x32xf32>
    %128 = vector.extract_strided_slice %123 {offsets = [0, 0], sizes = [2, 32], strides = [1, 1]} : vector<2x96xf32> to vector<2x32xf32>
    %129 = arith.mulf %128, %125 : vector<2x32xf32>
    %130 = arith.addf %127, %129 : vector<2x32xf32>
    %131 = vector.extract_strided_slice %123 {offsets = [0, 64], sizes = [2, 32], strides = [1, 1]} : vector<2x96xf32> to vector<2x32xf32>
    %132 = math.tanh %130 : vector<2x32xf32>
    %133 = arith.mulf %131, %132 : vector<2x32xf32>
    %c4_34 = arith.constant 4 : index
    %c0_35 = arith.constant 0 : index
    %134 = vector.load %arg4[%c4_34, %c0_35] : memref<16x64xf32, #tpu.memory_space<vmem>>, vector<2x32xf32>
    tpu.vector_store %arg4[%c4_34, %c0_35], %117 {strides = array<i32>} : memref<16x64xf32, #tpu.memory_space<vmem>>, vector<2x32xf32>,
    %c10_36 = arith.constant 10 : index
    %c32_37 = arith.constant 32 : index
    %135 = vector.load %arg4[%c10_36, %c32_37] : memref<16x64xf32, #tpu.memory_space<vmem>>, vector<2x32xf32>
    tpu.vector_store %arg4[%c10_36, %c32_37], %133 {strides = array<i32>} : memref<16x64xf32, #tpu.memory_space<vmem>>, vector<2x32xf32>,
    %136 = tpu.concatenate %117, %133 in 1 : vector<2x32xf32>, vector<2x32xf32> -> vector<2x64xf32>
    %cst_38 = arith.constant dense<0.000000e+00> : vector<2x256xf32>
    %137 = tpu.matmul %136, %7, %cst_38 {dimension_numbers = #tpu.dot_dimension_numbers<[1], [0], [0], [1], [0, 0, 1, 1], [], []>} : vector<2x64xf32>, vector<64x256xf32>, vector<2x256xf32> -> vector<2x256xf32>
    %c6 = arith.constant 6 : index
    %c0_39 = arith.constant 0 : index
    %138 = vector.load %arg5[%c6, %c0_39] : memref<16x256xf32, #tpu.memory_space<vmem>>, vector<2x128xf32>
    %139 = vector.extract_strided_slice %137 {offsets = [0, 0], sizes = [2, 128], strides = [1, 1]} : vector<2x256xf32> to vector<2x128xf32>
    %140 = arith.addf %138, %139 : vector<2x128xf32>
    %c8 = arith.constant 8 : index
    %c128_40 = arith.constant 128 : index
    %141 = vector.load %arg5[%c8, %c128_40] : memref<16x256xf32, #tpu.memory_space<vmem>>, vector<2x128xf32>
    %142 = vector.extract_strided_slice %137 {offsets = [0, 128], sizes = [2, 128], strides = [1, 1]} : vector<2x256xf32> to vector<2x128xf32>
    %143 = arith.addf %141, %142 : vector<2x128xf32>
    %144 = vector.extract_strided_slice %140 {offsets = [0, 0], sizes = [2, 96], strides = [1, 1]} : vector<2x128xf32> to vector<2x96xf32>
    %145 = arith.negf %144 : vector<2x96xf32>
    %146 = math.exp %145 : vector<2x96xf32>
    %cst_41 = arith.constant 1.000000e+00 : f32
    %147 = vector.broadcast %cst_41 : f32 to vector<2x96xf32>
    %148 = arith.addf %147, %146 : vector<2x96xf32>
    %149 = arith.divf %147, %148 : vector<2x96xf32>
    %150 = vector.extract_strided_slice %140 {offsets = [0, 96], sizes = [2, 32], strides = [1, 1]} : vector<2x128xf32> to vector<2x32xf32>
    %151 = math.tanh %150 : vector<2x32xf32>
    %152 = vector.extract_strided_slice %149 {offsets = [0, 32], sizes = [2, 32], strides = [1, 1]} : vector<2x96xf32> to vector<2x32xf32>
    %153 = arith.mulf %152, %114 : vector<2x32xf32>
    %154 = vector.extract_strided_slice %149 {offsets = [0, 0], sizes = [2, 32], strides = [1, 1]} : vector<2x96xf32> to vector<2x32xf32>
    %155 = arith.mulf %154, %151 : vector<2x32xf32>
    %156 = arith.addf %153, %155 : vector<2x32xf32>
    %157 = vector.extract_strided_slice %149 {offsets = [0, 64], sizes = [2, 32], strides = [1, 1]} : vector<2x96xf32> to vector<2x32xf32>
    %158 = math.tanh %156 : vector<2x32xf32>
    %159 = arith.mulf %157, %158 : vector<2x32xf32>
    %160 = vector.extract_strided_slice %143 {offsets = [0, 0], sizes = [2, 96], strides = [1, 1]} : vector<2x128xf32> to vector<2x96xf32>
    %161 = arith.negf %160 : vector<2x96xf32>
    %162 = math.exp %161 : vector<2x96xf32>
    %cst_42 = arith.constant 1.000000e+00 : f32
    %163 = vector.broadcast %cst_42 : f32 to vector<2x96xf32>
    %164 = arith.addf %163, %162 : vector<2x96xf32>
    %165 = arith.divf %163, %164 : vector<2x96xf32>
    %166 = vector.extract_strided_slice %143 {offsets = [0, 96], sizes = [2, 32], strides = [1, 1]} : vector<2x128xf32> to vector<2x32xf32>
    %167 = math.tanh %166 : vector<2x32xf32>
    %168 = vector.extract_strided_slice %165 {offsets = [0, 32], sizes = [2, 32], strides = [1, 1]} : vector<2x96xf32> to vector<2x32xf32>
    %169 = arith.mulf %168, %130 : vector<2x32xf32>
    %170 = vector.extract_strided_slice %165 {offsets = [0, 0], sizes = [2, 32], strides = [1, 1]} : vector<2x96xf32> to vector<2x32xf32>
    %171 = arith.mulf %170, %167 : vector<2x32xf32>
    %172 = arith.addf %169, %171 : vector<2x32xf32>
    %173 = vector.extract_strided_slice %165 {offsets = [0, 64], sizes = [2, 32], strides = [1, 1]} : vector<2x96xf32> to vector<2x32xf32>
    %174 = math.tanh %172 : vector<2x32xf32>
    %175 = arith.mulf %173, %174 : vector<2x32xf32>
    %c6_43 = arith.constant 6 : index
    %c0_44 = arith.constant 0 : index
    %176 = vector.load %arg4[%c6_43, %c0_44] : memref<16x64xf32, #tpu.memory_space<vmem>>, vector<2x32xf32>
    tpu.vector_store %arg4[%c6_43, %c0_44], %159 {strides = array<i32>} : memref<16x64xf32, #tpu.memory_space<vmem>>, vector<2x32xf32>,
    %c8_45 = arith.constant 8 : index
    %c32_46 = arith.constant 32 : index
    %177 = vector.load %arg4[%c8_45, %c32_46] : memref<16x64xf32, #tpu.memory_space<vmem>>, vector<2x32xf32>
    tpu.vector_store %arg4[%c8_45, %c32_46], %175 {strides = array<i32>} : memref<16x64xf32, #tpu.memory_space<vmem>>, vector<2x32xf32>,
    %178 = tpu.concatenate %159, %175 in 1 : vector<2x32xf32>, vector<2x32xf32> -> vector<2x64xf32>
    %cst_47 = arith.constant dense<0.000000e+00> : vector<2x256xf32>
    %179 = tpu.matmul %178, %7, %cst_47 {dimension_numbers = #tpu.dot_dimension_numbers<[1], [0], [0], [1], [0, 0, 1, 1], [], []>} : vector<2x64xf32>, vector<64x256xf32>, vector<2x256xf32> -> vector<2x256xf32>
    %c8_48 = arith.constant 8 : index
    %c0_49 = arith.constant 0 : index
    %180 = vector.load %arg5[%c8_48, %c0_49] : memref<16x256xf32, #tpu.memory_space<vmem>>, vector<2x128xf32>
    %181 = vector.extract_strided_slice %179 {offsets = [0, 0], sizes = [2, 128], strides = [1, 1]} : vector<2x256xf32> to vector<2x128xf32>
    %182 = arith.addf %180, %181 : vector<2x128xf32>
    %c6_50 = arith.constant 6 : index
    %c128_51 = arith.constant 128 : index
    %183 = vector.load %arg5[%c6_50, %c128_51] : memref<16x256xf32, #tpu.memory_space<vmem>>, vector<2x128xf32>
    %184 = vector.extract_strided_slice %179 {offsets = [0, 128], sizes = [2, 128], strides = [1, 1]} : vector<2x256xf32> to vector<2x128xf32>
    %185 = arith.addf %183, %184 : vector<2x128xf32>
    %186 = vector.extract_strided_slice %182 {offsets = [0, 0], sizes = [2, 96], strides = [1, 1]} : vector<2x128xf32> to vector<2x96xf32>
    %187 = arith.negf %186 : vector<2x96xf32>
    %188 = math.exp %187 : vector<2x96xf32>
    %cst_52 = arith.constant 1.000000e+00 : f32
    %189 = vector.broadcast %cst_52 : f32 to vector<2x96xf32>
    %190 = arith.addf %189, %188 : vector<2x96xf32>
    %191 = arith.divf %189, %190 : vector<2x96xf32>
    %192 = vector.extract_strided_slice %182 {offsets = [0, 96], sizes = [2, 32], strides = [1, 1]} : vector<2x128xf32> to vector<2x32xf32>
    %193 = math.tanh %192 : vector<2x32xf32>
    %194 = vector.extract_strided_slice %191 {offsets = [0, 32], sizes = [2, 32], strides = [1, 1]} : vector<2x96xf32> to vector<2x32xf32>
    %195 = arith.mulf %194, %156 : vector<2x32xf32>
    %196 = vector.extract_strided_slice %191 {offsets = [0, 0], sizes = [2, 32], strides = [1, 1]} : vector<2x96xf32> to vector<2x32xf32>
    %197 = arith.mulf %196, %193 : vector<2x32xf32>
    %198 = arith.addf %195, %197 : vector<2x32xf32>
    %199 = vector.extract_strided_slice %191 {offsets = [0, 64], sizes = [2, 32], strides = [1, 1]} : vector<2x96xf32> to vector<2x32xf32>
    %200 = math.tanh %198 : vector<2x32xf32>
    %201 = arith.mulf %199, %200 : vector<2x32xf32>
    %202 = vector.extract_strided_slice %185 {offsets = [0, 0], sizes = [2, 96], strides = [1, 1]} : vector<2x128xf32> to vector<2x96xf32>
    %203 = arith.negf %202 : vector<2x96xf32>
    %204 = math.exp %203 : vector<2x96xf32>
    %cst_53 = arith.constant 1.000000e+00 : f32
    %205 = vector.broadcast %cst_53 : f32 to vector<2x96xf32>
    %206 = arith.addf %205, %204 : vector<2x96xf32>
    %207 = arith.divf %205, %206 : vector<2x96xf32>
    %208 = vector.extract_strided_slice %185 {offsets = [0, 96], sizes = [2, 32], strides = [1, 1]} : vector<2x128xf32> to vector<2x32xf32>
    %209 = math.tanh %208 : vector<2x32xf32>
    %210 = vector.extract_strided_slice %207 {offsets = [0, 32], sizes = [2, 32], strides = [1, 1]} : vector<2x96xf32> to vector<2x32xf32>
    %211 = arith.mulf %210, %172 : vector<2x32xf32>
    %212 = vector.extract_strided_slice %207 {offsets = [0, 0], sizes = [2, 32], strides = [1, 1]} : vector<2x96xf32> to vector<2x32xf32>
    %213 = arith.mulf %212, %209 : vector<2x32xf32>
    %214 = arith.addf %211, %213 : vector<2x32xf32>
    %215 = vector.extract_strided_slice %207 {offsets = [0, 64], sizes = [2, 32], strides = [1, 1]} : vector<2x96xf32> to vector<2x32xf32>
    %216 = math.tanh %214 : vector<2x32xf32>
    %217 = arith.mulf %215, %216 : vector<2x32xf32>
    %c8_54 = arith.constant 8 : index
    %c0_55 = arith.constant 0 : index
    %218 = vector.load %arg4[%c8_54, %c0_55] : memref<16x64xf32, #tpu.memory_space<vmem>>, vector<2x32xf32>
    tpu.vector_store %arg4[%c8_54, %c0_55], %201 {strides = array<i32>} : memref<16x64xf32, #tpu.memory_space<vmem>>, vector<2x32xf32>,
    %c6_56 = arith.constant 6 : index
    %c32_57 = arith.constant 32 : index
    %219 = vector.load %arg4[%c6_56, %c32_57] : memref<16x64xf32, #tpu.memory_space<vmem>>, vector<2x32xf32>
    tpu.vector_store %arg4[%c6_56, %c32_57], %217 {strides = array<i32>} : memref<16x64xf32, #tpu.memory_space<vmem>>, vector<2x32xf32>,
    %220 = tpu.concatenate %201, %217 in 1 : vector<2x32xf32>, vector<2x32xf32> -> vector<2x64xf32>
    %cst_58 = arith.constant dense<0.000000e+00> : vector<2x256xf32>
    %221 = tpu.matmul %220, %7, %cst_58 {dimension_numbers = #tpu.dot_dimension_numbers<[1], [0], [0], [1], [0, 0, 1, 1], [], []>} : vector<2x64xf32>, vector<64x256xf32>, vector<2x256xf32> -> vector<2x256xf32>
    %c10_59 = arith.constant 10 : index
    %c0_60 = arith.constant 0 : index
    %222 = vector.load %arg5[%c10_59, %c0_60] : memref<16x256xf32, #tpu.memory_space<vmem>>, vector<2x128xf32>
    %223 = vector.extract_strided_slice %221 {offsets = [0, 0], sizes = [2, 128], strides = [1, 1]} : vector<2x256xf32> to vector<2x128xf32>
    %224 = arith.addf %222, %223 : vector<2x128xf32>
    %c4_61 = arith.constant 4 : index
    %c128_62 = arith.constant 128 : index
    %225 = vector.load %arg5[%c4_61, %c128_62] : memref<16x256xf32, #tpu.memory_space<vmem>>, vector<2x128xf32>
    %226 = vector.extract_strided_slice %221 {offsets = [0, 128], sizes = [2, 128], strides = [1, 1]} : vector<2x256xf32> to vector<2x128xf32>
    %227 = arith.addf %225, %226 : vector<2x128xf32>
    %228 = vector.extract_strided_slice %224 {offsets = [0, 0], sizes = [2, 96], strides = [1, 1]} : vector<2x128xf32> to vector<2x96xf32>
    %229 = arith.negf %228 : vector<2x96xf32>
    %230 = math.exp %229 : vector<2x96xf32>
    %cst_63 = arith.constant 1.000000e+00 : f32
    %231 = vector.broadcast %cst_63 : f32 to vector<2x96xf32>
    %232 = arith.addf %231, %230 : vector<2x96xf32>
    %233 = arith.divf %231, %232 : vector<2x96xf32>
    %234 = vector.extract_strided_slice %224 {offsets = [0, 96], sizes = [2, 32], strides = [1, 1]} : vector<2x128xf32> to vector<2x32xf32>
    %235 = math.tanh %234 : vector<2x32xf32>
    %236 = vector.extract_strided_slice %233 {offsets = [0, 32], sizes = [2, 32], strides = [1, 1]} : vector<2x96xf32> to vector<2x32xf32>
    %237 = arith.mulf %236, %198 : vector<2x32xf32>
    %238 = vector.extract_strided_slice %233 {offsets = [0, 0], sizes = [2, 32], strides = [1, 1]} : vector<2x96xf32> to vector<2x32xf32>
    %239 = arith.mulf %238, %235 : vector<2x32xf32>
    %240 = arith.addf %237, %239 : vector<2x32xf32>
    %241 = vector.extract_strided_slice %233 {offsets = [0, 64], sizes = [2, 32], strides = [1, 1]} : vector<2x96xf32> to vector<2x32xf32>
    %242 = math.tanh %240 : vector<2x32xf32>
    %243 = arith.mulf %241, %242 : vector<2x32xf32>
    %244 = vector.extract_strided_slice %227 {offsets = [0, 0], sizes = [2, 96], strides = [1, 1]} : vector<2x128xf32> to vector<2x96xf32>
    %245 = arith.negf %244 : vector<2x96xf32>
    %246 = math.exp %245 : vector<2x96xf32>
    %cst_64 = arith.constant 1.000000e+00 : f32
    %247 = vector.broadcast %cst_64 : f32 to vector<2x96xf32>
    %248 = arith.addf %247, %246 : vector<2x96xf32>
    %249 = arith.divf %247, %248 : vector<2x96xf32>
    %250 = vector.extract_strided_slice %227 {offsets = [0, 96], sizes = [2, 32], strides = [1, 1]} : vector<2x128xf32> to vector<2x32xf32>
    %251 = math.tanh %250 : vector<2x32xf32>
    %252 = vector.extract_strided_slice %249 {offsets = [0, 32], sizes = [2, 32], strides = [1, 1]} : vector<2x96xf32> to vector<2x32xf32>
    %253 = arith.mulf %252, %214 : vector<2x32xf32>
    %254 = vector.extract_strided_slice %249 {offsets = [0, 0], sizes = [2, 32], strides = [1, 1]} : vector<2x96xf32> to vector<2x32xf32>
    %255 = arith.mulf %254, %251 : vector<2x32xf32>
    %256 = arith.addf %253, %255 : vector<2x32xf32>
    %257 = vector.extract_strided_slice %249 {offsets = [0, 64], sizes = [2, 32], strides = [1, 1]} : vector<2x96xf32> to vector<2x32xf32>
    %258 = math.tanh %256 : vector<2x32xf32>
    %259 = arith.mulf %257, %258 : vector<2x32xf32>
    %c10_65 = arith.constant 10 : index
    %c0_66 = arith.constant 0 : index
    %260 = vector.load %arg4[%c10_65, %c0_66] : memref<16x64xf32, #tpu.memory_space<vmem>>, vector<2x32xf32>
    tpu.vector_store %arg4[%c10_65, %c0_66], %243 {strides = array<i32>} : memref<16x64xf32, #tpu.memory_space<vmem>>, vector<2x32xf32>,
    %c4_67 = arith.constant 4 : index
    %c32_68 = arith.constant 32 : index
    %261 = vector.load %arg4[%c4_67, %c32_68] : memref<16x64xf32, #tpu.memory_space<vmem>>, vector<2x32xf32>
    tpu.vector_store %arg4[%c4_67, %c32_68], %259 {strides = array<i32>} : memref<16x64xf32, #tpu.memory_space<vmem>>, vector<2x32xf32>,
    %262 = tpu.concatenate %243, %259 in 1 : vector<2x32xf32>, vector<2x32xf32> -> vector<2x64xf32>
    %cst_69 = arith.constant dense<0.000000e+00> : vector<2x256xf32>
    %263 = tpu.matmul %262, %7, %cst_69 {dimension_numbers = #tpu.dot_dimension_numbers<[1], [0], [0], [1], [0, 0, 1, 1], [], []>} : vector<2x64xf32>, vector<64x256xf32>, vector<2x256xf32> -> vector<2x256xf32>
    %c12_70 = arith.constant 12 : index
    %c0_71 = arith.constant 0 : index
    %264 = vector.load %arg5[%c12_70, %c0_71] : memref<16x256xf32, #tpu.memory_space<vmem>>, vector<2x128xf32>
    %265 = vector.extract_strided_slice %263 {offsets = [0, 0], sizes = [2, 128], strides = [1, 1]} : vector<2x256xf32> to vector<2x128xf32>
    %266 = arith.addf %264, %265 : vector<2x128xf32>
    %c2_72 = arith.constant 2 : index
    %c128_73 = arith.constant 128 : index
    %267 = vector.load %arg5[%c2_72, %c128_73] : memref<16x256xf32, #tpu.memory_space<vmem>>, vector<2x128xf32>
    %268 = vector.extract_strided_slice %263 {offsets = [0, 128], sizes = [2, 128], strides = [1, 1]} : vector<2x256xf32> to vector<2x128xf32>
    %269 = arith.addf %267, %268 : vector<2x128xf32>
    %270 = vector.extract_strided_slice %266 {offsets = [0, 0], sizes = [2, 96], strides = [1, 1]} : vector<2x128xf32> to vector<2x96xf32>
    %271 = arith.negf %270 : vector<2x96xf32>
    %272 = math.exp %271 : vector<2x96xf32>
    %cst_74 = arith.constant 1.000000e+00 : f32
    %273 = vector.broadcast %cst_74 : f32 to vector<2x96xf32>
    %274 = arith.addf %273, %272 : vector<2x96xf32>
    %275 = arith.divf %273, %274 : vector<2x96xf32>
    %276 = vector.extract_strided_slice %266 {offsets = [0, 96], sizes = [2, 32], strides = [1, 1]} : vector<2x128xf32> to vector<2x32xf32>
    %277 = math.tanh %276 : vector<2x32xf32>
    %278 = vector.extract_strided_slice %275 {offsets = [0, 32], sizes = [2, 32], strides = [1, 1]} : vector<2x96xf32> to vector<2x32xf32>
    %279 = arith.mulf %278, %240 : vector<2x32xf32>
    %280 = vector.extract_strided_slice %275 {offsets = [0, 0], sizes = [2, 32], strides = [1, 1]} : vector<2x96xf32> to vector<2x32xf32>
    %281 = arith.mulf %280, %277 : vector<2x32xf32>
    %282 = arith.addf %279, %281 : vector<2x32xf32>
    %283 = vector.extract_strided_slice %275 {offsets = [0, 64], sizes = [2, 32], strides = [1, 1]} : vector<2x96xf32> to vector<2x32xf32>
    %284 = math.tanh %282 : vector<2x32xf32>
    %285 = arith.mulf %283, %284 : vector<2x32xf32>
    %286 = vector.extract_strided_slice %269 {offsets = [0, 0], sizes = [2, 96], strides = [1, 1]} : vector<2x128xf32> to vector<2x96xf32>
    %287 = arith.negf %286 : vector<2x96xf32>
    %288 = math.exp %287 : vector<2x96xf32>
    %cst_75 = arith.constant 1.000000e+00 : f32
    %289 = vector.broadcast %cst_75 : f32 to vector<2x96xf32>
    %290 = arith.addf %289, %288 : vector<2x96xf32>
    %291 = arith.divf %289, %290 : vector<2x96xf32>
    %292 = vector.extract_strided_slice %269 {offsets = [0, 96], sizes = [2, 32], strides = [1, 1]} : vector<2x128xf32> to vector<2x32xf32>
    %293 = math.tanh %292 : vector<2x32xf32>
    %294 = vector.extract_strided_slice %291 {offsets = [0, 32], sizes = [2, 32], strides = [1, 1]} : vector<2x96xf32> to vector<2x32xf32>
    %295 = arith.mulf %294, %256 : vector<2x32xf32>
    %296 = vector.extract_strided_slice %291 {offsets = [0, 0], sizes = [2, 32], strides = [1, 1]} : vector<2x96xf32> to vector<2x32xf32>
    %297 = arith.mulf %296, %293 : vector<2x32xf32>
    %298 = arith.addf %295, %297 : vector<2x32xf32>
    %299 = vector.extract_strided_slice %291 {offsets = [0, 64], sizes = [2, 32], strides = [1, 1]} : vector<2x96xf32> to vector<2x32xf32>
    %300 = math.tanh %298 : vector<2x32xf32>
    %301 = arith.mulf %299, %300 : vector<2x32xf32>
    %c12_76 = arith.constant 12 : index
    %c0_77 = arith.constant 0 : index
    %302 = vector.load %arg4[%c12_76, %c0_77] : memref<16x64xf32, #tpu.memory_space<vmem>>, vector<2x32xf32>
    tpu.vector_store %arg4[%c12_76, %c0_77], %285 {strides = array<i32>} : memref<16x64xf32, #tpu.memory_space<vmem>>, vector<2x32xf32>,
    %c2_78 = arith.constant 2 : index
    %c32_79 = arith.constant 32 : index
    %303 = vector.load %arg4[%c2_78, %c32_79] : memref<16x64xf32, #tpu.memory_space<vmem>>, vector<2x32xf32>
    tpu.vector_store %arg4[%c2_78, %c32_79], %301 {strides = array<i32>} : memref<16x64xf32, #tpu.memory_space<vmem>>, vector<2x32xf32>,
    %304 = tpu.concatenate %285, %301 in 1 : vector<2x32xf32>, vector<2x32xf32> -> vector<2x64xf32>
    %cst_80 = arith.constant dense<0.000000e+00> : vector<2x256xf32>
    %305 = tpu.matmul %304, %7, %cst_80 {dimension_numbers = #tpu.dot_dimension_numbers<[1], [0], [0], [1], [0, 0, 1, 1], [], []>} : vector<2x64xf32>, vector<64x256xf32>, vector<2x256xf32> -> vector<2x256xf32>
    %c14_81 = arith.constant 14 : index
    %c0_82 = arith.constant 0 : index
    %306 = vector.load %arg5[%c14_81, %c0_82] : memref<16x256xf32, #tpu.memory_space<vmem>>, vector<2x128xf32>
    %307 = vector.extract_strided_slice %305 {offsets = [0, 0], sizes = [2, 128], strides = [1, 1]} : vector<2x256xf32> to vector<2x128xf32>
    %308 = arith.addf %306, %307 : vector<2x128xf32>
    %c0_83 = arith.constant 0 : index
    %c128_84 = arith.constant 128 : index
    %309 = vector.load %arg5[%c0_83, %c128_84] : memref<16x256xf32, #tpu.memory_space<vmem>>, vector<2x128xf32>
    %310 = vector.extract_strided_slice %305 {offsets = [0, 128], sizes = [2, 128], strides = [1, 1]} : vector<2x256xf32> to vector<2x128xf32>
    %311 = arith.addf %309, %310 : vector<2x128xf32>
    %312 = vector.extract_strided_slice %308 {offsets = [0, 0], sizes = [2, 96], strides = [1, 1]} : vector<2x128xf32> to vector<2x96xf32>
    %313 = arith.negf %312 : vector<2x96xf32>
    %314 = math.exp %313 : vector<2x96xf32>
    %cst_85 = arith.constant 1.000000e+00 : f32
    %315 = vector.broadcast %cst_85 : f32 to vector<2x96xf32>
    %316 = arith.addf %315, %314 : vector<2x96xf32>
    %317 = arith.divf %315, %316 : vector<2x96xf32>
    %318 = vector.extract_strided_slice %308 {offsets = [0, 96], sizes = [2, 32], strides = [1, 1]} : vector<2x128xf32> to vector<2x32xf32>
    %319 = math.tanh %318 : vector<2x32xf32>
    %320 = vector.extract_strided_slice %317 {offsets = [0, 32], sizes = [2, 32], strides = [1, 1]} : vector<2x96xf32> to vector<2x32xf32>
    %321 = arith.mulf %320, %282 : vector<2x32xf32>
    %322 = vector.extract_strided_slice %317 {offsets = [0, 0], sizes = [2, 32], strides = [1, 1]} : vector<2x96xf32> to vector<2x32xf32>
    %323 = arith.mulf %322, %319 : vector<2x32xf32>
    %324 = arith.addf %321, %323 : vector<2x32xf32>
    %325 = vector.extract_strided_slice %317 {offsets = [0, 64], sizes = [2, 32], strides = [1, 1]} : vector<2x96xf32> to vector<2x32xf32>
    %326 = math.tanh %324 : vector<2x32xf32>
    %327 = arith.mulf %325, %326 : vector<2x32xf32>
    %328 = vector.extract_strided_slice %311 {offsets = [0, 0], sizes = [2, 96], strides = [1, 1]} : vector<2x128xf32> to vector<2x96xf32>
    %329 = arith.negf %328 : vector<2x96xf32>
    %330 = math.exp %329 : vector<2x96xf32>
    %cst_86 = arith.constant 1.000000e+00 : f32
    %331 = vector.broadcast %cst_86 : f32 to vector<2x96xf32>
    %332 = arith.addf %331, %330 : vector<2x96xf32>
    %333 = arith.divf %331, %332 : vector<2x96xf32>
    %334 = vector.extract_strided_slice %311 {offsets = [0, 96], sizes = [2, 32], strides = [1, 1]} : vector<2x128xf32> to vector<2x32xf32>
    %335 = math.tanh %334 : vector<2x32xf32>
    %336 = vector.extract_strided_slice %333 {offsets = [0, 32], sizes = [2, 32], strides = [1, 1]} : vector<2x96xf32> to vector<2x32xf32>
    %337 = arith.mulf %336, %298 : vector<2x32xf32>
    %338 = vector.extract_strided_slice %333 {offsets = [0, 0], sizes = [2, 32], strides = [1, 1]} : vector<2x96xf32> to vector<2x32xf32>
    %339 = arith.mulf %338, %335 : vector<2x32xf32>
    %340 = arith.addf %337, %339 : vector<2x32xf32>
    %341 = vector.extract_strided_slice %333 {offsets = [0, 64], sizes = [2, 32], strides = [1, 1]} : vector<2x96xf32> to vector<2x32xf32>
    %342 = math.tanh %340 : vector<2x32xf32>
    %343 = arith.mulf %341, %342 : vector<2x32xf32>
    %c14_87 = arith.constant 14 : index
    %c0_88 = arith.constant 0 : index
    %344 = vector.load %arg4[%c14_87, %c0_88] : memref<16x64xf32, #tpu.memory_space<vmem>>, vector<2x32xf32>
    tpu.vector_store %arg4[%c14_87, %c0_88], %327 {strides = array<i32>} : memref<16x64xf32, #tpu.memory_space<vmem>>, vector<2x32xf32>,
    %c0_89 = arith.constant 0 : index
    %c32_90 = arith.constant 32 : index
    %345 = vector.load %arg4[%c0_89, %c32_90] : memref<16x64xf32, #tpu.memory_space<vmem>>, vector<2x32xf32>
    tpu.vector_store %arg4[%c0_89, %c32_90], %343 {strides = array<i32>} : memref<16x64xf32, #tpu.memory_space<vmem>>, vector<2x32xf32>,
    return
  }
}

module attributes {stable_mosaic.version = 11 : i64} {
  func.func @_bilstm_layer_kernel(%arg0: memref<16x16xf32, #tpu.memory_space<vmem>>, %arg1: memref<16x256xf32, #tpu.memory_space<vmem>>, %arg2: memref<1x256xf32, #tpu.memory_space<vmem>>, %arg3: memref<64x256xf32, #tpu.memory_space<vmem>>, %arg4: memref<16x64xf32, #tpu.memory_space<vmem>>, %arg5: memref<16x256xf32, #tpu.memory_space<vmem>>) attributes {dimension_semantics = [], scalar_prefetch = 0 : i64, scratch_operands = 1 : i64, tpu.core_type = #tpu.core_type<tc>} {
    %c0 = arith.constant 0 : index
    %c0_0 = arith.constant 0 : index
    %0 = vector.load %arg0[%c0, %c0_0] : memref<16x16xf32, #tpu.memory_space<vmem>>, vector<16x16xf32>
    %c0_1 = arith.constant 0 : index
    %c0_2 = arith.constant 0 : index
    %1 = vector.load %arg1[%c0_1, %c0_2] : memref<16x256xf32, #tpu.memory_space<vmem>>, vector<16x256xf32>
    %cst = arith.constant dense<0.000000e+00> : vector<16x256xf32>
    %2 = tpu.matmul %0, %1, %cst {dimension_numbers = #tpu.dot_dimension_numbers<[1], [0], [0], [1], [0, 0, 1, 1], [], []>} : vector<16x16xf32>, vector<16x256xf32>, vector<16x256xf32> -> vector<16x256xf32>
    %c0_3 = arith.constant 0 : index
    %c0_4 = arith.constant 0 : index
    %3 = vector.load %arg2[%c0_3, %c0_4] : memref<1x256xf32, #tpu.memory_space<vmem>>, vector<1x256xf32>
    %4 = vector.broadcast %3 : vector<1x256xf32> to vector<16x256xf32>
    %5 = arith.addf %2, %4 : vector<16x256xf32>
    %c0_5 = arith.constant 0 : index
    %c0_6 = arith.constant 0 : index
    %6 = vector.load %arg5[%c0_5, %c0_6] : memref<16x256xf32, #tpu.memory_space<vmem>>, vector<16x256xf32>
    tpu.vector_store %arg5[%c0_5, %c0_6], %5 {strides = array<i32>} : memref<16x256xf32, #tpu.memory_space<vmem>>, vector<16x256xf32>,
    %c0_7 = arith.constant 0 : index
    %c0_8 = arith.constant 0 : index
    %7 = vector.load %arg3[%c0_7, %c0_8] : memref<64x256xf32, #tpu.memory_space<vmem>>, vector<64x256xf32>
    %cst_9 = arith.constant 0.000000e+00 : f32
    %8 = vector.broadcast %cst_9 : f32 to vector<2x64xf32>
    %cst_10 = arith.constant 0.000000e+00 : f32
    %9 = vector.broadcast %cst_10 : f32 to vector<2x32xf32>
    %cst_11 = arith.constant 0.000000e+00 : f32
    %10 = vector.broadcast %cst_11 : f32 to vector<2x32xf32>
    %cst_12 = arith.constant dense<0.000000e+00> : vector<2x256xf32>
    %11 = tpu.matmul %8, %7, %cst_12 {dimension_numbers = #tpu.dot_dimension_numbers<[1], [0], [0], [1], [0, 0, 1, 1], [], []>} : vector<2x64xf32>, vector<64x256xf32>, vector<2x256xf32> -> vector<2x256xf32>
    %c0_13 = arith.constant 0 : index
    %c0_14 = arith.constant 0 : index
    %12 = vector.load %arg5[%c0_13, %c0_14] : memref<16x256xf32, #tpu.memory_space<vmem>>, vector<2x128xf32>
    %13 = vector.extract_strided_slice %11 {offsets = [0, 0], sizes = [2, 128], strides = [1, 1]} : vector<2x256xf32> to vector<2x128xf32>
    %14 = arith.addf %12, %13 : vector<2x128xf32>
    %c14 = arith.constant 14 : index
    %c128 = arith.constant 128 : index
    %15 = vector.load %arg5[%c14, %c128] : memref<16x256xf32, #tpu.memory_space<vmem>>, vector<2x128xf32>
    %16 = vector.extract_strided_slice %11 {offsets = [0, 128], sizes = [2, 128], strides = [1, 1]} : vector<2x256xf32> to vector<2x128xf32>
    %17 = arith.addf %15, %16 : vector<2x128xf32>
    %18 = vector.extract_strided_slice %14 {offsets = [0, 0], sizes = [2, 96], strides = [1, 1]} : vector<2x128xf32> to vector<2x96xf32>
    %19 = arith.negf %18 : vector<2x96xf32>
    %20 = math.exp %19 : vector<2x96xf32>
    %cst_15 = arith.constant 1.000000e+00 : f32
    %21 = vector.broadcast %cst_15 : f32 to vector<2x96xf32>
    %22 = arith.addf %21, %20 : vector<2x96xf32>
    %23 = arith.divf %21, %22 : vector<2x96xf32>
    %24 = vector.extract_strided_slice %14 {offsets = [0, 96], sizes = [2, 32], strides = [1, 1]} : vector<2x128xf32> to vector<2x32xf32>
    %25 = math.tanh %24 : vector<2x32xf32>
    %26 = vector.extract_strided_slice %23 {offsets = [0, 32], sizes = [2, 32], strides = [1, 1]} : vector<2x96xf32> to vector<2x32xf32>
    %27 = arith.mulf %26, %9 : vector<2x32xf32>
    %28 = vector.extract_strided_slice %23 {offsets = [0, 0], sizes = [2, 32], strides = [1, 1]} : vector<2x96xf32> to vector<2x32xf32>
    %29 = arith.mulf %28, %25 : vector<2x32xf32>
    %30 = arith.addf %27, %29 : vector<2x32xf32>
    %31 = vector.extract_strided_slice %23 {offsets = [0, 64], sizes = [2, 32], strides = [1, 1]} : vector<2x96xf32> to vector<2x32xf32>
    %32 = math.tanh %30 : vector<2x32xf32>
    %33 = arith.mulf %31, %32 : vector<2x32xf32>
    %34 = vector.extract_strided_slice %17 {offsets = [0, 0], sizes = [2, 96], strides = [1, 1]} : vector<2x128xf32> to vector<2x96xf32>
    %35 = arith.negf %34 : vector<2x96xf32>
    %36 = math.exp %35 : vector<2x96xf32>
    %cst_16 = arith.constant 1.000000e+00 : f32
    %37 = vector.broadcast %cst_16 : f32 to vector<2x96xf32>
    %38 = arith.addf %37, %36 : vector<2x96xf32>
    %39 = arith.divf %37, %38 : vector<2x96xf32>
    %40 = vector.extract_strided_slice %17 {offsets = [0, 96], sizes = [2, 32], strides = [1, 1]} : vector<2x128xf32> to vector<2x32xf32>
    %41 = math.tanh %40 : vector<2x32xf32>
    %42 = vector.extract_strided_slice %39 {offsets = [0, 32], sizes = [2, 32], strides = [1, 1]} : vector<2x96xf32> to vector<2x32xf32>
    %43 = arith.mulf %42, %10 : vector<2x32xf32>
    %44 = vector.extract_strided_slice %39 {offsets = [0, 0], sizes = [2, 32], strides = [1, 1]} : vector<2x96xf32> to vector<2x32xf32>
    %45 = arith.mulf %44, %41 : vector<2x32xf32>
    %46 = arith.addf %43, %45 : vector<2x32xf32>
    %47 = vector.extract_strided_slice %39 {offsets = [0, 64], sizes = [2, 32], strides = [1, 1]} : vector<2x96xf32> to vector<2x32xf32>
    %48 = math.tanh %46 : vector<2x32xf32>
    %49 = arith.mulf %47, %48 : vector<2x32xf32>
    %c0_17 = arith.constant 0 : index
    %c0_18 = arith.constant 0 : index
    %50 = vector.load %arg4[%c0_17, %c0_18] : memref<16x64xf32, #tpu.memory_space<vmem>>, vector<2x32xf32>
    tpu.vector_store %arg4[%c0_17, %c0_18], %33 {strides = array<i32>} : memref<16x64xf32, #tpu.memory_space<vmem>>, vector<2x32xf32>,
    %c14_19 = arith.constant 14 : index
    %c32 = arith.constant 32 : index
    %51 = vector.load %arg4[%c14_19, %c32] : memref<16x64xf32, #tpu.memory_space<vmem>>, vector<2x32xf32>
    tpu.vector_store %arg4[%c14_19, %c32], %49 {strides = array<i32>} : memref<16x64xf32, #tpu.memory_space<vmem>>, vector<2x32xf32>,
    %52 = tpu.concatenate %33, %49 in 1 : vector<2x32xf32>, vector<2x32xf32> -> vector<2x64xf32>
    %cst_20 = arith.constant dense<0.000000e+00> : vector<2x256xf32>
    %53 = tpu.matmul %52, %7, %cst_20 {dimension_numbers = #tpu.dot_dimension_numbers<[1], [0], [0], [1], [0, 0, 1, 1], [], []>} : vector<2x64xf32>, vector<64x256xf32>, vector<2x256xf32> -> vector<2x256xf32>
    %c2 = arith.constant 2 : index
    %c0_21 = arith.constant 0 : index
    %54 = vector.load %arg5[%c2, %c0_21] : memref<16x256xf32, #tpu.memory_space<vmem>>, vector<2x128xf32>
    %55 = vector.extract_strided_slice %53 {offsets = [0, 0], sizes = [2, 128], strides = [1, 1]} : vector<2x256xf32> to vector<2x128xf32>
    %56 = arith.addf %54, %55 : vector<2x128xf32>
    %c12 = arith.constant 12 : index
    %c128_22 = arith.constant 128 : index
    %57 = vector.load %arg5[%c12, %c128_22] : memref<16x256xf32, #tpu.memory_space<vmem>>, vector<2x128xf32>
    %58 = vector.extract_strided_slice %53 {offsets = [0, 128], sizes = [2, 128], strides = [1, 1]} : vector<2x256xf32> to vector<2x128xf32>
    %59 = arith.addf %57, %58 : vector<2x128xf32>
    %60 = vector.extract_strided_slice %56 {offsets = [0, 0], sizes = [2, 96], strides = [1, 1]} : vector<2x128xf32> to vector<2x96xf32>
    %61 = arith.negf %60 : vector<2x96xf32>
    %62 = math.exp %61 : vector<2x96xf32>
    %cst_23 = arith.constant 1.000000e+00 : f32
    %63 = vector.broadcast %cst_23 : f32 to vector<2x96xf32>
    %64 = arith.addf %63, %62 : vector<2x96xf32>
    %65 = arith.divf %63, %64 : vector<2x96xf32>
    %66 = vector.extract_strided_slice %56 {offsets = [0, 96], sizes = [2, 32], strides = [1, 1]} : vector<2x128xf32> to vector<2x32xf32>
    %67 = math.tanh %66 : vector<2x32xf32>
    %68 = vector.extract_strided_slice %65 {offsets = [0, 32], sizes = [2, 32], strides = [1, 1]} : vector<2x96xf32> to vector<2x32xf32>
    %69 = arith.mulf %68, %30 : vector<2x32xf32>
    %70 = vector.extract_strided_slice %65 {offsets = [0, 0], sizes = [2, 32], strides = [1, 1]} : vector<2x96xf32> to vector<2x32xf32>
    %71 = arith.mulf %70, %67 : vector<2x32xf32>
    %72 = arith.addf %69, %71 : vector<2x32xf32>
    %73 = vector.extract_strided_slice %65 {offsets = [0, 64], sizes = [2, 32], strides = [1, 1]} : vector<2x96xf32> to vector<2x32xf32>
    %74 = math.tanh %72 : vector<2x32xf32>
    %75 = arith.mulf %73, %74 : vector<2x32xf32>
    %76 = vector.extract_strided_slice %59 {offsets = [0, 0], sizes = [2, 96], strides = [1, 1]} : vector<2x128xf32> to vector<2x96xf32>
    %77 = arith.negf %76 : vector<2x96xf32>
    %78 = math.exp %77 : vector<2x96xf32>
    %cst_24 = arith.constant 1.000000e+00 : f32
    %79 = vector.broadcast %cst_24 : f32 to vector<2x96xf32>
    %80 = arith.addf %79, %78 : vector<2x96xf32>
    %81 = arith.divf %79, %80 : vector<2x96xf32>
    %82 = vector.extract_strided_slice %59 {offsets = [0, 96], sizes = [2, 32], strides = [1, 1]} : vector<2x128xf32> to vector<2x32xf32>
    %83 = math.tanh %82 : vector<2x32xf32>
    %84 = vector.extract_strided_slice %81 {offsets = [0, 32], sizes = [2, 32], strides = [1, 1]} : vector<2x96xf32> to vector<2x32xf32>
    %85 = arith.mulf %84, %46 : vector<2x32xf32>
    %86 = vector.extract_strided_slice %81 {offsets = [0, 0], sizes = [2, 32], strides = [1, 1]} : vector<2x96xf32> to vector<2x32xf32>
    %87 = arith.mulf %86, %83 : vector<2x32xf32>
    %88 = arith.addf %85, %87 : vector<2x32xf32>
    %89 = vector.extract_strided_slice %81 {offsets = [0, 64], sizes = [2, 32], strides = [1, 1]} : vector<2x96xf32> to vector<2x32xf32>
    %90 = math.tanh %88 : vector<2x32xf32>
    %91 = arith.mulf %89, %90 : vector<2x32xf32>
    %c2_25 = arith.constant 2 : index
    %c0_26 = arith.constant 0 : index
    %92 = vector.load %arg4[%c2_25, %c0_26] : memref<16x64xf32, #tpu.memory_space<vmem>>, vector<2x32xf32>
    tpu.vector_store %arg4[%c2_25, %c0_26], %75 {strides = array<i32>} : memref<16x64xf32, #tpu.memory_space<vmem>>, vector<2x32xf32>,
    %c12_27 = arith.constant 12 : index
    %c32_28 = arith.constant 32 : index
    %93 = vector.load %arg4[%c12_27, %c32_28] : memref<16x64xf32, #tpu.memory_space<vmem>>, vector<2x32xf32>
    tpu.vector_store %arg4[%c12_27, %c32_28], %91 {strides = array<i32>} : memref<16x64xf32, #tpu.memory_space<vmem>>, vector<2x32xf32>,
    %94 = tpu.concatenate %75, %91 in 1 : vector<2x32xf32>, vector<2x32xf32> -> vector<2x64xf32>
    %cst_29 = arith.constant dense<0.000000e+00> : vector<2x256xf32>
    %95 = tpu.matmul %94, %7, %cst_29 {dimension_numbers = #tpu.dot_dimension_numbers<[1], [0], [0], [1], [0, 0, 1, 1], [], []>} : vector<2x64xf32>, vector<64x256xf32>, vector<2x256xf32> -> vector<2x256xf32>
    %c4 = arith.constant 4 : index
    %c0_30 = arith.constant 0 : index
    %96 = vector.load %arg5[%c4, %c0_30] : memref<16x256xf32, #tpu.memory_space<vmem>>, vector<2x128xf32>
    %97 = vector.extract_strided_slice %95 {offsets = [0, 0], sizes = [2, 128], strides = [1, 1]} : vector<2x256xf32> to vector<2x128xf32>
    %98 = arith.addf %96, %97 : vector<2x128xf32>
    %c10 = arith.constant 10 : index
    %c128_31 = arith.constant 128 : index
    %99 = vector.load %arg5[%c10, %c128_31] : memref<16x256xf32, #tpu.memory_space<vmem>>, vector<2x128xf32>
    %100 = vector.extract_strided_slice %95 {offsets = [0, 128], sizes = [2, 128], strides = [1, 1]} : vector<2x256xf32> to vector<2x128xf32>
    %101 = arith.addf %99, %100 : vector<2x128xf32>
    %102 = vector.extract_strided_slice %98 {offsets = [0, 0], sizes = [2, 96], strides = [1, 1]} : vector<2x128xf32> to vector<2x96xf32>
    %103 = arith.negf %102 : vector<2x96xf32>
    %104 = math.exp %103 : vector<2x96xf32>
    %cst_32 = arith.constant 1.000000e+00 : f32
    %105 = vector.broadcast %cst_32 : f32 to vector<2x96xf32>
    %106 = arith.addf %105, %104 : vector<2x96xf32>
    %107 = arith.divf %105, %106 : vector<2x96xf32>
    %108 = vector.extract_strided_slice %98 {offsets = [0, 96], sizes = [2, 32], strides = [1, 1]} : vector<2x128xf32> to vector<2x32xf32>
    %109 = math.tanh %108 : vector<2x32xf32>
    %110 = vector.extract_strided_slice %107 {offsets = [0, 32], sizes = [2, 32], strides = [1, 1]} : vector<2x96xf32> to vector<2x32xf32>
    %111 = arith.mulf %110, %72 : vector<2x32xf32>
    %112 = vector.extract_strided_slice %107 {offsets = [0, 0], sizes = [2, 32], strides = [1, 1]} : vector<2x96xf32> to vector<2x32xf32>
    %113 = arith.mulf %112, %109 : vector<2x32xf32>
    %114 = arith.addf %111, %113 : vector<2x32xf32>
    %115 = vector.extract_strided_slice %107 {offsets = [0, 64], sizes = [2, 32], strides = [1, 1]} : vector<2x96xf32> to vector<2x32xf32>
    %116 = math.tanh %114 : vector<2x32xf32>
    %117 = arith.mulf %115, %116 : vector<2x32xf32>
    %118 = vector.extract_strided_slice %101 {offsets = [0, 0], sizes = [2, 96], strides = [1, 1]} : vector<2x128xf32> to vector<2x96xf32>
    %119 = arith.negf %118 : vector<2x96xf32>
    %120 = math.exp %119 : vector<2x96xf32>
    %cst_33 = arith.constant 1.000000e+00 : f32
    %121 = vector.broadcast %cst_33 : f32 to vector<2x96xf32>
    %122 = arith.addf %121, %120 : vector<2x96xf32>
    %123 = arith.divf %121, %122 : vector<2x96xf32>
    %124 = vector.extract_strided_slice %101 {offsets = [0, 96], sizes = [2, 32], strides = [1, 1]} : vector<2x128xf32> to vector<2x32xf32>
    %125 = math.tanh %124 : vector<2x32xf32>
    %126 = vector.extract_strided_slice %123 {offsets = [0, 32], sizes = [2, 32], strides = [1, 1]} : vector<2x96xf32> to vector<2x32xf32>
    %127 = arith.mulf %126, %88 : vector<2x32xf32>
    %128 = vector.extract_strided_slice %123 {offsets = [0, 0], sizes = [2, 32], strides = [1, 1]} : vector<2x96xf32> to vector<2x32xf32>
    %129 = arith.mulf %128, %125 : vector<2x32xf32>
    %130 = arith.addf %127, %129 : vector<2x32xf32>
    %131 = vector.extract_strided_slice %123 {offsets = [0, 64], sizes = [2, 32], strides = [1, 1]} : vector<2x96xf32> to vector<2x32xf32>
    %132 = math.tanh %130 : vector<2x32xf32>
    %133 = arith.mulf %131, %132 : vector<2x32xf32>
    %c4_34 = arith.constant 4 : index
    %c0_35 = arith.constant 0 : index
    %134 = vector.load %arg4[%c4_34, %c0_35] : memref<16x64xf32, #tpu.memory_space<vmem>>, vector<2x32xf32>
    tpu.vector_store %arg4[%c4_34, %c0_35], %117 {strides = array<i32>} : memref<16x64xf32, #tpu.memory_space<vmem>>, vector<2x32xf32>,
    %c10_36 = arith.constant 10 : index
    %c32_37 = arith.constant 32 : index
    %135 = vector.load %arg4[%c10_36, %c32_37] : memref<16x64xf32, #tpu.memory_space<vmem>>, vector<2x32xf32>
    tpu.vector_store %arg4[%c10_36, %c32_37], %133 {strides = array<i32>} : memref<16x64xf32, #tpu.memory_space<vmem>>, vector<2x32xf32>,
    %136 = tpu.concatenate %117, %133 in 1 : vector<2x32xf32>, vector<2x32xf32> -> vector<2x64xf32>
    %cst_38 = arith.constant dense<0.000000e+00> : vector<2x256xf32>
    %137 = tpu.matmul %136, %7, %cst_38 {dimension_numbers = #tpu.dot_dimension_numbers<[1], [0], [0], [1], [0, 0, 1, 1], [], []>} : vector<2x64xf32>, vector<64x256xf32>, vector<2x256xf32> -> vector<2x256xf32>
    %c6 = arith.constant 6 : index
    %c0_39 = arith.constant 0 : index
    %138 = vector.load %arg5[%c6, %c0_39] : memref<16x256xf32, #tpu.memory_space<vmem>>, vector<2x128xf32>
    %139 = vector.extract_strided_slice %137 {offsets = [0, 0], sizes = [2, 128], strides = [1, 1]} : vector<2x256xf32> to vector<2x128xf32>
    %140 = arith.addf %138, %139 : vector<2x128xf32>
    %c8 = arith.constant 8 : index
    %c128_40 = arith.constant 128 : index
    %141 = vector.load %arg5[%c8, %c128_40] : memref<16x256xf32, #tpu.memory_space<vmem>>, vector<2x128xf32>
    %142 = vector.extract_strided_slice %137 {offsets = [0, 128], sizes = [2, 128], strides = [1, 1]} : vector<2x256xf32> to vector<2x128xf32>
    %143 = arith.addf %141, %142 : vector<2x128xf32>
    %144 = vector.extract_strided_slice %140 {offsets = [0, 0], sizes = [2, 96], strides = [1, 1]} : vector<2x128xf32> to vector<2x96xf32>
    %145 = arith.negf %144 : vector<2x96xf32>
    %146 = math.exp %145 : vector<2x96xf32>
    %cst_41 = arith.constant 1.000000e+00 : f32
    %147 = vector.broadcast %cst_41 : f32 to vector<2x96xf32>
    %148 = arith.addf %147, %146 : vector<2x96xf32>
    %149 = arith.divf %147, %148 : vector<2x96xf32>
    %150 = vector.extract_strided_slice %140 {offsets = [0, 96], sizes = [2, 32], strides = [1, 1]} : vector<2x128xf32> to vector<2x32xf32>
    %151 = math.tanh %150 : vector<2x32xf32>
    %152 = vector.extract_strided_slice %149 {offsets = [0, 32], sizes = [2, 32], strides = [1, 1]} : vector<2x96xf32> to vector<2x32xf32>
    %153 = arith.mulf %152, %114 : vector<2x32xf32>
    %154 = vector.extract_strided_slice %149 {offsets = [0, 0], sizes = [2, 32], strides = [1, 1]} : vector<2x96xf32> to vector<2x32xf32>
    %155 = arith.mulf %154, %151 : vector<2x32xf32>
    %156 = arith.addf %153, %155 : vector<2x32xf32>
    %157 = vector.extract_strided_slice %149 {offsets = [0, 64], sizes = [2, 32], strides = [1, 1]} : vector<2x96xf32> to vector<2x32xf32>
    %158 = math.tanh %156 : vector<2x32xf32>
    %159 = arith.mulf %157, %158 : vector<2x32xf32>
    %160 = vector.extract_strided_slice %143 {offsets = [0, 0], sizes = [2, 96], strides = [1, 1]} : vector<2x128xf32> to vector<2x96xf32>
    %161 = arith.negf %160 : vector<2x96xf32>
    %162 = math.exp %161 : vector<2x96xf32>
    %cst_42 = arith.constant 1.000000e+00 : f32
    %163 = vector.broadcast %cst_42 : f32 to vector<2x96xf32>
    %164 = arith.addf %163, %162 : vector<2x96xf32>
    %165 = arith.divf %163, %164 : vector<2x96xf32>
    %166 = vector.extract_strided_slice %143 {offsets = [0, 96], sizes = [2, 32], strides = [1, 1]} : vector<2x128xf32> to vector<2x32xf32>
    %167 = math.tanh %166 : vector<2x32xf32>
    %168 = vector.extract_strided_slice %165 {offsets = [0, 32], sizes = [2, 32], strides = [1, 1]} : vector<2x96xf32> to vector<2x32xf32>
    %169 = arith.mulf %168, %130 : vector<2x32xf32>
    %170 = vector.extract_strided_slice %165 {offsets = [0, 0], sizes = [2, 32], strides = [1, 1]} : vector<2x96xf32> to vector<2x32xf32>
    %171 = arith.mulf %170, %167 : vector<2x32xf32>
    %172 = arith.addf %169, %171 : vector<2x32xf32>
    %173 = vector.extract_strided_slice %165 {offsets = [0, 64], sizes = [2, 32], strides = [1, 1]} : vector<2x96xf32> to vector<2x32xf32>
    %174 = math.tanh %172 : vector<2x32xf32>
    %175 = arith.mulf %173, %174 : vector<2x32xf32>
    %c6_43 = arith.constant 6 : index
    %c0_44 = arith.constant 0 : index
    %176 = vector.load %arg4[%c6_43, %c0_44] : memref<16x64xf32, #tpu.memory_space<vmem>>, vector<2x32xf32>
    tpu.vector_store %arg4[%c6_43, %c0_44], %159 {strides = array<i32>} : memref<16x64xf32, #tpu.memory_space<vmem>>, vector<2x32xf32>,
    %c8_45 = arith.constant 8 : index
    %c32_46 = arith.constant 32 : index
    %177 = vector.load %arg4[%c8_45, %c32_46] : memref<16x64xf32, #tpu.memory_space<vmem>>, vector<2x32xf32>
    tpu.vector_store %arg4[%c8_45, %c32_46], %175 {strides = array<i32>} : memref<16x64xf32, #tpu.memory_space<vmem>>, vector<2x32xf32>,
    %178 = tpu.concatenate %159, %175 in 1 : vector<2x32xf32>, vector<2x32xf32> -> vector<2x64xf32>
    %cst_47 = arith.constant dense<0.000000e+00> : vector<2x256xf32>
    %179 = tpu.matmul %178, %7, %cst_47 {dimension_numbers = #tpu.dot_dimension_numbers<[1], [0], [0], [1], [0, 0, 1, 1], [], []>} : vector<2x64xf32>, vector<64x256xf32>, vector<2x256xf32> -> vector<2x256xf32>
    %c8_48 = arith.constant 8 : index
    %c0_49 = arith.constant 0 : index
    %180 = vector.load %arg5[%c8_48, %c0_49] : memref<16x256xf32, #tpu.memory_space<vmem>>, vector<2x128xf32>
    %181 = vector.extract_strided_slice %179 {offsets = [0, 0], sizes = [2, 128], strides = [1, 1]} : vector<2x256xf32> to vector<2x128xf32>
    %182 = arith.addf %180, %181 : vector<2x128xf32>
    %c6_50 = arith.constant 6 : index
    %c128_51 = arith.constant 128 : index
    %183 = vector.load %arg5[%c6_50, %c128_51] : memref<16x256xf32, #tpu.memory_space<vmem>>, vector<2x128xf32>
    %184 = vector.extract_strided_slice %179 {offsets = [0, 128], sizes = [2, 128], strides = [1, 1]} : vector<2x256xf32> to vector<2x128xf32>
    %185 = arith.addf %183, %184 : vector<2x128xf32>
    %186 = vector.extract_strided_slice %182 {offsets = [0, 0], sizes = [2, 96], strides = [1, 1]} : vector<2x128xf32> to vector<2x96xf32>
    %187 = arith.negf %186 : vector<2x96xf32>
    %188 = math.exp %187 : vector<2x96xf32>
    %cst_52 = arith.constant 1.000000e+00 : f32
    %189 = vector.broadcast %cst_52 : f32 to vector<2x96xf32>
    %190 = arith.addf %189, %188 : vector<2x96xf32>
    %191 = arith.divf %189, %190 : vector<2x96xf32>
    %192 = vector.extract_strided_slice %182 {offsets = [0, 96], sizes = [2, 32], strides = [1, 1]} : vector<2x128xf32> to vector<2x32xf32>
    %193 = math.tanh %192 : vector<2x32xf32>
    %194 = vector.extract_strided_slice %191 {offsets = [0, 32], sizes = [2, 32], strides = [1, 1]} : vector<2x96xf32> to vector<2x32xf32>
    %195 = arith.mulf %194, %156 : vector<2x32xf32>
    %196 = vector.extract_strided_slice %191 {offsets = [0, 0], sizes = [2, 32], strides = [1, 1]} : vector<2x96xf32> to vector<2x32xf32>
    %197 = arith.mulf %196, %193 : vector<2x32xf32>
    %198 = arith.addf %195, %197 : vector<2x32xf32>
    %199 = vector.extract_strided_slice %191 {offsets = [0, 64], sizes = [2, 32], strides = [1, 1]} : vector<2x96xf32> to vector<2x32xf32>
    %200 = math.tanh %198 : vector<2x32xf32>
    %201 = arith.mulf %199, %200 : vector<2x32xf32>
    %202 = vector.extract_strided_slice %185 {offsets = [0, 0], sizes = [2, 96], strides = [1, 1]} : vector<2x128xf32> to vector<2x96xf32>
    %203 = arith.negf %202 : vector<2x96xf32>
    %204 = math.exp %203 : vector<2x96xf32>
    %cst_53 = arith.constant 1.000000e+00 : f32
    %205 = vector.broadcast %cst_53 : f32 to vector<2x96xf32>
    %206 = arith.addf %205, %204 : vector<2x96xf32>
    %207 = arith.divf %205, %206 : vector<2x96xf32>
    %208 = vector.extract_strided_slice %185 {offsets = [0, 96], sizes = [2, 32], strides = [1, 1]} : vector<2x128xf32> to vector<2x32xf32>
    %209 = math.tanh %208 : vector<2x32xf32>
    %210 = vector.extract_strided_slice %207 {offsets = [0, 32], sizes = [2, 32], strides = [1, 1]} : vector<2x96xf32> to vector<2x32xf32>
    %211 = arith.mulf %210, %172 : vector<2x32xf32>
    %212 = vector.extract_strided_slice %207 {offsets = [0, 0], sizes = [2, 32], strides = [1, 1]} : vector<2x96xf32> to vector<2x32xf32>
    %213 = arith.mulf %212, %209 : vector<2x32xf32>
    %214 = arith.addf %211, %213 : vector<2x32xf32>
    %215 = vector.extract_strided_slice %207 {offsets = [0, 64], sizes = [2, 32], strides = [1, 1]} : vector<2x96xf32> to vector<2x32xf32>
    %216 = math.tanh %214 : vector<2x32xf32>
    %217 = arith.mulf %215, %216 : vector<2x32xf32>
    %c8_54 = arith.constant 8 : index
    %c0_55 = arith.constant 0 : index
    %218 = vector.load %arg4[%c8_54, %c0_55] : memref<16x64xf32, #tpu.memory_space<vmem>>, vector<2x32xf32>
    tpu.vector_store %arg4[%c8_54, %c0_55], %201 {strides = array<i32>} : memref<16x64xf32, #tpu.memory_space<vmem>>, vector<2x32xf32>,
    %c6_56 = arith.constant 6 : index
    %c32_57 = arith.constant 32 : index
    %219 = vector.load %arg4[%c6_56, %c32_57] : memref<16x64xf32, #tpu.memory_space<vmem>>, vector<2x32xf32>
    tpu.vector_store %arg4[%c6_56, %c32_57], %217 {strides = array<i32>} : memref<16x64xf32, #tpu.memory_space<vmem>>, vector<2x32xf32>,
    %220 = tpu.concatenate %201, %217 in 1 : vector<2x32xf32>, vector<2x32xf32> -> vector<2x64xf32>
    %cst_58 = arith.constant dense<0.000000e+00> : vector<2x256xf32>
    %221 = tpu.matmul %220, %7, %cst_58 {dimension_numbers = #tpu.dot_dimension_numbers<[1], [0], [0], [1], [0, 0, 1, 1], [], []>} : vector<2x64xf32>, vector<64x256xf32>, vector<2x256xf32> -> vector<2x256xf32>
    %c10_59 = arith.constant 10 : index
    %c0_60 = arith.constant 0 : index
    %222 = vector.load %arg5[%c10_59, %c0_60] : memref<16x256xf32, #tpu.memory_space<vmem>>, vector<2x128xf32>
    %223 = vector.extract_strided_slice %221 {offsets = [0, 0], sizes = [2, 128], strides = [1, 1]} : vector<2x256xf32> to vector<2x128xf32>
    %224 = arith.addf %222, %223 : vector<2x128xf32>
    %c4_61 = arith.constant 4 : index
    %c128_62 = arith.constant 128 : index
    %225 = vector.load %arg5[%c4_61, %c128_62] : memref<16x256xf32, #tpu.memory_space<vmem>>, vector<2x128xf32>
    %226 = vector.extract_strided_slice %221 {offsets = [0, 128], sizes = [2, 128], strides = [1, 1]} : vector<2x256xf32> to vector<2x128xf32>
    %227 = arith.addf %225, %226 : vector<2x128xf32>
    %228 = vector.extract_strided_slice %224 {offsets = [0, 0], sizes = [2, 96], strides = [1, 1]} : vector<2x128xf32> to vector<2x96xf32>
    %229 = arith.negf %228 : vector<2x96xf32>
    %230 = math.exp %229 : vector<2x96xf32>
    %cst_63 = arith.constant 1.000000e+00 : f32
    %231 = vector.broadcast %cst_63 : f32 to vector<2x96xf32>
    %232 = arith.addf %231, %230 : vector<2x96xf32>
    %233 = arith.divf %231, %232 : vector<2x96xf32>
    %234 = vector.extract_strided_slice %224 {offsets = [0, 96], sizes = [2, 32], strides = [1, 1]} : vector<2x128xf32> to vector<2x32xf32>
    %235 = math.tanh %234 : vector<2x32xf32>
    %236 = vector.extract_strided_slice %233 {offsets = [0, 32], sizes = [2, 32], strides = [1, 1]} : vector<2x96xf32> to vector<2x32xf32>
    %237 = arith.mulf %236, %198 : vector<2x32xf32>
    %238 = vector.extract_strided_slice %233 {offsets = [0, 0], sizes = [2, 32], strides = [1, 1]} : vector<2x96xf32> to vector<2x32xf32>
    %239 = arith.mulf %238, %235 : vector<2x32xf32>
    %240 = arith.addf %237, %239 : vector<2x32xf32>
    %241 = vector.extract_strided_slice %233 {offsets = [0, 64], sizes = [2, 32], strides = [1, 1]} : vector<2x96xf32> to vector<2x32xf32>
    %242 = math.tanh %240 : vector<2x32xf32>
    %243 = arith.mulf %241, %242 : vector<2x32xf32>
    %244 = vector.extract_strided_slice %227 {offsets = [0, 0], sizes = [2, 96], strides = [1, 1]} : vector<2x128xf32> to vector<2x96xf32>
    %245 = arith.negf %244 : vector<2x96xf32>
    %246 = math.exp %245 : vector<2x96xf32>
    %cst_64 = arith.constant 1.000000e+00 : f32
    %247 = vector.broadcast %cst_64 : f32 to vector<2x96xf32>
    %248 = arith.addf %247, %246 : vector<2x96xf32>
    %249 = arith.divf %247, %248 : vector<2x96xf32>
    %250 = vector.extract_strided_slice %227 {offsets = [0, 96], sizes = [2, 32], strides = [1, 1]} : vector<2x128xf32> to vector<2x32xf32>
    %251 = math.tanh %250 : vector<2x32xf32>
    %252 = vector.extract_strided_slice %249 {offsets = [0, 32], sizes = [2, 32], strides = [1, 1]} : vector<2x96xf32> to vector<2x32xf32>
    %253 = arith.mulf %252, %214 : vector<2x32xf32>
    %254 = vector.extract_strided_slice %249 {offsets = [0, 0], sizes = [2, 32], strides = [1, 1]} : vector<2x96xf32> to vector<2x32xf32>
    %255 = arith.mulf %254, %251 : vector<2x32xf32>
    %256 = arith.addf %253, %255 : vector<2x32xf32>
    %257 = vector.extract_strided_slice %249 {offsets = [0, 64], sizes = [2, 32], strides = [1, 1]} : vector<2x96xf32> to vector<2x32xf32>
    %258 = math.tanh %256 : vector<2x32xf32>
    %259 = arith.mulf %257, %258 : vector<2x32xf32>
    %c10_65 = arith.constant 10 : index
    %c0_66 = arith.constant 0 : index
    %260 = vector.load %arg4[%c10_65, %c0_66] : memref<16x64xf32, #tpu.memory_space<vmem>>, vector<2x32xf32>
    tpu.vector_store %arg4[%c10_65, %c0_66], %243 {strides = array<i32>} : memref<16x64xf32, #tpu.memory_space<vmem>>, vector<2x32xf32>,
    %c4_67 = arith.constant 4 : index
    %c32_68 = arith.constant 32 : index
    %261 = vector.load %arg4[%c4_67, %c32_68] : memref<16x64xf32, #tpu.memory_space<vmem>>, vector<2x32xf32>
    tpu.vector_store %arg4[%c4_67, %c32_68], %259 {strides = array<i32>} : memref<16x64xf32, #tpu.memory_space<vmem>>, vector<2x32xf32>,
    %262 = tpu.concatenate %243, %259 in 1 : vector<2x32xf32>, vector<2x32xf32> -> vector<2x64xf32>
    %cst_69 = arith.constant dense<0.000000e+00> : vector<2x256xf32>
    %263 = tpu.matmul %262, %7, %cst_69 {dimension_numbers = #tpu.dot_dimension_numbers<[1], [0], [0], [1], [0, 0, 1, 1], [], []>} : vector<2x64xf32>, vector<64x256xf32>, vector<2x256xf32> -> vector<2x256xf32>
    %c12_70 = arith.constant 12 : index
    %c0_71 = arith.constant 0 : index
    %264 = vector.load %arg5[%c12_70, %c0_71] : memref<16x256xf32, #tpu.memory_space<vmem>>, vector<2x128xf32>
    %265 = vector.extract_strided_slice %263 {offsets = [0, 0], sizes = [2, 128], strides = [1, 1]} : vector<2x256xf32> to vector<2x128xf32>
    %266 = arith.addf %264, %265 : vector<2x128xf32>
    %c2_72 = arith.constant 2 : index
    %c128_73 = arith.constant 128 : index
    %267 = vector.load %arg5[%c2_72, %c128_73] : memref<16x256xf32, #tpu.memory_space<vmem>>, vector<2x128xf32>
    %268 = vector.extract_strided_slice %263 {offsets = [0, 128], sizes = [2, 128], strides = [1, 1]} : vector<2x256xf32> to vector<2x128xf32>
    %269 = arith.addf %267, %268 : vector<2x128xf32>
    %270 = vector.extract_strided_slice %266 {offsets = [0, 0], sizes = [2, 96], strides = [1, 1]} : vector<2x128xf32> to vector<2x96xf32>
    %271 = arith.negf %270 : vector<2x96xf32>
    %272 = math.exp %271 : vector<2x96xf32>
    %cst_74 = arith.constant 1.000000e+00 : f32
    %273 = vector.broadcast %cst_74 : f32 to vector<2x96xf32>
    %274 = arith.addf %273, %272 : vector<2x96xf32>
    %275 = arith.divf %273, %274 : vector<2x96xf32>
    %276 = vector.extract_strided_slice %266 {offsets = [0, 96], sizes = [2, 32], strides = [1, 1]} : vector<2x128xf32> to vector<2x32xf32>
    %277 = math.tanh %276 : vector<2x32xf32>
    %278 = vector.extract_strided_slice %275 {offsets = [0, 32], sizes = [2, 32], strides = [1, 1]} : vector<2x96xf32> to vector<2x32xf32>
    %279 = arith.mulf %278, %240 : vector<2x32xf32>
    %280 = vector.extract_strided_slice %275 {offsets = [0, 0], sizes = [2, 32], strides = [1, 1]} : vector<2x96xf32> to vector<2x32xf32>
    %281 = arith.mulf %280, %277 : vector<2x32xf32>
    %282 = arith.addf %279, %281 : vector<2x32xf32>
    %283 = vector.extract_strided_slice %275 {offsets = [0, 64], sizes = [2, 32], strides = [1, 1]} : vector<2x96xf32> to vector<2x32xf32>
    %284 = math.tanh %282 : vector<2x32xf32>
    %285 = arith.mulf %283, %284 : vector<2x32xf32>
    %286 = vector.extract_strided_slice %269 {offsets = [0, 0], sizes = [2, 96], strides = [1, 1]} : vector<2x128xf32> to vector<2x96xf32>
    %287 = arith.negf %286 : vector<2x96xf32>
    %288 = math.exp %287 : vector<2x96xf32>
    %cst_75 = arith.constant 1.000000e+00 : f32
    %289 = vector.broadcast %cst_75 : f32 to vector<2x96xf32>
    %290 = arith.addf %289, %288 : vector<2x96xf32>
    %291 = arith.divf %289, %290 : vector<2x96xf32>
    %292 = vector.extract_strided_slice %269 {offsets = [0, 96], sizes = [2, 32], strides = [1, 1]} : vector<2x128xf32> to vector<2x32xf32>
    %293 = math.tanh %292 : vector<2x32xf32>
    %294 = vector.extract_strided_slice %291 {offsets = [0, 32], sizes = [2, 32], strides = [1, 1]} : vector<2x96xf32> to vector<2x32xf32>
    %295 = arith.mulf %294, %256 : vector<2x32xf32>
    %296 = vector.extract_strided_slice %291 {offsets = [0, 0], sizes = [2, 32], strides = [1, 1]} : vector<2x96xf32> to vector<2x32xf32>
    %297 = arith.mulf %296, %293 : vector<2x32xf32>
    %298 = arith.addf %295, %297 : vector<2x32xf32>
    %299 = vector.extract_strided_slice %291 {offsets = [0, 64], sizes = [2, 32], strides = [1, 1]} : vector<2x96xf32> to vector<2x32xf32>
    %300 = math.tanh %298 : vector<2x32xf32>
    %301 = arith.mulf %299, %300 : vector<2x32xf32>
    %c12_76 = arith.constant 12 : index
    %c0_77 = arith.constant 0 : index
    %302 = vector.load %arg4[%c12_76, %c0_77] : memref<16x64xf32, #tpu.memory_space<vmem>>, vector<2x32xf32>
    tpu.vector_store %arg4[%c12_76, %c0_77], %285 {strides = array<i32>} : memref<16x64xf32, #tpu.memory_space<vmem>>, vector<2x32xf32>,
    %c2_78 = arith.constant 2 : index
    %c32_79 = arith.constant 32 : index
    %303 = vector.load %arg4[%c2_78, %c32_79] : memref<16x64xf32, #tpu.memory_space<vmem>>, vector<2x32xf32>
    tpu.vector_store %arg4[%c2_78, %c32_79], %301 {strides = array<i32>} : memref<16x64xf32, #tpu.memory_space<vmem>>, vector<2x32xf32>,
    %304 = tpu.concatenate %285, %301 in 1 : vector<2x32xf32>, vector<2x32xf32> -> vector<2x64xf32>
    %cst_80 = arith.constant dense<0.000000e+00> : vector<2x256xf32>
    %305 = tpu.matmul %304, %7, %cst_80 {dimension_numbers = #tpu.dot_dimension_numbers<[1], [0], [0], [1], [0, 0, 1, 1], [], []>} : vector<2x64xf32>, vector<64x256xf32>, vector<2x256xf32> -> vector<2x256xf32>
    %c14_81 = arith.constant 14 : index
    %c0_82 = arith.constant 0 : index
    %306 = vector.load %arg5[%c14_81, %c0_82] : memref<16x256xf32, #tpu.memory_space<vmem>>, vector<2x128xf32>
    %307 = vector.extract_strided_slice %305 {offsets = [0, 0], sizes = [2, 128], strides = [1, 1]} : vector<2x256xf32> to vector<2x128xf32>
    %308 = arith.addf %306, %307 : vector<2x128xf32>
    %c0_83 = arith.constant 0 : index
    %c128_84 = arith.constant 128 : index
    %309 = vector.load %arg5[%c0_83, %c128_84] : memref<16x256xf32, #tpu.memory_space<vmem>>, vector<2x128xf32>
    %310 = vector.extract_strided_slice %305 {offsets = [0, 128], sizes = [2, 128], strides = [1, 1]} : vector<2x256xf32> to vector<2x128xf32>
    %311 = arith.addf %309, %310 : vector<2x128xf32>
    %312 = vector.extract_strided_slice %308 {offsets = [0, 0], sizes = [2, 96], strides = [1, 1]} : vector<2x128xf32> to vector<2x96xf32>
    %313 = arith.negf %312 : vector<2x96xf32>
    %314 = math.exp %313 : vector<2x96xf32>
    %cst_85 = arith.constant 1.000000e+00 : f32
    %315 = vector.broadcast %cst_85 : f32 to vector<2x96xf32>
    %316 = arith.addf %315, %314 : vector<2x96xf32>
    %317 = arith.divf %315, %316 : vector<2x96xf32>
    %318 = vector.extract_strided_slice %308 {offsets = [0, 96], sizes = [2, 32], strides = [1, 1]} : vector<2x128xf32> to vector<2x32xf32>
    %319 = math.tanh %318 : vector<2x32xf32>
    %320 = vector.extract_strided_slice %317 {offsets = [0, 32], sizes = [2, 32], strides = [1, 1]} : vector<2x96xf32> to vector<2x32xf32>
    %321 = arith.mulf %320, %282 : vector<2x32xf32>
    %322 = vector.extract_strided_slice %317 {offsets = [0, 0], sizes = [2, 32], strides = [1, 1]} : vector<2x96xf32> to vector<2x32xf32>
    %323 = arith.mulf %322, %319 : vector<2x32xf32>
    %324 = arith.addf %321, %323 : vector<2x32xf32>
    %325 = vector.extract_strided_slice %317 {offsets = [0, 64], sizes = [2, 32], strides = [1, 1]} : vector<2x96xf32> to vector<2x32xf32>
    %326 = math.tanh %324 : vector<2x32xf32>
    %327 = arith.mulf %325, %326 : vector<2x32xf32>
    %328 = vector.extract_strided_slice %311 {offsets = [0, 0], sizes = [2, 96], strides = [1, 1]} : vector<2x128xf32> to vector<2x96xf32>
    %329 = arith.negf %328 : vector<2x96xf32>
    %330 = math.exp %329 : vector<2x96xf32>
    %cst_86 = arith.constant 1.000000e+00 : f32
    %331 = vector.broadcast %cst_86 : f32 to vector<2x96xf32>
    %332 = arith.addf %331, %330 : vector<2x96xf32>
    %333 = arith.divf %331, %332 : vector<2x96xf32>
    %334 = vector.extract_strided_slice %311 {offsets = [0, 96], sizes = [2, 32], strides = [1, 1]} : vector<2x128xf32> to vector<2x32xf32>
    %335 = math.tanh %334 : vector<2x32xf32>
    %336 = vector.extract_strided_slice %333 {offsets = [0, 32], sizes = [2, 32], strides = [1, 1]} : vector<2x96xf32> to vector<2x32xf32>
    %337 = arith.mulf %336, %298 : vector<2x32xf32>
    %338 = vector.extract_strided_slice %333 {offsets = [0, 0], sizes = [2, 32], strides = [1, 1]} : vector<2x96xf32> to vector<2x32xf32>
    %339 = arith.mulf %338, %335 : vector<2x32xf32>
    %340 = arith.addf %337, %339 : vector<2x32xf32>
    %341 = vector.extract_strided_slice %333 {offsets = [0, 64], sizes = [2, 32], strides = [1, 1]} : vector<2x96xf32> to vector<2x32xf32>
    %342 = math.tanh %340 : vector<2x32xf32>
    %343 = arith.mulf %341, %342 : vector<2x32xf32>
    %c14_87 = arith.constant 14 : index
    %c0_88 = arith.constant 0 : index
    %344 = vector.load %arg4[%c14_87, %c0_88] : memref<16x64xf32, #tpu.memory_space<vmem>>, vector<2x32xf32>
    tpu.vector_store %arg4[%c14_87, %c0_88], %327 {strides = array<i32>} : memref<16x64xf32, #tpu.memory_space<vmem>>, vector<2x32xf32>,
    %c0_89 = arith.constant 0 : index
    %c32_90 = arith.constant 32 : index
    %345 = vector.load %arg4[%c0_89, %c32_90] : memref<16x64xf32, #tpu.memory_space<vmem>>, vector<2x32xf32>
    tpu.vector_store %arg4[%c0_89, %c32_90], %343 {strides = array<i32>} : memref<16x64xf32, #tpu.memory_space<vmem>>, vector<2x32xf32>,
    return
  }
}

</mosaic_0001>

<bundles_post_ra>
// kernel: bilstm_forward.5
= control target key start
LH: loop header
LB: loop body
LE: loop exit
PB: predicated region body
PF: predicated region fallthrough
CT: control target
= control target key end

     0   :  { %v272_v0 = vmov 0.0|0.0   ;;  %vm273_vm0 = vmmov 0   ;;  %v274_v6 = vmov 0.0   ;;  %vm30_vm1 = vcmask 523264   ;;  %s334_s1 = inlined_call_operand.vmem [shape: f32[64,128], index: 1, kind: input, shape index: {}]   ;;  %s335_s0 = inlined_call_operand.vmem [shape: f32[16,64], index: 0, kind: input, shape index: {}]   ;;  %s336_s2 = inlined_call_operand.vmem [shape: f32[1,128], index: 2, kind: input, shape index: {}]   ;;  %s337_s3 = inlined_call_operand.vmem [shape: f32[16,128], index: 3, kind: output, shape index: {}]  }
   0x1   :  { %245 = vmatprep.subr.bf16.mxu0 %v272_v0  ;;  %257 = vmatprep.subr.bf16.mxu1 %v272_v0  ;;  %v14_v1 = vld [vmem:[%s334_s1] sm:$0xff]  ;;  %v15_v2 = vld [vmem:[%s334_s1 + $0x8] sm:$0xff]  ;;  %v16_v3 = vld [vmem:[%s334_s1 + $0x10] sm:$0xff] }
   0x2   :  { %v246_v4 = vpack.c.bf16 %v15_v2, %v14_v1  ;;  %v17_v5 = vld [vmem:[%s334_s1 + $0x18] sm:$0xff]  ;;  %223 = vmatprep.mubr.msk.f32.mxu0 %vm273_vm0, %v274_v6  ;;  %242 = vmatprep.mubr.msk.f32.mxu1 %vm273_vm0, %v274_v6  ;;  %v18_v8 = vld [vmem:[%s334_s1 + $0x20] sm:$0xff]  ;;  %v19_v9 = vld [vmem:[%s334_s1 + $0x28] sm:$0xff] }
   0x3   :  { %v249_v7 = vpack.c.bf16 %v17_v5, %v16_v3  ;;  %v252_v10 = vpack.c.bf16 %v19_v9, %v18_v8  ;;  %v20_v11 = vld [vmem:[%s334_s1 + $0x30] sm:$0xff]  ;;  %v21_v12 = vld [vmem:[%s334_s1 + $0x38] sm:$0xff]  ;;  %v23_v14 = vld [vmem:[%s335_s0] ss:$2 sm:$0xff] }
   0x4   :  { %247 = vmatpush3.bf16.msra.mxu0 %v246_v4  ;;  %259 = vmatpush3.bf16.msra.mxu1 %v246_v4  ;;  %v255_v13 = vpack.c.bf16 %v21_v12, %v20_v11  ;;  %v187_v15 = vld [vmem:[%s335_s0 + $0x1] ss:$2 sm:$0xff]  ;;  %v185_v16 = vld [vmem:[%s336_s2] ss:$0 sm:$0xff] }
   0x5   :  { %248 = vmatprep.subr.bf16.mxu0 %v272_v0  ;;  %260 = vmatprep.subr.bf16.mxu1 %v272_v0 }
   0x8   :  { %250 = vmatpush3.bf16.msra.mxu0 %v249_v7  ;;  %262 = vmatpush3.bf16.msra.mxu1 %v249_v7 }
   0x9   :  { %251 = vmatprep.subr.bf16.mxu0 %v272_v0  ;;  %263 = vmatprep.subr.bf16.mxu1 %v272_v0 }
   0xc   :  { %253 = vmatpush3.bf16.msra.mxu0 %v252_v10  ;;  %265 = vmatpush3.bf16.msra.mxu1 %v252_v10 }
   0xd   :  { %254 = vmatprep.subr.bf16.mxu0 %v272_v0  ;;  %266 = vmatprep.subr.bf16.mxu1 %v272_v0 }
  0x10   :  { %256 = vmatpush3.bf16.msra.mxu0 %v255_v13  ;;  %268 = vmatpush3.bf16.msra.mxu1 %v255_v13 }
  0x13   :  { %224 = vmatmul.mubr.msk.f32.vlgmr.msra.gmra.mrb[0].mxu0 %vm30_vm1, %v23_v14  ;;  %243 = vmatmul.mubr.msk.f32.vlgmr.msra.gmra.mrb[0].mxu1 %vm30_vm1, %v187_v15 }
  0xe6   :  { %v100_v17 = vpop.f32.mrb[0].mxu0  ;;  %v176_v18 = vpop.f32.mrb[0].mxu1 }
  0xe7   :  { %v101_v19 = vadd.f32 %v185_v16, %v100_v17  ;;  %v177_v20 = vadd.f32 %v185_v16, %v176_v18  ;;  %v225_v21 = vpop.f32.mrb[1].mxu0  ;;  %v244_v22 = vpop.f32.mrb[1].mxu1 }
  0xe9   :  { %104 = vst [vmem:[%s337_s3] sm:$0xff] %v101_v19  ;;  %180 = vst [vmem:[%s337_s3 + $0x8] sm:$0xff] %v177_v20 }

// kernel: bilstm_forward.4
= control target key start
LH: loop header
LB: loop body
LE: loop exit
PB: predicated region body
PF: predicated region fallthrough
CT: control target
= control target key end

     0   :  { %v1671_v3 = vmov 0.0   ;;  %vm47_vm0 = vcmask 523264   ;;  %v37_v51 = vlaneseq  ;;  %s1673_s30 = smov 96   ;;  %s1674_s5 = smov 64   ;;  %vm284_vm1 = vcmask 254976   ;;  %s2111_s1 = inlined_call_operand.vmem [shape: f32[64,256], index: 1, kind: input, shape index: {}]   ;;  %s2112_s3 = inlined_call_operand.vmem [shape: f32[64,256], index: 3, kind: input, shape index: {}]   ;;  %s2113_s0 = inlined_call_operand.vmem [shape: f32[16,64], index: 0, kind: input, shape index: {}]   ;;  %s2114_s2 = inlined_call_operand.vmem [shape: f32[1,256], index: 2, kind: input, shape index: {}]   ;;  %s2115_s4 = inlined_call_operand.vmem [shape: f32[16,64], index: 4, kind: output, shape index: {}]  }
   0x1   :  { %v20_v0 = vld [vmem:[%s2111_s1 + $0x8] sm:$0xff]  ;;  %v22_v1 = vld [vmem:[%s2111_s1 + $0x18] sm:$0xff]  ;;  %v19_v2 = vld [vmem:[%s2111_s1] sm:$0xff]  ;;  %118 = vmatprep.mubr.f32.mxu0 %v1671_v3  ;;  %218 = vmatprep.mubr.f32.mxu1 %v1671_v3  ;;  %vm296_vm2 = vcmask 261120   ;;  %vm440_vm3 = vcmask 257026   ;;  %vm596_vm4 = vcmask 259076  }
   0x2   :  { %v1395_v4 = vpack.c.bf16 %v22_v1, %v20_v0  ;;  %v21_v5 = vld [vmem:[%s2111_s1 + $0x10] sm:$0xff]  ;;  %v24_v6 = vld [vmem:[%s2111_s1 + $0x28] sm:$0xff]  ;;  %v26_v7 = vld [vmem:[%s2111_s1 + $0x38] sm:$0xff]  ;;  %v38_v52 = vshrl.u32 %v37_v51, 7  ;;  %vm749_vm5 = vcmask 261126   ;;  %vm446_vm6 = vcmask 521476  }
   0x3   :  { %v1397_v8 = vpack.c.bf16 %v21_v5, %v19_v2  ;;  %v1399_v9 = vpack.c.bf16 %v26_v7, %v24_v6  ;;  %v23_v10 = vld [vmem:[%s2111_s1 + $0x20] sm:$0xff]  ;;  %v25_v11 = vld [vmem:[%s2111_s1 + $0x30] sm:$0xff]  ;;  %v28_v12 = vld [vmem:[%s2111_s1 + $0x48] sm:$0xff]  ;;  %vm290_vm7 = vcmask 523526   ;;  %vm755_vm8 = vcmask 517376  }
   0x4   :  { %1396 = vmatprep.subr.bf16.mxu0 %v1395_v4  ;;  %v30_v13 = vld [vmem:[%s2111_s1 + $0x58] sm:$0xff]  ;;  %v1401_v14 = vpack.c.bf16 %v25_v11, %v23_v10  ;;  %v136_v15 = vld [vmem:[%s2112_s3 + $0x8] sm:$0xff]  ;;  %v135_v17 = vld [vmem:[%s2112_s3] sm:$0xff]  ;;  %v39_v53 = vsub.s32 0, %v38_v52  ;;  %v43_v55 = vsub.s32 1, %v38_v52  ;;  %vm602_vm9 = vcmask 519426  }
   0x5   :  { %1398 = vmatpush1.bf16.msra.mxu0 %v1397_v8  ;;  %v138_v16 = vld [vmem:[%s2112_s3 + $0x18] sm:$0xff]  ;;  %v1403_v18 = vpack.c.bf16 %v30_v13, %v28_v12  ;;  %v27_v19 = vld [vmem:[%s2111_s1 + $0x40] sm:$0xff]  ;;  %v29_v20 = vld [vmem:[%s2111_s1 + $0x50] sm:$0xff] }
   0x6   :  { %1400 = vmatprep.subr.bf16.mxu0 %v1399_v9  ;;  %v1747_v21 = vpack.c.bf16 %v138_v16, %v136_v15  ;;  %v137_v22 = vld [vmem:[%s2112_s3 + $0x10] sm:$0xff]  ;;  %v32_v24 = vld [vmem:[%s2111_s1 + $0x68] sm:$0xff]  ;;  %v34_v25 = vld [vmem:[%s2111_s1 + $0x78] sm:$0xff]  ;;  %v1405_v30 = vpack.c.bf16 %v29_v20, %v27_v19 }
   0x7   :  { %v1752_v23 = vpack.c.bf16 %v137_v22, %v135_v17  ;;  %v140_v26 = vld [vmem:[%s2112_s3 + $0x28] sm:$0xff]  ;;  %v142_v27 = vld [vmem:[%s2112_s3 + $0x38] sm:$0xff]  ;;  %v139_v28 = vld [vmem:[%s2112_s3 + $0x20] sm:$0xff]  ;;  %v1407_v36 = vpack.c.bf16 %v34_v25, %v32_v24 }
   0x8   :  { %1412 = vmatprep.subr.bf16.mxu1 %v1747_v21  ;;  %v141_v29 = vld [vmem:[%s2112_s3 + $0x30] sm:$0xff]  ;;  %v31_v31 = vld [vmem:[%s2111_s1 + $0x60] sm:$0xff]  ;;  %v1777_v32 = vpack.c.bf16 %v142_v27, %v140_v26  ;;  %v144_v34 = vld [vmem:[%s2112_s3 + $0x48] sm:$0xff] }
   0x9   :  { %1402 = vmatpush1.bf16.msra.mxu0 %v1401_v14  ;;  %1414 = vmatpush1.bf16.msra.mxu1 %v1752_v23  ;;  %v1779_v33 = vpack.c.bf16 %v141_v29, %v139_v28  ;;  %v146_v35 = vld [vmem:[%s2112_s3 + $0x58] sm:$0xff]  ;;  %v33_v37 = vld [vmem:[%s2111_s1 + $0x70] sm:$0xff]  ;;  %v143_v39 = vld [vmem:[%s2112_s3 + $0x40] sm:$0xff] }
   0xa   :  { %1404 = vmatprep.subr.bf16.mxu0 %v1403_v18  ;;  %v1790_v38 = vpack.c.bf16 %v146_v35, %v144_v34  ;;  %v145_v40 = vld [vmem:[%s2112_s3 + $0x50] sm:$0xff]  ;;  %1416 = vmatprep.subr.bf16.mxu1 %v1777_v32  ;;  %v148_v41 = vld [vmem:[%s2112_s3 + $0x68] sm:$0xff]  ;;  %v150_v42 = vld [vmem:[%s2112_s3 + $0x78] sm:$0xff]  ;;  %v1409_v43 = vpack.c.bf16 %v33_v37, %v31_v31 }
   0xb   :  { %v1806_v44 = vpack.c.bf16 %v145_v40, %v143_v39  ;;  %v1809_v45 = vpack.c.bf16 %v150_v42, %v148_v41  ;;  %v147_v46 = vld [vmem:[%s2112_s3 + $0x60] sm:$0xff]  ;;  %v149_v47 = vld [vmem:[%s2112_s3 + $0x70] sm:$0xff]  ;;  %v18_v50 = vld [vmem:[%s2113_s0 + $0x8] sm:$0xff] }
   0xc   :  { %v17_v48 = vld [vmem:[%s2113_s0] sm:$0xff]  ;;  %v1821_v49 = vpack.c.bf16 %v149_v47, %v147_v46 }
   0xd   :  { %1406 = vmatpush1.bf16.msra.mxu0 %v1405_v30  ;;  %1418 = vmatpush1.bf16.msra.mxu1 %v1779_v33  ;;  %v35_v54 = vld [vmem:[%s2114_s2] sm:$0x3]  ;;  %s1672_s2 = smov 32  }
   0xe   :  { %1408 = vmatprep.subr.bf16.mxu0 %v1407_v36  ;;  %1420 = vmatprep.subr.bf16.mxu1 %v1790_v38  ;;  %v40_v56 = vrot.slane %v35_v54, %v39_v53  ;;  %v44_v57 = vrot.slane %v35_v54, %v43_v55 }
  0x11   :  { %1410 = vmatpush1.bf16.msra.mxu0 %v1409_v43  ;;  %1422 = vmatpush1.bf16.msra.mxu1 %v1806_v44 }
  0x12   :  { %1424 = vmatprep.subr.bf16.mxu1 %v1809_v45  ;;  %1428 = vmatprep.subr.bf16.mxu0 %v1747_v21 }
  0x14   :  { %1370 = vmatmul.mubr.msk.f32.vlgmr.msra.gmra.mrb[0].mxu0 %vm47_vm0, %v17_v48 }
  0x15   :  { %124 = vmatprep.mubr.f32.mxu0 %v1671_v3  ;;  %1426 = vmatpush1.bf16.msra.mxu1 %v1821_v49 }
  0x16   :  { %1430 = vmatpush1.bf16.msra.mxu0 %v1752_v23  ;;  %1444 = vmatprep.subr.bf16.mxu1 %v1747_v21 }
  0x17   :  { %1432 = vmatprep.subr.bf16.mxu0 %v1777_v32 }
  0x18   :  { %1371 = vmatmul.mubr.msk.f32.gmra.mrb[2].mxu0 %vm47_vm0, %v18_v50  ;;  %219 = vmatmul.mubr.f32.vlgmr.msra.gmra.mrb[0].mxu1 %v1671_v3 }
  0x19   :  { %365 = vmatprep.mubr.f32.mxu0 %v1671_v3  ;;  %1446 = vmatpush1.bf16.msra.mxu1 %v1752_v23 }
  0x1a   :  { %1434 = vmatpush1.bf16.msra.mxu0 %v1779_v33  ;;  %1448 = vmatprep.subr.bf16.mxu1 %v1777_v32 }
  0x1b   :  { %1436 = vmatprep.subr.bf16.mxu0 %v1790_v38  ;;  %521 = vmatprep.mubr.f32.mxu1 %v1671_v3 }
  0x1d   :  { %1450 = vmatpush1.bf16.msra.mxu1 %v1779_v33 }
  0x1e   :  { %1438 = vmatpush1.bf16.msra.mxu0 %v1806_v44  ;;  %1452 = vmatprep.subr.bf16.mxu1 %v1790_v38 }
  0x1f   :  { %1440 = vmatprep.subr.bf16.mxu0 %v1809_v45 }
  0x21   :  { %1454 = vmatpush1.bf16.msra.mxu1 %v1806_v44 }
  0x22   :  { %1442 = vmatpush1.bf16.msra.mxu0 %v1821_v49  ;;  %1456 = vmatprep.subr.bf16.mxu1 %v1809_v45 }
  0x23   :  { %1460 = vmatprep.subr.bf16.mxu0 %v1747_v21 }
  0x25   :  { %1458 = vmatpush1.bf16.msra.mxu1 %v1821_v49 }
  0x26   :  { %1476 = vmatprep.subr.bf16.mxu1 %v1747_v21 }
  0xe7   :  { %v120_v58 = vpop.f32.mrb[0].mxu0 }
  0xe8   :  { %v121_v59 = vadd.f32 %v120_v58, %v40_v56  ;;  %v122_v60 = vpop.f32.mrb[1].mxu0 }
  0xe9   :  { %v123_v61 = vadd.f32 %v122_v60, %v44_v57 }
  0xea   :  { %131 = vst [vmem:[#allocation2] sm:$0xff] %v121_v59 }
  0xeb   :  { %132 = vst [vmem:[#allocation2 + $0x8] sm:$0xff] %v123_v61  ;;  %v126_v62 = vpop.f32.mrb[2].mxu0  ;;  %v220_v63 = vpop.f32.mrb[0].mxu1 }
  0xec   :  { %v127_v0 = vadd.f32 %v126_v62, %v40_v56  ;;  %v128_v1 = vpop.f32.mrb[3].mxu0  ;;  %v222_v2 = vpop.f32.mrb[1].mxu1 }
  0xed   :  { %v129_v4 = vadd.f32 %v128_v1, %v44_v57  ;;  %v229_v5 = vrot.slane %v222_v2, 2 }
  0xee   :  { %133 = vst [vmem:[#allocation2 + $0x10] sm:$0xff] %v127_v0 }
  0xef   :  { %134 = vst [vmem:[#allocation2 + $0x18] sm:$0xff] %v129_v4 }
  0xf1   :  { %v225_v6 = vld [vmem:[#allocation2] sm:$0x3]  ;;  %v372_v51 = vld [vmem:[#allocation2] sm:$0xc] }
  0xf2   :  { %v226_v9 = vadd.f32 %v225_v6, %v220_v63 }
  0xf4   :  { %v1372_v13 = vmul.f32 -1.442695, %v226_v9 }
  0xf6   :  { %v227_v7 = vld [vmem:[#allocation2 + $0x18] sm:$0xc0]  ;;  %v377_v54 = vld [vmem:[#allocation2 + $0x18] sm:$0x30] }
  0xf7   :  { %v231_v8 = vadd.f32 %v229_v5, %v227_v7 }
  0xf9   :  { %1543 = vtanh.f32 %v231_v8  ;;  %v1373_v12 = vmul.f32 -1.442695, %v231_v8 }
  0xfa   :  { %1545 = vtanh.f32 %v226_v9 }
  0xfb   :  { %1547 = vpow2.f32 %v1373_v12 }
  0xfc   :  { %1549 = vpow2.f32 %v1372_v13 }
 0x103   :  { %v1544_v10 = vpop.eup %1543 }
 0x104   :  { %265 = vrot.lane.b32.xlu0 %v1544_v10, %s1672_s2  ;;  %v1546_v11 = vpop.eup %1545 }
 0x105   :  { %v1548_v14 = vpop.eup %1547 }
 0x106   :  { %v259_v15 = vadd.f32 1.0, %v1548_v14  ;;  %v1550_v16 = vpop.eup %1549 }
 0x107   :  { %v235_v17 = vadd.f32 1.0, %v1550_v16 }
 0x108   :  { %241 = vrot.lane.b32.xlu0 %v1546_v11, %s1672_s2  ;;  %1551 = vrcp.f32 %v259_v15 }
 0x109   :  { %1553 = vrcp.f32 %v235_v17 }
 0x112   :  { %v1552_v18 = vpop.eup %1551 }
 0x113   :  { %v1554_v22 = vpop.eup %1553  ;;  %v263_v26 = vmul.f32 0.0, %v1552_v18 }
 0x114   :  { %v239_v29 = vmul.f32 0.0, %v1554_v22 }
 0x176   :  { %v266_v19 = vpop.permute.xlu0 %265 }
 0x177   :  { %v268_v20 = vmul.f32 %v1552_v18, %v266_v19 }
 0x179   :  { %270 = vrot.lane.b32.xlu1 %v268_v20, %s1672_s2 }
 0x17a   :  { %v242_v24 = vpop.permute.xlu0 %241 }
 0x17b   :  { %v244_v25 = vmul.f32 %v1554_v22, %v242_v24 }
 0x17d   :  { %246 = vrot.lane.b32.xlu1 %v244_v25, %s1672_s2 }
 0x1eb   :  { %v271_v27 = vpop.permute.xlu1 %270 }
 0x1ec   :  { %v1859_v28 = vadd.f32 %v271_v27, %v263_v26 }
 0x1ee   :  { %1555 = vtanh.f32 %v1859_v28  ;;  %v417_v8 = vrot.slane %v1859_v28, 2 }
 0x1ef   :  { %v247_v30 = vpop.permute.xlu1 %246 }
 0x1f0   :  { %v1862_v31 = vadd.f32 %v247_v30, %v239_v29 }
 0x1f2   :  { %1557 = vtanh.f32 %v1862_v31  ;;  %v390_v7 = vrot.slane %v1862_v31, 6  ;;  %v528_v31 = vld [vmem:[#allocation2] sm:$0x30] }
 0x1f8   :  { %v1556_v34 = vpop.eup %1555 }
 0x1f9   :  { %276 = vrot.lane.b32.xlu0 %v1556_v34, %s1672_s2 }
 0x1fc   :  { %v1558_v35 = vpop.eup %1557 }
 0x1fd   :  { %252 = vrot.lane.b32.xlu1 %v1558_v35, %s1672_s2 }
 0x26b   :  { %v277_v36 = vpop.permute.xlu0 %276 }
 0x26c   :  { %v1867_v37 = vmul.f32 %v1552_v18, %v277_v36  ;;  %v533_v36 = vld [vmem:[#allocation2 + $0x18] sm:$0xc] }
 0x26e   :  { %v292_v39 = vrot.slane %v1867_v37, 6 }
 0x26f   :  { %v253_v40 = vpop.permute.xlu1 %252 }
 0x270   :  { %v255_v41 = vmul.f32 %v1554_v22, %v253_v40  ;;  %293 = vrot.lane.b32.xlu1 %v292_v39, %s1673_s30 }
 0x272   :  { %281 = vrot.lane.b32.xlu0 %v255_v41, %s1674_s5 }
 0x2e2   :  { %v294_v42 = vpop.permute.xlu1 %293 }
 0x2e4   :  { %v282_v43 = vpop.permute.xlu0 %281 }
 0x2e5   :  { %285 = vst.msk [vmem:[%s2115_s4] sm:$0x3] %vm284_vm1, %v282_v43  ;;  %v297_v46 = vsel %vm296_vm2, %v282_v43, %v294_v42 }
 0x2e6   :  { %1374 = vmatmul.mubr.msk.f32.vlgmr.msra.gmra.mrb[4].mxu0 %vm47_vm0, %v297_v46 }
 0x2e7   :  { %1462 = vmatpush1.bf16.msra.mxu0 %v1752_v23  ;;  %677 = vmatprep.mubr.f32.mxu0 %v1671_v3 }
 0x2e8   :  { %1464 = vmatprep.subr.bf16.mxu0 %v1777_v32 }
 0x2eb   :  { %1466 = vmatpush1.bf16.msra.mxu0 %v1779_v33 }
 0x2ec   :  { %1468 = vmatprep.subr.bf16.mxu0 %v1790_v38 }
 0x2ef   :  { %1470 = vmatpush1.bf16.msra.mxu0 %v1806_v44 }
 0x2f0   :  { %1472 = vmatprep.subr.bf16.mxu0 %v1809_v45 }
 0x2f3   :  { %1474 = vmatpush1.bf16.msra.mxu0 %v1821_v49 }
 0x2f4   :  { %1492 = vmatprep.subr.bf16.mxu0 %v1747_v21 }
 0x3b9   :  { %v367_v47 = vpop.f32.mrb[4].mxu0 }
 0x3ba   :  { %v374_v48 = vrot.slane %v367_v47, 6  ;;  %v369_v50 = vpop.f32.mrb[5].mxu0 }
 0x3bb   :  { %v379_v52 = vrot.slane %v369_v50, 4 }
 0x3bc   :  { %v376_v53 = vadd.f32 %v374_v48, %v372_v51 }
 0x3bd   :  { %v381_v55 = vadd.f32 %v379_v52, %v377_v54 }
 0x3be   :  { %1559 = vtanh.f32 %v376_v53  ;;  %v1375_v58 = vmul.f32 -1.442695, %v376_v53 }
 0x3bf   :  { %1561 = vtanh.f32 %v381_v55  ;;  %v1376_v59 = vmul.f32 -1.442695, %v381_v55 }
 0x3c0   :  { %1563 = vpow2.f32 %v1375_v58 }
 0x3c1   :  { %1565 = vpow2.f32 %v1376_v59 }
 0x3c8   :  { %v1560_v56 = vpop.eup %1559 }
 0x3c9   :  { %v1562_v57 = vpop.eup %1561  ;;  %394 = vrot.lane.b32.xlu1 %v1560_v56, %s1672_s2 }
 0x3ca   :  { %421 = vrot.lane.b32.xlu0 %v1562_v57, %s1672_s2  ;;  %v1564_v60 = vpop.eup %1563 }
 0x3cb   :  { %v1566_v61 = vpop.eup %1565  ;;  %v385_v62 = vadd.f32 1.0, %v1564_v60 }
 0x3cc   :  { %v412_v63 = vadd.f32 1.0, %v1566_v61 }
 0x3cd   :  { %1567 = vrcp.f32 %v385_v62 }
 0x3ce   :  { %1569 = vrcp.f32 %v412_v63 }
 0x3d7   :  { %v1568_v0 = vpop.eup %1567 }
 0x3d8   :  { %v1570_v2 = vpop.eup %1569  ;;  %v392_v9 = vmul.f32 %v1568_v0, %v390_v7 }
 0x3d9   :  { %v419_v11 = vmul.f32 %v1570_v2, %v417_v8 }
 0x43b   :  { %v395_v1 = vpop.permute.xlu1 %394 }
 0x43c   :  { %v397_v4 = vmul.f32 %v1568_v0, %v395_v1  ;;  %v422_v5 = vpop.permute.xlu0 %421 }
 0x43d   :  { %v424_v6 = vmul.f32 %v1570_v2, %v422_v5 }
 0x43e   :  { %399 = vrot.lane.b32.xlu1 %v397_v4, %s1672_s2 }
 0x43f   :  { %426 = vrot.lane.b32.xlu0 %v424_v6, %s1672_s2 }
 0x4b0   :  { %v400_v10 = vpop.permute.xlu1 %399 }
 0x4b1   :  { %v1893_v12 = vadd.f32 %v400_v10, %v392_v9  ;;  %v427_v13 = vpop.permute.xlu0 %426 }
 0x4b2   :  { %v1895_v14 = vadd.f32 %v427_v13, %v419_v11 }
 0x4b3   :  { %1571 = vtanh.f32 %v1893_v12  ;;  %v546_v57 = vrot.slane %v1893_v12, 6 }
 0x4b4   :  { %1573 = vtanh.f32 %v1895_v14  ;;  %v573_v58 = vrot.slane %v1895_v14, 2 }
 0x4bd   :  { %v1572_v15 = vpop.eup %1571 }
 0x4be   :  { %v1574_v16 = vpop.eup %1573  ;;  %405 = vrot.lane.b32.xlu1 %v1572_v15, %s1672_s2 }
 0x4bf   :  { %432 = vrot.lane.b32.xlu0 %v1574_v16, %s1672_s2  ;;  %v689_v16 = vld [vmem:[#allocation2 + $0x18] sm:$0x3] }
 0x530   :  { %v406_v17 = vpop.permute.xlu1 %405 }
 0x531   :  { %v408_v18 = vmul.f32 %v1568_v0, %v406_v17  ;;  %v433_v19 = vpop.permute.xlu0 %432  ;;  %v684_v17 = vld [vmem:[#allocation2] sm:$0xc0] }
 0x532   :  { %v1901_v20 = vmul.f32 %v1570_v2, %v433_v19 }
 0x533   :  { %437 = vrot.lane.b32.xlu0 %v408_v18, %s1674_s5 }
 0x534   :  { %v448_v22 = vrot.slane %v1901_v20, 2 }
 0x536   :  { %449 = vrot.lane.b32.xlu1 %v448_v22, %s1673_s30 }
 0x5a5   :  { %v438_v24 = vpop.permute.xlu0 %437 }
 0x5a6   :  { %441 = vst.msk [vmem:[%s2115_s4] sm:$0xc] %vm440_vm3, %v438_v24 }
 0x5a8   :  { %v450_v25 = vpop.permute.xlu1 %449 }
 0x5a9   :  { %v452_v26 = vsel %vm296_vm2, %v438_v24, %v450_v25 }
 0x5aa   :  { %v454_v27 = vrot.slane %v452_v26, 2 }
 0x5ac   :  { %1377 = vmatmul.mubr.msk.f32.vlgmr.msra.gmra.mrb[2].mxu1 %vm47_vm0, %v454_v27 }
 0x5ad   :  { %1478 = vmatpush1.bf16.msra.mxu1 %v1752_v23  ;;  %830 = vmatprep.mubr.f32.mxu1 %v1671_v3 }
 0x5ae   :  { %1480 = vmatprep.subr.bf16.mxu1 %v1777_v32 }
 0x5b1   :  { %1482 = vmatpush1.bf16.msra.mxu1 %v1779_v33 }
 0x5b2   :  { %1484 = vmatprep.subr.bf16.mxu1 %v1790_v38 }
 0x5b5   :  { %1486 = vmatpush1.bf16.msra.mxu1 %v1806_v44 }
 0x5b6   :  { %1488 = vmatprep.subr.bf16.mxu1 %v1809_v45 }
 0x5b9   :  { %1490 = vmatpush1.bf16.msra.mxu1 %v1821_v49 }
 0x5ba   :  { %1508 = vmatprep.subr.bf16.mxu1 %v1747_v21 }
 0x67f   :  { %v523_v28 = vpop.f32.mrb[2].mxu1 }
 0x680   :  { %v530_v29 = vrot.slane %v523_v28, 4  ;;  %v525_v30 = vpop.f32.mrb[3].mxu1 }
 0x681   :  { %v535_v34 = vrot.slane %v525_v30, 6 }
 0x682   :  { %v532_v35 = vadd.f32 %v530_v29, %v528_v31 }
 0x683   :  { %v537_v39 = vadd.f32 %v535_v34, %v533_v36 }
 0x684   :  { %1575 = vtanh.f32 %v532_v35  ;;  %v1378_v42 = vmul.f32 -1.442695, %v532_v35 }
 0x685   :  { %1577 = vtanh.f32 %v537_v39  ;;  %v1379_v43 = vmul.f32 -1.442695, %v537_v39 }
 0x686   :  { %1579 = vpow2.f32 %v1378_v42 }
 0x687   :  { %1581 = vpow2.f32 %v1379_v43 }
 0x68e   :  { %v1576_v40 = vpop.eup %1575 }
 0x68f   :  { %v1578_v41 = vpop.eup %1577  ;;  %550 = vrot.lane.b32.xlu1 %v1576_v40, %s1672_s2 }
 0x690   :  { %577 = vrot.lane.b32.xlu0 %v1578_v41, %s1672_s2  ;;  %v1580_v46 = vpop.eup %1579 }
 0x691   :  { %v1582_v47 = vpop.eup %1581  ;;  %v541_v48 = vadd.f32 1.0, %v1580_v46 }
 0x692   :  { %v568_v50 = vadd.f32 1.0, %v1582_v47 }
 0x693   :  { %1583 = vrcp.f32 %v541_v48 }
 0x694   :  { %1585 = vrcp.f32 %v568_v50 }
 0x69d   :  { %v1584_v51 = vpop.eup %1583 }
 0x69e   :  { %v1586_v53 = vpop.eup %1585  ;;  %v548_v59 = vmul.f32 %v1584_v51, %v546_v57 }
 0x69f   :  { %v575_v61 = vmul.f32 %v1586_v53, %v573_v58 }
 0x701   :  { %v551_v52 = vpop.permute.xlu1 %550 }
 0x702   :  { %v553_v54 = vmul.f32 %v1584_v51, %v551_v52  ;;  %v578_v55 = vpop.permute.xlu0 %577 }
 0x703   :  { %v580_v56 = vmul.f32 %v1586_v53, %v578_v55 }
 0x704   :  { %555 = vrot.lane.b32.xlu1 %v553_v54, %s1672_s2 }
 0x705   :  { %582 = vrot.lane.b32.xlu0 %v580_v56, %s1672_s2 }
 0x776   :  { %v556_v60 = vpop.permute.xlu1 %555 }
 0x777   :  { %v1927_v62 = vadd.f32 %v556_v60, %v548_v59  ;;  %v583_v63 = vpop.permute.xlu0 %582 }
 0x778   :  { %v1929_v0 = vadd.f32 %v583_v63, %v575_v61  ;;  %v837_v63 = vld [vmem:[#allocation2 + $0x10] sm:$0x3] }
 0x779   :  { %1587 = vtanh.f32 %v1927_v62  ;;  %v699_v41 = vrot.slane %v1927_v62, 6 }
 0x77a   :  { %1589 = vtanh.f32 %v1929_v0  ;;  %v726_v40 = vrot.slane %v1929_v0, 2 }
 0x783   :  { %v1588_v1 = vpop.eup %1587 }
 0x784   :  { %v1590_v2 = vpop.eup %1589  ;;  %561 = vrot.lane.b32.xlu1 %v1588_v1, %s1672_s2 }
 0x785   :  { %588 = vrot.lane.b32.xlu0 %v1590_v2, %s1672_s2 }
 0x7f6   :  { %v562_v4 = vpop.permute.xlu1 %561 }
 0x7f7   :  { %v564_v5 = vmul.f32 %v1584_v51, %v562_v4  ;;  %v589_v6 = vpop.permute.xlu0 %588  ;;  %v839_v4 = vld [vmem:[#allocation2 + $0x8] sm:$0xc0] }
 0x7f8   :  { %v1935_v7 = vmul.f32 %v1586_v53, %v589_v6 }
 0x7f9   :  { %593 = vrot.lane.b32.xlu0 %v564_v5, %s1674_s5 }
 0x7fa   :  { %v604_v8 = vrot.slane %v1935_v7, 6 }
 0x7fc   :  { %605 = vrot.lane.b32.xlu1 %v604_v8, %s1673_s30 }
 0x86b   :  { %v594_v9 = vpop.permute.xlu0 %593 }
 0x86c   :  { %597 = vst.msk [vmem:[%s2115_s4] sm:$0x30] %vm596_vm4, %v594_v9 }
 0x86e   :  { %v606_v10 = vpop.permute.xlu1 %605 }
 0x86f   :  { %v608_v11 = vsel %vm296_vm2, %v594_v9, %v606_v10 }
 0x870   :  { %v610_v12 = vrot.slane %v608_v11, 4 }
 0x872   :  { %1380 = vmatmul.mubr.msk.f32.vlgmr.msra.gmra.mrb[6].mxu0 %vm47_vm0, %v610_v12 }
 0x873   :  { %1494 = vmatpush1.bf16.msra.mxu0 %v1752_v23  ;;  %980 = vmatprep.mubr.f32.mxu0 %v1671_v3 }
 0x874   :  { %1496 = vmatprep.subr.bf16.mxu0 %v1777_v32 }
 0x877   :  { %1498 = vmatpush1.bf16.msra.mxu0 %v1779_v33 }
 0x878   :  { %1500 = vmatprep.subr.bf16.mxu0 %v1790_v38 }
 0x87b   :  { %1502 = vmatpush1.bf16.msra.mxu0 %v1806_v44 }
 0x87c   :  { %1504 = vmatprep.subr.bf16.mxu0 %v1809_v45 }
 0x87f   :  { %1506 = vmatpush1.bf16.msra.mxu0 %v1821_v49 }
 0x880   :  { %1524 = vmatprep.subr.bf16.mxu0 %v1747_v21 }
 0x945   :  { %v679_v13 = vpop.f32.mrb[6].mxu0 }
 0x946   :  { %v686_v14 = vrot.slane %v679_v13, 2  ;;  %v681_v15 = vpop.f32.mrb[7].mxu0 }
 0x947   :  { %v690_v18 = vadd.f32 %v689_v16, %v681_v15 }
 0x948   :  { %v688_v19 = vadd.f32 %v686_v14, %v684_v17 }
 0x949   :  { %1591 = vtanh.f32 %v690_v18  ;;  %v1382_v25 = vmul.f32 -1.442695, %v690_v18 }
 0x94a   :  { %1593 = vtanh.f32 %v688_v19  ;;  %v1381_v26 = vmul.f32 -1.442695, %v688_v19 }
 0x94b   :  { %1595 = vpow2.f32 %v1382_v25 }
 0x94c   :  { %1597 = vpow2.f32 %v1381_v26 }
 0x953   :  { %v1592_v22 = vpop.eup %1591 }
 0x954   :  { %v1594_v24 = vpop.eup %1593  ;;  %730 = vrot.lane.b32.xlu0 %v1592_v22, %s1672_s2 }
 0x955   :  { %703 = vrot.lane.b32.xlu1 %v1594_v24, %s1672_s2  ;;  %v1596_v21 = vpop.eup %1595 }
 0x956   :  { %v1598_v27 = vpop.eup %1597  ;;  %v721_v28 = vadd.f32 1.0, %v1596_v21 }
 0x957   :  { %v694_v29 = vadd.f32 1.0, %v1598_v27 }
 0x958   :  { %1599 = vrcp.f32 %v721_v28 }
 0x959   :  { %1601 = vrcp.f32 %v694_v29 }
 0x962   :  { %v1600_v30 = vpop.eup %1599 }
 0x963   :  { %v1602_v34 = vpop.eup %1601  ;;  %v728_v42 = vmul.f32 %v1600_v30, %v726_v40 }
 0x964   :  { %v701_v46 = vmul.f32 %v1602_v34, %v699_v41 }
 0x9c6   :  { %v731_v31 = vpop.permute.xlu0 %730 }
 0x9c7   :  { %v733_v35 = vmul.f32 %v1600_v30, %v731_v31  ;;  %v704_v36 = vpop.permute.xlu1 %703 }
 0x9c8   :  { %v706_v39 = vmul.f32 %v1602_v34, %v704_v36 }
 0x9c9   :  { %735 = vrot.lane.b32.xlu0 %v733_v35, %s1672_s2 }
 0x9ca   :  { %708 = vrot.lane.b32.xlu1 %v706_v39, %s1672_s2 }
 0xa3b   :  { %v736_v43 = vpop.permute.xlu0 %735 }
 0xa3c   :  { %v1961_v47 = vadd.f32 %v736_v43, %v728_v42  ;;  %v709_v48 = vpop.permute.xlu1 %708 }
 0xa3d   :  { %v711_v50 = vadd.f32 %v709_v48, %v701_v46 }
 0xa3e   :  { %1603 = vtanh.f32 %v1961_v47  ;;  %v879_v26 = vrot.slane %v1961_v47, 2 }
 0xa3f   :  { %1605 = vtanh.f32 %v711_v50  ;;  %v852_v24 = vrot.slane %v711_v50, 6 }
 0xa48   :  { %v1604_v51 = vpop.eup %1603 }
 0xa49   :  { %v1606_v52 = vpop.eup %1605  ;;  %741 = vrot.lane.b32.xlu0 %v1604_v51, %s1672_s2  ;;  %v987_v51 = vld [vmem:[#allocation2 + $0x10] sm:$0xc] }
 0xa4a   :  { %714 = vrot.lane.b32.xlu1 %v1606_v52, %s1672_s2 }
 0xabb   :  { %v742_v53 = vpop.permute.xlu0 %741 }
 0xabc   :  { %v1966_v54 = vmul.f32 %v1600_v30, %v742_v53  ;;  %v715_v55 = vpop.permute.xlu1 %714  ;;  %v992_v53 = vld [vmem:[#allocation2 + $0x8] sm:$0x30] }
 0xabd   :  { %v717_v56 = vmul.f32 %v1602_v34, %v715_v55 }
 0xabe   :  { %v757_v57 = vrot.slane %v1966_v54, 2 }
 0xabf   :  { %746 = vrot.lane.b32.xlu0 %v717_v56, %s1674_s5 }
 0xac0   :  { %758 = vrot.lane.b32.xlu1 %v757_v57, %s1673_s30 }
 0xb31   :  { %v747_v58 = vpop.permute.xlu0 %746 }
 0xb32   :  { %750 = vst.msk [vmem:[%s2115_s4] sm:$0xc0] %vm749_vm5, %v747_v58  ;;  %v759_v59 = vpop.permute.xlu1 %758 }
 0xb33   :  { %v761_v60 = vsel %vm296_vm2, %v747_v58, %v759_v59 }
 0xb34   :  { %v763_v61 = vrot.slane %v761_v60, 6 }
 0xb36   :  { %1383 = vmatmul.mubr.msk.f32.vlgmr.msra.gmra.mrb[4].mxu1 %vm47_vm0, %v763_v61 }
 0xb37   :  { %1510 = vmatpush1.bf16.msra.mxu1 %v1752_v23  ;;  %1134 = vmatprep.mubr.f32.mxu1 %v1671_v3 }
 0xb38   :  { %1512 = vmatprep.subr.bf16.mxu1 %v1777_v32 }
 0xb3b   :  { %1514 = vmatpush1.bf16.msra.mxu1 %v1779_v33 }
 0xb3c   :  { %1516 = vmatprep.subr.bf16.mxu1 %v1790_v38 }
 0xb3f   :  { %1518 = vmatpush1.bf16.msra.mxu1 %v1806_v44 }
 0xb40   :  { %1520 = vmatprep.subr.bf16.mxu1 %v1809_v45 }
 0xb43   :  { %1522 = vmatpush1.bf16.msra.mxu1 %v1821_v49 }
 0xc09   :  { %v832_v62 = vpop.f32.mrb[4].mxu1 }
 0xc0a   :  { %v838_v0 = vadd.f32 %v837_v63, %v832_v62  ;;  %v834_v1 = vpop.f32.mrb[5].mxu1 }
 0xc0b   :  { %v841_v2 = vrot.slane %v834_v1, 2 }
 0xc0c   :  { %1607 = vtanh.f32 %v838_v0  ;;  %v1384_v9 = vmul.f32 -1.442695, %v838_v0 }
 0xc0d   :  { %v843_v5 = vadd.f32 %v841_v2, %v839_v4 }
 0xc0f   :  { %1609 = vtanh.f32 %v843_v5  ;;  %v1385_v10 = vmul.f32 -1.442695, %v843_v5 }
 0xc10   :  { %1611 = vpow2.f32 %v1384_v9 }
 0xc11   :  { %1613 = vpow2.f32 %v1385_v10 }
 0xc16   :  { %v1608_v6 = vpop.eup %1607 }
 0xc17   :  { %856 = vrot.lane.b32.xlu1 %v1608_v6, %s1672_s2 }
 0xc19   :  { %v1610_v8 = vpop.eup %1609 }
 0xc1a   :  { %883 = vrot.lane.b32.xlu0 %v1610_v8, %s1672_s2  ;;  %v1612_v11 = vpop.eup %1611 }
 0xc1b   :  { %v1614_v12 = vpop.eup %1613  ;;  %v847_v13 = vadd.f32 1.0, %v1612_v11 }
 0xc1c   :  { %v874_v14 = vadd.f32 1.0, %v1614_v12 }
 0xc1d   :  { %1615 = vrcp.f32 %v847_v13 }
 0xc1e   :  { %1617 = vrcp.f32 %v874_v14 }
 0xc27   :  { %v1616_v15 = vpop.eup %1615 }
 0xc28   :  { %v1618_v18 = vpop.eup %1617  ;;  %v854_v25 = vmul.f32 %v1616_v15, %v852_v24 }
 0xc29   :  { %v881_v28 = vmul.f32 %v1618_v18, %v879_v26  ;;  %v1141_v26 = vld [vmem:[#allocation2 + $0x10] sm:$0x30] }
 0xc89   :  { %v857_v16 = vpop.permute.xlu1 %856 }
 0xc8a   :  { %v859_v17 = vmul.f32 %v1616_v15, %v857_v16 }
 0xc8c   :  { %861 = vrot.lane.b32.xlu1 %v859_v17, %s1672_s2  ;;  %v884_v19 = vpop.permute.xlu0 %883 }
 0xc8d   :  { %v886_v22 = vmul.f32 %v1618_v18, %v884_v19 }
 0xc8f   :  { %888 = vrot.lane.b32.xlu0 %v886_v22, %s1672_s2 }
 0xcfe   :  { %v862_v21 = vpop.permute.xlu1 %861 }
 0xcff   :  { %v1990_v27 = vadd.f32 %v862_v21, %v854_v25 }
 0xd01   :  { %1619 = vtanh.f32 %v1990_v27  ;;  %v889_v29 = vpop.permute.xlu0 %888  ;;  %v1005_v63 = vrot.slane %v1990_v27, 6 }
 0xd02   :  { %v891_v30 = vadd.f32 %v889_v29, %v881_v28  ;;  %v1146_v28 = vld [vmem:[#allocation2 + $0x8] sm:$0xc] }
 0xd04   :  { %1621 = vtanh.f32 %v891_v30  ;;  %v1032_v0 = vrot.slane %v891_v30, 2 }
 0xd0b   :  { %v1620_v31 = vpop.eup %1619 }
 0xd0c   :  { %867 = vrot.lane.b32.xlu1 %v1620_v31, %s1672_s2 }
 0xd0e   :  { %v1622_v34 = vpop.eup %1621 }
 0xd0f   :  { %894 = vrot.lane.b32.xlu0 %v1622_v34, %s1672_s2 }
 0xd7e   :  { %v868_v35 = vpop.permute.xlu1 %867 }
 0xd7f   :  { %v870_v36 = vmul.f32 %v1616_v15, %v868_v35 }
 0xd81   :  { %899 = vrot.lane.b32.xlu0 %v870_v36, %s1674_s5  ;;  %v895_v39 = vpop.permute.xlu0 %894 }
 0xd82   :  { %v1996_v40 = vmul.f32 %v1618_v18, %v895_v39 }
 0xd84   :  { %v908_v41 = vrot.slane %v1996_v40, 6 }
 0xd86   :  { %909 = vrot.lane.b32.xlu1 %v908_v41, %s1673_s30 }
 0xdf3   :  { %v2000_v42 = vpop.permute.xlu0 %899 }
 0xdf8   :  { %v910_v43 = vpop.permute.xlu1 %909 }
 0xdf9   :  { %v912_v46 = vsel %vm296_vm2, %v2000_v42, %v910_v43 }
 0xdfa   :  { %1386 = vmatmul.mubr.msk.f32.vlgmr.msra.gmra.mrb[8].mxu0 %vm47_vm0, %v912_v46 }
 0xdfb   :  { %1526 = vmatpush1.bf16.msra.mxu0 %v1752_v23  ;;  %1288 = vmatprep.mubr.f32.mxu0 %v1671_v3 }
 0xdfc   :  { %1528 = vmatprep.subr.bf16.mxu0 %v1777_v32 }
 0xdff   :  { %1530 = vmatpush1.bf16.msra.mxu0 %v1779_v33 }
 0xe00   :  { %1532 = vmatprep.subr.bf16.mxu0 %v1790_v38 }
 0xe03   :  { %1534 = vmatpush1.bf16.msra.mxu0 %v1806_v44 }
 0xe04   :  { %1536 = vmatprep.subr.bf16.mxu0 %v1809_v45 }
 0xe07   :  { %1538 = vmatpush1.bf16.msra.mxu0 %v1821_v49 }
 0xecd   :  { %v982_v47 = vpop.f32.mrb[8].mxu0 }
 0xece   :  { %v989_v48 = vrot.slane %v982_v47, 6  ;;  %v984_v50 = vpop.f32.mrb[9].mxu0 }
 0xecf   :  { %v994_v52 = vrot.slane %v984_v50, 4 }
 0xed0   :  { %v991_v23 = vadd.f32 %v989_v48, %v987_v51 }
 0xed1   :  { %v996_v3 = vadd.f32 %v994_v52, %v992_v53 }
 0xed2   :  { %1623 = vtanh.f32 %v991_v23  ;;  %v1387_v38 = vmul.f32 -1.442695, %v991_v23 }
 0xed3   :  { %1625 = vtanh.f32 %v996_v3  ;;  %v1388_v44 = vmul.f32 -1.442695, %v996_v3 }
 0xed4   :  { %1627 = vpow2.f32 %v1387_v38 }
 0xed5   :  { %1629 = vpow2.f32 %v1388_v44 }
 0xedc   :  { %v1624_v32 = vpop.eup %1623 }
 0xedd   :  { %v1626_v33 = vpop.eup %1625  ;;  %1009 = vrot.lane.b32.xlu1 %v1624_v32, %s1672_s2 }
 0xede   :  { %1036 = vrot.lane.b32.xlu0 %v1626_v33, %s1672_s2  ;;  %v1628_v45 = vpop.eup %1627 }
 0xedf   :  { %v1630_v49 = vpop.eup %1629  ;;  %v1000_v55 = vadd.f32 1.0, %v1628_v45 }
 0xee0   :  { %v1027_v56 = vadd.f32 1.0, %v1630_v49 }
 0xee1   :  { %1631 = vrcp.f32 %v1000_v55 }
 0xee2   :  { %1633 = vrcp.f32 %v1027_v56 }
 0xeeb   :  { %v1632_v57 = vpop.eup %1631 }
 0xeec   :  { %v1634_v59 = vpop.eup %1633  ;;  %v1007_v1 = vmul.f32 %v1632_v57, %v1005_v63 }
 0xeed   :  { %v1034_v4 = vmul.f32 %v1634_v59, %v1032_v0 }
 0xf4f   :  { %v1010_v58 = vpop.permute.xlu1 %1009 }
 0xf50   :  { %v1012_v60 = vmul.f32 %v1632_v57, %v1010_v58  ;;  %v1037_v61 = vpop.permute.xlu0 %1036 }
 0xf51   :  { %v1039_v62 = vmul.f32 %v1634_v59, %v1037_v61 }
 0xf52   :  { %1014 = vrot.lane.b32.xlu1 %v1012_v60, %s1672_s2 }
 0xf53   :  { %1041 = vrot.lane.b32.xlu0 %v1039_v62, %s1672_s2 }
 0xfc4   :  { %v1015_v2 = vpop.permute.xlu1 %1014 }
 0xfc5   :  { %v1017_v5 = vadd.f32 %v1015_v2, %v1007_v1  ;;  %v1042_v6 = vpop.permute.xlu0 %1041 }
 0xfc6   :  { %v1044_v8 = vadd.f32 %v1042_v6, %v1034_v4  ;;  %v1295_v6 = vld [vmem:[#allocation2 + $0x10] sm:$0xc0] }
 0xfc7   :  { %1635 = vtanh.f32 %v1017_v5  ;;  %v1159_v23 = vrot.slane %v1017_v5, 6  ;;  %v1300_v5 = vld [vmem:[#allocation2 + $0x8] sm:$0x3] }
 0xfc8   :  { %1637 = vtanh.f32 %v1044_v8  ;;  %v1186_v53 = vrot.slane %v1044_v8, 2 }
 0xfd1   :  { %v1636_v9 = vpop.eup %1635 }
 0xfd2   :  { %v1638_v10 = vpop.eup %1637  ;;  %1020 = vrot.lane.b32.xlu1 %v1636_v9, %s1672_s2 }
 0xfd3   :  { %1047 = vrot.lane.b32.xlu0 %v1638_v10, %s1672_s2 }
0x1044   :  { %v1021_v11 = vpop.permute.xlu1 %1020 }
0x1045   :  { %v1023_v12 = vmul.f32 %v1632_v57, %v1021_v11  ;;  %v1048_v13 = vpop.permute.xlu0 %1047 }
0x1046   :  { %v2020_v14 = vmul.f32 %v1634_v59, %v1048_v13 }
0x1047   :  { %1052 = vrot.lane.b32.xlu0 %v1023_v12, %s1674_s5 }
0x1048   :  { %v1061_v15 = vrot.slane %v2020_v14, 2 }
0x104a   :  { %1062 = vrot.lane.b32.xlu1 %v1061_v15, %s1673_s30 }
0x10b9   :  { %v2025_v16 = vpop.permute.xlu0 %1052 }
0x10bc   :  { %v1063_v17 = vpop.permute.xlu1 %1062 }
0x10bd   :  { %v1065_v18 = vsel %vm296_vm2, %v2025_v16, %v1063_v17 }
0x10be   :  { %v1067_v19 = vrot.slane %v1065_v18, 2 }
0x10c0   :  { %1389 = vmatmul.mubr.msk.f32.vlgmr.msra.gmra.mrb[6].mxu1 %vm47_vm0, %v1067_v19 }
0x1193   :  { %v1136_v22 = vpop.f32.mrb[6].mxu1 }
0x1194   :  { %v1143_v24 = vrot.slane %v1136_v22, 4  ;;  %v1138_v25 = vpop.f32.mrb[7].mxu1 }
0x1195   :  { %v1148_v21 = vrot.slane %v1138_v25, 6 }
0x1196   :  { %v1145_v27 = vadd.f32 %v1143_v24, %v1141_v26 }
0x1197   :  { %v1150_v29 = vadd.f32 %v1148_v21, %v1146_v28 }
0x1198   :  { %1639 = vtanh.f32 %v1145_v27  ;;  %v1390_v34 = vmul.f32 -1.442695, %v1145_v27 }
0x1199   :  { %1641 = vtanh.f32 %v1150_v29  ;;  %v1391_v35 = vmul.f32 -1.442695, %v1150_v29 }
0x119a   :  { %1643 = vpow2.f32 %v1390_v34 }
0x119b   :  { %1645 = vpow2.f32 %v1391_v35 }
0x11a2   :  { %v1640_v30 = vpop.eup %1639 }
0x11a3   :  { %v1642_v31 = vpop.eup %1641  ;;  %1163 = vrot.lane.b32.xlu1 %v1640_v30, %s1672_s2 }
0x11a4   :  { %1190 = vrot.lane.b32.xlu0 %v1642_v31, %s1672_s2  ;;  %v1644_v36 = vpop.eup %1643 }
0x11a5   :  { %v1646_v39 = vpop.eup %1645  ;;  %v1154_v41 = vadd.f32 1.0, %v1644_v36 }
0x11a6   :  { %v1181_v43 = vadd.f32 1.0, %v1646_v39 }
0x11a7   :  { %1647 = vrcp.f32 %v1154_v41 }
0x11a8   :  { %1649 = vrcp.f32 %v1181_v43 }
0x11b1   :  { %v1648_v46 = vpop.eup %1647 }
0x11b2   :  { %v1650_v48 = vpop.eup %1649  ;;  %v1161_v3 = vmul.f32 %v1648_v46, %v1159_v23 }
0x11b3   :  { %v1188_v33 = vmul.f32 %v1650_v48, %v1186_v53 }
0x1215   :  { %v1164_v47 = vpop.permute.xlu1 %1163 }
0x1216   :  { %v1166_v50 = vmul.f32 %v1648_v46, %v1164_v47  ;;  %v1191_v51 = vpop.permute.xlu0 %1190 }
0x1217   :  { %v1193_v52 = vmul.f32 %v1650_v48, %v1191_v51 }
0x1218   :  { %1168 = vrot.lane.b32.xlu1 %v1166_v50, %s1672_s2 }
0x1219   :  { %1195 = vrot.lane.b32.xlu0 %v1193_v52, %s1672_s2 }
0x128a   :  { %v1169_v32 = vpop.permute.xlu1 %1168 }
0x128b   :  { %v1171_v38 = vadd.f32 %v1169_v32, %v1161_v3  ;;  %v1196_v44 = vpop.permute.xlu0 %1195 }
0x128c   :  { %v1198_v45 = vadd.f32 %v1196_v44, %v1188_v33 }
0x128d   :  { %1651 = vtanh.f32 %v1171_v38  ;;  %v1310_v29 = vrot.slane %v1171_v38, 6 }
0x128e   :  { %1653 = vtanh.f32 %v1198_v45  ;;  %v1337_v28 = vrot.slane %v1198_v45, 2 }
0x1297   :  { %v1652_v49 = vpop.eup %1651 }
0x1298   :  { %v1654_v55 = vpop.eup %1653  ;;  %1174 = vrot.lane.b32.xlu1 %v1652_v49, %s1672_s2 }
0x1299   :  { %1201 = vrot.lane.b32.xlu0 %v1654_v55, %s1672_s2 }
0x130a   :  { %v1175_v56 = vpop.permute.xlu1 %1174 }
0x130b   :  { %v1177_v57 = vmul.f32 %v1648_v46, %v1175_v56  ;;  %v1202_v58 = vpop.permute.xlu0 %1201 }
0x130c   :  { %v1204_v59 = vmul.f32 %v1650_v48, %v1202_v58 }
0x130d   :  { %1206 = vrot.lane.b32.xlu0 %v1177_v57, %s1674_s5 }
0x130e   :  { %v1215_v60 = vrot.slane %v1204_v59, 6 }
0x1310   :  { %1216 = vrot.lane.b32.xlu1 %v1215_v60, %s1673_s30 }
0x137f   :  { %v2038_v61 = vpop.permute.xlu0 %1206 }
0x1382   :  { %v1217_v62 = vpop.permute.xlu1 %1216 }
0x1383   :  { %v1219_v63 = vsel %vm296_vm2, %v2038_v61, %v1217_v62 }
0x1384   :  { %v1221_v0 = vrot.slane %v1219_v63, 4 }
0x1386   :  { %1392 = vmatmul.mubr.msk.f32.vlgmr.msra.gmra.mrb[10].mxu0 %vm47_vm0, %v1221_v0 }
0x1459   :  { %v1290_v1 = vpop.f32.mrb[10].mxu0 }
0x145a   :  { %v1297_v2 = vrot.slane %v1290_v1, 2  ;;  %v1292_v4 = vpop.f32.mrb[11].mxu0 }
0x145b   :  { %v1301_v8 = vadd.f32 %v1300_v5, %v1292_v4 }
0x145c   :  { %v1299_v9 = vadd.f32 %v1297_v2, %v1295_v6 }
0x145d   :  { %1655 = vtanh.f32 %v1301_v8  ;;  %v1394_v12 = vmul.f32 -1.442695, %v1301_v8 }
0x145e   :  { %1657 = vtanh.f32 %v1299_v9  ;;  %v1393_v13 = vmul.f32 -1.442695, %v1299_v9 }
0x145f   :  { %1659 = vpow2.f32 %v1394_v12 }
0x1460   :  { %1661 = vpow2.f32 %v1393_v13 }
0x1467   :  { %v1656_v10 = vpop.eup %1655 }
0x1468   :  { %v1658_v11 = vpop.eup %1657  ;;  %1341 = vrot.lane.b32.xlu1 %v1656_v10, %s1672_s2 }
0x1469   :  { %1314 = vrot.lane.b32.xlu0 %v1658_v11, %s1672_s2  ;;  %v1660_v15 = vpop.eup %1659 }
0x146a   :  { %v1662_v17 = vpop.eup %1661  ;;  %v1332_v18 = vadd.f32 1.0, %v1660_v15 }
0x146b   :  { %v1305_v19 = vadd.f32 1.0, %v1662_v17 }
0x146c   :  { %1663 = vrcp.f32 %v1332_v18 }
0x146d   :  { %1665 = vrcp.f32 %v1305_v19 }
0x1476   :  { %v1664_v22 = vpop.eup %1663 }
0x1477   :  { %v1666_v25 = vpop.eup %1665  ;;  %v1339_v30 = vmul.f32 %v1664_v22, %v1337_v28 }
0x1478   :  { %v1312_v34 = vmul.f32 %v1666_v25, %v1310_v29 }
0x14da   :  { %v1342_v24 = vpop.permute.xlu1 %1341 }
0x14db   :  { %v1344_v26 = vmul.f32 %v1664_v22, %v1342_v24  ;;  %v1315_v21 = vpop.permute.xlu0 %1314 }
0x14dc   :  { %v1317_v27 = vmul.f32 %v1666_v25, %v1315_v21 }
0x14dd   :  { %1346 = vrot.lane.b32.xlu1 %v1344_v26, %s1672_s2 }
0x14de   :  { %1319 = vrot.lane.b32.xlu0 %v1317_v27, %s1672_s2 }
0x154f   :  { %v1347_v31 = vpop.permute.xlu1 %1346 }
0x1550   :  { %v1349_v35 = vadd.f32 %v1347_v31, %v1339_v30  ;;  %v1320_v36 = vpop.permute.xlu0 %1319 }
0x1551   :  { %v1322_v39 = vadd.f32 %v1320_v36, %v1312_v34 }
0x1552   :  { %1667 = vtanh.f32 %v1349_v35 }
0x1553   :  { %1669 = vtanh.f32 %v1322_v39 }
0x155c   :  { %v1668_v41 = vpop.eup %1667 }
0x155d   :  { %v1670_v43 = vpop.eup %1669  ;;  %1352 = vrot.lane.b32.xlu1 %v1668_v41, %s1672_s2 }
0x155e   :  { %1325 = vrot.lane.b32.xlu0 %v1670_v43, %s1672_s2 }
0x1561   :  { %443 = vrot.lane.b32.xlu1 %v1901_v20, %s1673_s30 }
0x1562   :  { %287 = vrot.lane.b32.xlu0 %v1867_v37, %s1673_s30 }
0x1565   :  { %752 = vrot.lane.b32.xlu1 %v1966_v54, %s1673_s30 }
0x1566   :  { %599 = vrot.lane.b32.xlu0 %v1935_v7, %s1673_s30 }
0x1569   :  { %1057 = vrot.lane.b32.xlu1 %v2020_v14, %s1673_s30 }
0x156a   :  { %904 = vrot.lane.b32.xlu0 %v1996_v40, %s1673_s30 }
0x156e   :  { %1211 = vrot.lane.b32.xlu0 %v1204_v59, %s1673_s30 }
0x15cf   :  { %v1353_v46 = vpop.permute.xlu1 %1352 }
0x15d0   :  { %v1355_v47 = vmul.f32 %v1664_v22, %v1353_v46  ;;  %v1326_v20 = vpop.permute.xlu0 %1325 }
0x15d1   :  { %v1328_v48 = vmul.f32 %v1666_v25, %v1326_v20 }
0x15d2   :  { %1362 = vrot.lane.b32.xlu0 %v1355_v47, %s1673_s30 }
0x15d3   :  { %1357 = vrot.lane.b32.xlu1 %v1328_v48, %s1674_s5  ;;  %v444_v37 = vpop.permute.xlu1 %443 }
0x15d4   :  { %447 = vst.msk [vmem:[%s2115_s4 + $0x8] sm:$0x30] %vm446_vm6, %v444_v37  ;;  %v288_v7 = vpop.permute.xlu0 %287 }
0x15d5   :  { %1209 = vst.msk [vmem:[%s2115_s4 + $0x8] sm:$0x30] %vm596_vm4, %v2038_v61 }
0x15d6   :  { %291 = vst.msk [vmem:[%s2115_s4 + $0x8] sm:$0xc0] %vm290_vm7, %v288_v7 }
0x15d7   :  { %v753_v54 = vpop.permute.xlu1 %752 }
0x15d8   :  { %756 = vst.msk [vmem:[%s2115_s4 + $0x8] sm:$0x3] %vm755_vm8, %v753_v54  ;;  %v600_v40 = vpop.permute.xlu0 %599 }
0x15d9   :  { %902 = vst.msk [vmem:[%s2115_s4 + $0x8] sm:$0x3] %vm284_vm1, %v2000_v42 }
0x15da   :  { %603 = vst.msk [vmem:[%s2115_s4 + $0x8] sm:$0xc] %vm602_vm9, %v600_v40 }
0x15db   :  { %1055 = vst.msk [vmem:[%s2115_s4 + $0x8] sm:$0xc] %vm440_vm3, %v2025_v16  ;;  %v1058_v14 = vpop.permute.xlu1 %1057 }
0x15dc   :  { %1060 = vst.msk [vmem:[%s2115_s4] sm:$0x30] %vm446_vm6, %v1058_v14  ;;  %v905_v50 = vpop.permute.xlu0 %904 }
0x15dd   :  { %907 = vst.msk [vmem:[%s2115_s4] sm:$0xc0] %vm290_vm7, %v905_v50 }
0x15e0   :  { %v1212_v42 = vpop.permute.xlu0 %1211 }
0x15e1   :  { %1214 = vst.msk [vmem:[%s2115_s4] sm:$0xc] %vm602_vm9, %v1212_v42 }
0x1644   :  { %v1363_v51 = vpop.permute.xlu0 %1362 }
0x1645   :  { %1365 = vst.msk [vmem:[%s2115_s4] sm:$0x3] %vm755_vm8, %v1363_v51  ;;  %v1358_v16 = vpop.permute.xlu1 %1357 }
0x1646   :  { %1360 = vst.msk [vmem:[%s2115_s4 + $0x8] sm:$0xc0] %vm749_vm5, %v1358_v16 }

// kernel: bilstm_forward.3
= control target key start
LH: loop header
LB: loop body
LE: loop exit
PB: predicated region body
PF: predicated region fallthrough
CT: control target
= control target key end

     0   :  { %v1648_v3 = vmov 0.0   ;;  %vm35_vm0 = vcmask 130048   ;;  %v25_v33 = vlaneseq  ;;  %s1650_s6 = smov 96   ;;  %s1651_s7 = smov 64   ;;  %vm273_vm1 = vcmask 254976   ;;  %s2052_s1 = inlined_call_operand.vmem [shape: f32[16,256], index: 1, kind: input, shape index: {}]   ;;  %s2053_s3 = inlined_call_operand.vmem [shape: f32[64,256], index: 3, kind: input, shape index: {}]   ;;  %s2054_s0 = inlined_call_operand.vmem [shape: f32[16,16], index: 0, kind: input, shape index: {}]   ;;  %s2055_s2 = inlined_call_operand.vmem [shape: f32[1,256], index: 2, kind: input, shape index: {}]   ;;  %s2056_s4 = inlined_call_operand.vmem [shape: f32[16,64], index: 4, kind: output, shape index: {}]  }
   0x1   :  { %v20_v0 = vld [vmem:[%s2052_s1 + $0x8] sm:$0xff]  ;;  %v22_v1 = vld [vmem:[%s2052_s1 + $0x18] sm:$0xff]  ;;  %106 = vmatprep.mubr.f32.mxu0 %v1648_v3  ;;  %207 = vmatprep.mubr.f32.mxu1 %v1648_v3  ;;  %v19_v6 = vld [vmem:[%s2052_s1] sm:$0xff]  ;;  %vm285_vm2 = vcmask 261120   ;;  %vm139_vm3 = vcmask 523264   ;;  %vm429_vm4 = vcmask 257026  }
   0x2   :  { %v124_v2 = vld [vmem:[%s2053_s3 + $0x8] sm:$0xff]  ;;  %v1384_v4 = vpack.c.bf16 %v22_v1, %v20_v0  ;;  %v126_v5 = vld [vmem:[%s2053_s3 + $0x18] sm:$0xff]  ;;  %v21_v7 = vld [vmem:[%s2052_s1 + $0x10] sm:$0xff]  ;;  %v26_v34 = vshrl.u32 %v25_v33, 7  ;;  %vm585_vm5 = vcmask 259076   ;;  %vm738_vm6 = vcmask 261126  }
   0x3   :  { %v1697_v8 = vpack.c.bf16 %v126_v5, %v124_v2  ;;  %v1386_v9 = vpack.c.bf16 %v21_v7, %v19_v6  ;;  %v123_v10 = vld [vmem:[%s2053_s3] sm:$0xff]  ;;  %v125_v11 = vld [vmem:[%s2053_s3 + $0x10] sm:$0xff]  ;;  %v128_v13 = vld [vmem:[%s2053_s3 + $0x28] sm:$0xff]  ;;  %vm435_vm7 = vcmask 521476   ;;  %vm279_vm8 = vcmask 523526  }
   0x4   :  { %1385 = vmatprep.subr.bf16.mxu0 %v1384_v4  ;;  %v1705_v12 = vpack.c.bf16 %v125_v11, %v123_v10  ;;  %v130_v14 = vld [vmem:[%s2053_s3 + $0x38] sm:$0xff]  ;;  %v127_v15 = vld [vmem:[%s2053_s3 + $0x20] sm:$0xff]  ;;  %v129_v18 = vld [vmem:[%s2053_s3 + $0x30] sm:$0xff]  ;;  %v27_v35 = vsub.s32 0, %v26_v34  ;;  %v31_v37 = vsub.s32 1, %v26_v34  ;;  %vm744_vm9 = vcmask 517376  }
   0x5   :  { %1389 = vmatprep.subr.bf16.mxu1 %v1697_v8  ;;  %1387 = vmatpush1.bf16.msra.mxu0 %v1386_v9  ;;  %v17_v16 = vld [vmem:[%s2054_s0] sm:$0xff]  ;;  %v1720_v17 = vpack.c.bf16 %v130_v14, %v128_v13  ;;  %v132_v19 = vld [vmem:[%s2053_s3 + $0x48] sm:$0xff]  ;;  %v1729_v20 = vpack.c.bf16 %v129_v18, %v127_v15  ;;  %v134_v21 = vld [vmem:[%s2053_s3 + $0x58] sm:$0xff]  ;;  %vm591_vm10 = vcmask 519426  }
   0x6   :  { %1391 = vmatpush1.bf16.msra.mxu1 %v1705_v12  ;;  %1405 = vmatprep.subr.bf16.mxu0 %v1697_v8  ;;  %v1736_v22 = vpack.c.bf16 %v134_v21, %v132_v19  ;;  %v131_v23 = vld [vmem:[%s2053_s3 + $0x40] sm:$0xff]  ;;  %v133_v24 = vld [vmem:[%s2053_s3 + $0x50] sm:$0xff]  ;;  %v136_v25 = vld [vmem:[%s2053_s3 + $0x68] sm:$0xff] }
   0x7   :  { %1393 = vmatprep.subr.bf16.mxu1 %v1720_v17  ;;  %v138_v26 = vld [vmem:[%s2053_s3 + $0x78] sm:$0xff]  ;;  %v18_v27 = vld [vmem:[%s2054_s0 + $0x8] sm:$0xff]  ;;  %v1757_v28 = vpack.c.bf16 %v133_v24, %v131_v23  ;;  %v135_v30 = vld [vmem:[%s2053_s3 + $0x60] sm:$0xff] }
   0x8   :  { %1359 = vmatmul.mubr.msk.f32.vlgmr.msra.gmra.mrb[0].mxu0 %vm35_vm0, %v17_v16  ;;  %v1761_v29 = vpack.c.bf16 %v138_v26, %v136_v25  ;;  %v137_v31 = vld [vmem:[%s2053_s3 + $0x70] sm:$0xff]  ;;  %v23_v36 = vld [vmem:[%s2055_s2] sm:$0x3]  ;;  %s1649_s2 = smov 32  }
   0x9   :  { %112 = vmatprep.mubr.f32.mxu0 %v1648_v3  ;;  %1407 = vmatpush1.bf16.msra.mxu0 %v1705_v12  ;;  %v1773_v32 = vpack.c.bf16 %v137_v31, %v135_v30  ;;  %v28_v38 = vrot.slane %v23_v36, %v27_v35  ;;  %v32_v39 = vrot.slane %v23_v36, %v31_v37 }
   0xa   :  { %1395 = vmatpush1.bf16.msra.mxu1 %v1729_v20  ;;  %1409 = vmatprep.subr.bf16.mxu0 %v1720_v17 }
   0xb   :  { %1397 = vmatprep.subr.bf16.mxu1 %v1736_v22 }
   0xc   :  { %1360 = vmatmul.mubr.msk.f32.gmra.mrb[2].mxu0 %vm35_vm0, %v18_v27 }
   0xd   :  { %1411 = vmatpush1.bf16.msra.mxu0 %v1729_v20  ;;  %354 = vmatprep.mubr.f32.mxu0 %v1648_v3 }
   0xe   :  { %1399 = vmatpush1.bf16.msra.mxu1 %v1757_v28  ;;  %1413 = vmatprep.subr.bf16.mxu0 %v1736_v22 }
   0xf   :  { %1401 = vmatprep.subr.bf16.mxu1 %v1761_v29 }
  0x11   :  { %1415 = vmatpush1.bf16.msra.mxu0 %v1757_v28 }
  0x12   :  { %1403 = vmatpush1.bf16.msra.mxu1 %v1773_v32  ;;  %1417 = vmatprep.subr.bf16.mxu0 %v1761_v29 }
  0x13   :  { %1421 = vmatprep.subr.bf16.mxu1 %v1697_v8 }
  0x15   :  { %208 = vmatmul.mubr.f32.vlgmr.msra.gmra.mrb[0].mxu1 %v1648_v3  ;;  %1419 = vmatpush1.bf16.msra.mxu0 %v1773_v32 }
  0x16   :  { %1423 = vmatpush1.bf16.msra.mxu1 %v1705_v12  ;;  %510 = vmatprep.mubr.f32.mxu1 %v1648_v3 }
  0x17   :  { %1425 = vmatprep.subr.bf16.mxu1 %v1720_v17  ;;  %1437 = vmatprep.subr.bf16.mxu0 %v1697_v8 }
  0x1a   :  { %1427 = vmatpush1.bf16.msra.mxu1 %v1729_v20 }
  0x1b   :  { %1429 = vmatprep.subr.bf16.mxu1 %v1736_v22 }
  0x1e   :  { %1431 = vmatpush1.bf16.msra.mxu1 %v1757_v28 }
  0x1f   :  { %1433 = vmatprep.subr.bf16.mxu1 %v1761_v29 }
  0x22   :  { %1435 = vmatpush1.bf16.msra.mxu1 %v1773_v32 }
  0x23   :  { %1453 = vmatprep.subr.bf16.mxu1 %v1697_v8 }
  0xdb   :  { %v108_v40 = vpop.f32.mrb[0].mxu0 }
  0xdc   :  { %v109_v41 = vadd.f32 %v108_v40, %v28_v38  ;;  %v110_v42 = vpop.f32.mrb[1].mxu0 }
  0xdd   :  { %v111_v43 = vadd.f32 %v110_v42, %v32_v39 }
  0xde   :  { %119 = vst [vmem:[#allocation2] sm:$0xff] %v109_v41 }
  0xdf   :  { %120 = vst [vmem:[#allocation2 + $0x8] sm:$0xff] %v111_v43  ;;  %v114_v44 = vpop.f32.mrb[2].mxu0 }
  0xe0   :  { %v115_v45 = vadd.f32 %v114_v44, %v28_v38  ;;  %v116_v46 = vpop.f32.mrb[3].mxu0 }
  0xe1   :  { %v117_v47 = vadd.f32 %v116_v46, %v32_v39 }
  0xe2   :  { %121 = vst [vmem:[#allocation2 + $0x10] sm:$0xff] %v115_v45 }
  0xe3   :  { %122 = vst [vmem:[#allocation2 + $0x18] sm:$0xff] %v117_v47 }
  0xe5   :  { %v214_v53 = vld [vmem:[#allocation2] sm:$0x3]  ;;  %v361_v33 = vld [vmem:[#allocation2] sm:$0xc] }
  0xe8   :  { %v209_v48 = vpop.f32.mrb[0].mxu1 }
  0xe9   :  { %v211_v49 = vpop.f32.mrb[1].mxu1  ;;  %v215_v54 = vadd.f32 %v214_v53, %v209_v48 }
  0xea   :  { %v216_v50 = vld [vmem:[#allocation2 + $0x18] sm:$0xc0]  ;;  %v218_v51 = vrot.slane %v211_v49, 2  ;;  %v366_v36 = vld [vmem:[#allocation2 + $0x18] sm:$0x30] }
  0xeb   :  { %v1361_v58 = vmul.f32 -1.442695, %v215_v54 }
  0xec   :  { %v220_v52 = vadd.f32 %v218_v51, %v216_v50 }
  0xee   :  { %1520 = vtanh.f32 %v220_v52  ;;  %v1362_v57 = vmul.f32 -1.442695, %v220_v52 }
  0xef   :  { %1522 = vtanh.f32 %v215_v54 }
  0xf0   :  { %1524 = vpow2.f32 %v1362_v57 }
  0xf1   :  { %1526 = vpow2.f32 %v1361_v58 }
  0xf8   :  { %v1521_v55 = vpop.eup %1520 }
  0xf9   :  { %254 = vrot.lane.b32.xlu0 %v1521_v55, %s1649_s2  ;;  %v1523_v56 = vpop.eup %1522 }
  0xfa   :  { %v1525_v59 = vpop.eup %1524 }
  0xfb   :  { %v248_v60 = vadd.f32 1.0, %v1525_v59  ;;  %v1527_v61 = vpop.eup %1526 }
  0xfc   :  { %v224_v62 = vadd.f32 1.0, %v1527_v61 }
  0xfd   :  { %230 = vrot.lane.b32.xlu0 %v1523_v56, %s1649_s2  ;;  %1528 = vrcp.f32 %v248_v60 }
  0xfe   :  { %1530 = vrcp.f32 %v224_v62 }
 0x107   :  { %v1529_v63 = vpop.eup %1528 }
 0x108   :  { %v1531_v2 = vpop.eup %1530  ;;  %v252_v6 = vmul.f32 0.0, %v1529_v63 }
 0x109   :  { %v228_v10 = vmul.f32 0.0, %v1531_v2 }
 0x16b   :  { %v255_v0 = vpop.permute.xlu0 %254 }
 0x16c   :  { %v257_v1 = vmul.f32 %v1529_v63, %v255_v0 }
 0x16e   :  { %259 = vrot.lane.b32.xlu1 %v257_v1, %s1649_s2 }
 0x16f   :  { %v231_v4 = vpop.permute.xlu0 %230 }
 0x170   :  { %v233_v5 = vmul.f32 %v1531_v2, %v231_v4 }
 0x172   :  { %235 = vrot.lane.b32.xlu1 %v233_v5, %s1649_s2 }
 0x1e0   :  { %v260_v7 = vpop.permute.xlu1 %259 }
 0x1e1   :  { %v1800_v9 = vadd.f32 %v260_v7, %v252_v6 }
 0x1e3   :  { %1532 = vtanh.f32 %v1800_v9  ;;  %v406_v53 = vrot.slane %v1800_v9, 2 }
 0x1e4   :  { %v236_v11 = vpop.permute.xlu1 %235 }
 0x1e5   :  { %v1803_v13 = vadd.f32 %v236_v11, %v228_v10 }
 0x1e7   :  { %1534 = vtanh.f32 %v1803_v13  ;;  %v379_v52 = vrot.slane %v1803_v13, 6  ;;  %v517_v13 = vld [vmem:[#allocation2] sm:$0x30] }
 0x1ed   :  { %v1533_v14 = vpop.eup %1532 }
 0x1ee   :  { %265 = vrot.lane.b32.xlu0 %v1533_v14, %s1649_s2 }
 0x1f1   :  { %v1535_v15 = vpop.eup %1534 }
 0x1f2   :  { %241 = vrot.lane.b32.xlu1 %v1535_v15, %s1649_s2 }
 0x260   :  { %v266_v16 = vpop.permute.xlu0 %265 }
 0x261   :  { %v1808_v18 = vmul.f32 %v1529_v63, %v266_v16  ;;  %v522_v16 = vld [vmem:[#allocation2 + $0x18] sm:$0xc] }
 0x263   :  { %v281_v19 = vrot.slane %v1808_v18, 6 }
 0x264   :  { %v242_v21 = vpop.permute.xlu1 %241 }
 0x265   :  { %v244_v23 = vmul.f32 %v1531_v2, %v242_v21  ;;  %282 = vrot.lane.b32.xlu1 %v281_v19, %s1650_s6 }
 0x267   :  { %270 = vrot.lane.b32.xlu0 %v244_v23, %s1651_s7 }
 0x2d7   :  { %v283_v24 = vpop.permute.xlu1 %282 }
 0x2d9   :  { %v271_v25 = vpop.permute.xlu0 %270 }
 0x2da   :  { %274 = vst.msk [vmem:[%s2056_s4] sm:$0x3] %vm273_vm1, %v271_v25  ;;  %v286_v26 = vsel %vm285_vm2, %v271_v25, %v283_v24 }
 0x2db   :  { %1363 = vmatmul.mubr.msk.f32.vlgmr.msra.gmra.mrb[4].mxu0 %vm139_vm3, %v286_v26 }
 0x2dc   :  { %1439 = vmatpush1.bf16.msra.mxu0 %v1705_v12  ;;  %666 = vmatprep.mubr.f32.mxu0 %v1648_v3 }
 0x2dd   :  { %1441 = vmatprep.subr.bf16.mxu0 %v1720_v17 }
 0x2e0   :  { %1443 = vmatpush1.bf16.msra.mxu0 %v1729_v20 }
 0x2e1   :  { %1445 = vmatprep.subr.bf16.mxu0 %v1736_v22 }
 0x2e4   :  { %1447 = vmatpush1.bf16.msra.mxu0 %v1757_v28 }
 0x2e5   :  { %1449 = vmatprep.subr.bf16.mxu0 %v1761_v29 }
 0x2e8   :  { %1451 = vmatpush1.bf16.msra.mxu0 %v1773_v32 }
 0x2e9   :  { %1469 = vmatprep.subr.bf16.mxu0 %v1697_v8 }
 0x3ae   :  { %v356_v27 = vpop.f32.mrb[4].mxu0 }
 0x3af   :  { %v363_v30 = vrot.slane %v356_v27, 6  ;;  %v358_v31 = vpop.f32.mrb[5].mxu0 }
 0x3b0   :  { %v368_v34 = vrot.slane %v358_v31, 4 }
 0x3b1   :  { %v365_v35 = vadd.f32 %v363_v30, %v361_v33 }
 0x3b2   :  { %v370_v37 = vadd.f32 %v368_v34, %v366_v36 }
 0x3b3   :  { %1536 = vtanh.f32 %v365_v35  ;;  %v1364_v40 = vmul.f32 -1.442695, %v365_v35 }
 0x3b4   :  { %1538 = vtanh.f32 %v370_v37  ;;  %v1365_v41 = vmul.f32 -1.442695, %v370_v37 }
 0x3b5   :  { %1540 = vpow2.f32 %v1364_v40 }
 0x3b6   :  { %1542 = vpow2.f32 %v1365_v41 }
 0x3bd   :  { %v1537_v38 = vpop.eup %1536 }
 0x3be   :  { %v1539_v39 = vpop.eup %1538  ;;  %383 = vrot.lane.b32.xlu1 %v1537_v38, %s1649_s2 }
 0x3bf   :  { %410 = vrot.lane.b32.xlu0 %v1539_v39, %s1649_s2  ;;  %v1541_v42 = vpop.eup %1540 }
 0x3c0   :  { %v1543_v43 = vpop.eup %1542  ;;  %v374_v44 = vadd.f32 1.0, %v1541_v42 }
 0x3c1   :  { %v401_v45 = vadd.f32 1.0, %v1543_v43 }
 0x3c2   :  { %1544 = vrcp.f32 %v374_v44 }
 0x3c3   :  { %1546 = vrcp.f32 %v401_v45 }
 0x3cc   :  { %v1545_v46 = vpop.eup %1544 }
 0x3cd   :  { %v1547_v48 = vpop.eup %1546  ;;  %v381_v54 = vmul.f32 %v1545_v46, %v379_v52 }
 0x3ce   :  { %v408_v56 = vmul.f32 %v1547_v48, %v406_v53 }
 0x430   :  { %v384_v47 = vpop.permute.xlu1 %383 }
 0x431   :  { %v386_v49 = vmul.f32 %v1545_v46, %v384_v47  ;;  %v411_v50 = vpop.permute.xlu0 %410 }
 0x432   :  { %v413_v51 = vmul.f32 %v1547_v48, %v411_v50 }
 0x433   :  { %388 = vrot.lane.b32.xlu1 %v386_v49, %s1649_s2 }
 0x434   :  { %415 = vrot.lane.b32.xlu0 %v413_v51, %s1649_s2 }
 0x4a5   :  { %v389_v55 = vpop.permute.xlu1 %388 }
 0x4a6   :  { %v1834_v57 = vadd.f32 %v389_v55, %v381_v54  ;;  %v416_v58 = vpop.permute.xlu0 %415 }
 0x4a7   :  { %v1836_v59 = vadd.f32 %v416_v58, %v408_v56 }
 0x4a8   :  { %1548 = vtanh.f32 %v1834_v57  ;;  %v535_v39 = vrot.slane %v1834_v57, 6 }
 0x4a9   :  { %1550 = vtanh.f32 %v1836_v59  ;;  %v562_v40 = vrot.slane %v1836_v59, 2 }
 0x4b2   :  { %v1549_v60 = vpop.eup %1548 }
 0x4b3   :  { %v1551_v61 = vpop.eup %1550  ;;  %394 = vrot.lane.b32.xlu1 %v1549_v60, %s1649_s2 }
 0x4b4   :  { %421 = vrot.lane.b32.xlu0 %v1551_v61, %s1649_s2  ;;  %v678_v61 = vld [vmem:[#allocation2 + $0x18] sm:$0x3] }
 0x525   :  { %v395_v62 = vpop.permute.xlu1 %394 }
 0x526   :  { %v397_v63 = vmul.f32 %v1545_v46, %v395_v62  ;;  %v422_v0 = vpop.permute.xlu0 %421  ;;  %v673_v62 = vld [vmem:[#allocation2] sm:$0xc0] }
 0x527   :  { %v1842_v1 = vmul.f32 %v1547_v48, %v422_v0 }
 0x528   :  { %426 = vrot.lane.b32.xlu0 %v397_v63, %s1651_s7 }
 0x529   :  { %v437_v2 = vrot.slane %v1842_v1, 2 }
 0x52b   :  { %438 = vrot.lane.b32.xlu1 %v437_v2, %s1650_s6 }
 0x59a   :  { %v427_v4 = vpop.permute.xlu0 %426 }
 0x59b   :  { %430 = vst.msk [vmem:[%s2056_s4] sm:$0xc] %vm429_vm4, %v427_v4 }
 0x59d   :  { %v439_v5 = vpop.permute.xlu1 %438 }
 0x59e   :  { %v441_v6 = vsel %vm285_vm2, %v427_v4, %v439_v5 }
 0x59f   :  { %v443_v7 = vrot.slane %v441_v6, 2 }
 0x5a1   :  { %1366 = vmatmul.mubr.msk.f32.vlgmr.msra.gmra.mrb[2].mxu1 %vm139_vm3, %v443_v7 }
 0x5a2   :  { %1455 = vmatpush1.bf16.msra.mxu1 %v1705_v12  ;;  %819 = vmatprep.mubr.f32.mxu1 %v1648_v3 }
 0x5a3   :  { %1457 = vmatprep.subr.bf16.mxu1 %v1720_v17 }
 0x5a6   :  { %1459 = vmatpush1.bf16.msra.mxu1 %v1729_v20 }
 0x5a7   :  { %1461 = vmatprep.subr.bf16.mxu1 %v1736_v22 }
 0x5aa   :  { %1463 = vmatpush1.bf16.msra.mxu1 %v1757_v28 }
 0x5ab   :  { %1465 = vmatprep.subr.bf16.mxu1 %v1761_v29 }
 0x5ae   :  { %1467 = vmatpush1.bf16.msra.mxu1 %v1773_v32 }
 0x5af   :  { %1485 = vmatprep.subr.bf16.mxu1 %v1697_v8 }
 0x674   :  { %v512_v9 = vpop.f32.mrb[2].mxu1 }
 0x675   :  { %v519_v10 = vrot.slane %v512_v9, 4  ;;  %v514_v11 = vpop.f32.mrb[3].mxu1 }
 0x676   :  { %v524_v14 = vrot.slane %v514_v11, 6 }
 0x677   :  { %v521_v15 = vadd.f32 %v519_v10, %v517_v13 }
 0x678   :  { %v526_v19 = vadd.f32 %v524_v14, %v522_v16 }
 0x679   :  { %1552 = vtanh.f32 %v521_v15  ;;  %v1367_v24 = vmul.f32 -1.442695, %v521_v15 }
 0x67a   :  { %1554 = vtanh.f32 %v526_v19  ;;  %v1368_v25 = vmul.f32 -1.442695, %v526_v19 }
 0x67b   :  { %1556 = vpow2.f32 %v1367_v24 }
 0x67c   :  { %1558 = vpow2.f32 %v1368_v25 }
 0x683   :  { %v1553_v21 = vpop.eup %1552 }
 0x684   :  { %v1555_v23 = vpop.eup %1554  ;;  %539 = vrot.lane.b32.xlu1 %v1553_v21, %s1649_s2 }
 0x685   :  { %566 = vrot.lane.b32.xlu0 %v1555_v23, %s1649_s2  ;;  %v1557_v26 = vpop.eup %1556 }
 0x686   :  { %v1559_v27 = vpop.eup %1558  ;;  %v530_v30 = vadd.f32 1.0, %v1557_v26 }
 0x687   :  { %v557_v31 = vadd.f32 1.0, %v1559_v27 }
 0x688   :  { %1560 = vrcp.f32 %v530_v30 }
 0x689   :  { %1562 = vrcp.f32 %v557_v31 }
 0x692   :  { %v1561_v33 = vpop.eup %1560 }
 0x693   :  { %v1563_v35 = vpop.eup %1562  ;;  %v537_v41 = vmul.f32 %v1561_v33, %v535_v39 }
 0x694   :  { %v564_v43 = vmul.f32 %v1563_v35, %v562_v40 }
 0x6f6   :  { %v540_v34 = vpop.permute.xlu1 %539 }
 0x6f7   :  { %v542_v36 = vmul.f32 %v1561_v33, %v540_v34  ;;  %v567_v37 = vpop.permute.xlu0 %566 }
 0x6f8   :  { %v569_v38 = vmul.f32 %v1563_v35, %v567_v37 }
 0x6f9   :  { %544 = vrot.lane.b32.xlu1 %v542_v36, %s1649_s2 }
 0x6fa   :  { %571 = vrot.lane.b32.xlu0 %v569_v38, %s1649_s2 }
 0x76b   :  { %v545_v42 = vpop.permute.xlu1 %544 }
 0x76c   :  { %v1868_v44 = vadd.f32 %v545_v42, %v537_v41  ;;  %v572_v45 = vpop.permute.xlu0 %571 }
 0x76d   :  { %v1870_v46 = vadd.f32 %v572_v45, %v564_v43  ;;  %v826_v45 = vld [vmem:[#allocation2 + $0x10] sm:$0x3] }
 0x76e   :  { %1564 = vtanh.f32 %v1868_v44  ;;  %v688_v23 = vrot.slane %v1868_v44, 6 }
 0x76f   :  { %1566 = vtanh.f32 %v1870_v46  ;;  %v715_v21 = vrot.slane %v1870_v46, 2 }
 0x778   :  { %v1565_v47 = vpop.eup %1564 }
 0x779   :  { %v1567_v48 = vpop.eup %1566  ;;  %550 = vrot.lane.b32.xlu1 %v1565_v47, %s1649_s2 }
 0x77a   :  { %577 = vrot.lane.b32.xlu0 %v1567_v48, %s1649_s2 }
 0x7eb   :  { %v551_v49 = vpop.permute.xlu1 %550 }
 0x7ec   :  { %v553_v50 = vmul.f32 %v1561_v33, %v551_v49  ;;  %v578_v51 = vpop.permute.xlu0 %577  ;;  %v828_v49 = vld [vmem:[#allocation2 + $0x8] sm:$0xc0] }
 0x7ed   :  { %v1876_v52 = vmul.f32 %v1563_v35, %v578_v51 }
 0x7ee   :  { %582 = vrot.lane.b32.xlu0 %v553_v50, %s1651_s7 }
 0x7ef   :  { %v593_v53 = vrot.slane %v1876_v52, 6 }
 0x7f1   :  { %594 = vrot.lane.b32.xlu1 %v593_v53, %s1650_s6 }
 0x860   :  { %v583_v54 = vpop.permute.xlu0 %582 }
 0x861   :  { %586 = vst.msk [vmem:[%s2056_s4] sm:$0x30] %vm585_vm5, %v583_v54 }
 0x863   :  { %v595_v55 = vpop.permute.xlu1 %594 }
 0x864   :  { %v597_v56 = vsel %vm285_vm2, %v583_v54, %v595_v55 }
 0x865   :  { %v599_v57 = vrot.slane %v597_v56, 4 }
 0x867   :  { %1369 = vmatmul.mubr.msk.f32.vlgmr.msra.gmra.mrb[6].mxu0 %vm139_vm3, %v599_v57 }
 0x868   :  { %1471 = vmatpush1.bf16.msra.mxu0 %v1705_v12  ;;  %969 = vmatprep.mubr.f32.mxu0 %v1648_v3 }
 0x869   :  { %1473 = vmatprep.subr.bf16.mxu0 %v1720_v17 }
 0x86c   :  { %1475 = vmatpush1.bf16.msra.mxu0 %v1729_v20 }
 0x86d   :  { %1477 = vmatprep.subr.bf16.mxu0 %v1736_v22 }
 0x870   :  { %1479 = vmatpush1.bf16.msra.mxu0 %v1757_v28 }
 0x871   :  { %1481 = vmatprep.subr.bf16.mxu0 %v1761_v29 }
 0x874   :  { %1483 = vmatpush1.bf16.msra.mxu0 %v1773_v32 }
 0x875   :  { %1501 = vmatprep.subr.bf16.mxu0 %v1697_v8 }
 0x93a   :  { %v668_v58 = vpop.f32.mrb[6].mxu0 }
 0x93b   :  { %v675_v59 = vrot.slane %v668_v58, 2  ;;  %v670_v60 = vpop.f32.mrb[7].mxu0 }
 0x93c   :  { %v679_v63 = vadd.f32 %v678_v61, %v670_v60 }
 0x93d   :  { %v677_v0 = vadd.f32 %v675_v59, %v673_v62 }
 0x93e   :  { %1568 = vtanh.f32 %v679_v63  ;;  %v1371_v5 = vmul.f32 -1.442695, %v679_v63 }
 0x93f   :  { %1570 = vtanh.f32 %v677_v0  ;;  %v1370_v6 = vmul.f32 -1.442695, %v677_v0 }
 0x940   :  { %1572 = vpow2.f32 %v1371_v5 }
 0x941   :  { %1574 = vpow2.f32 %v1370_v6 }
 0x948   :  { %v1569_v2 = vpop.eup %1568 }
 0x949   :  { %v1571_v4 = vpop.eup %1570  ;;  %719 = vrot.lane.b32.xlu0 %v1569_v2, %s1649_s2 }
 0x94a   :  { %692 = vrot.lane.b32.xlu1 %v1571_v4, %s1649_s2  ;;  %v1573_v8 = vpop.eup %1572 }
 0x94b   :  { %v1575_v7 = vpop.eup %1574  ;;  %v710_v9 = vadd.f32 1.0, %v1573_v8 }
 0x94c   :  { %v683_v10 = vadd.f32 1.0, %v1575_v7 }
 0x94d   :  { %1576 = vrcp.f32 %v710_v9 }
 0x94e   :  { %1578 = vrcp.f32 %v683_v10 }
 0x957   :  { %v1577_v11 = vpop.eup %1576 }
 0x958   :  { %v1579_v14 = vpop.eup %1578  ;;  %v717_v24 = vmul.f32 %v1577_v11, %v715_v21 }
 0x959   :  { %v690_v26 = vmul.f32 %v1579_v14, %v688_v23 }
 0x9bb   :  { %v720_v13 = vpop.permute.xlu0 %719 }
 0x9bc   :  { %v722_v15 = vmul.f32 %v1577_v11, %v720_v13  ;;  %v693_v16 = vpop.permute.xlu1 %692 }
 0x9bd   :  { %v695_v19 = vmul.f32 %v1579_v14, %v693_v16 }
 0x9be   :  { %724 = vrot.lane.b32.xlu0 %v722_v15, %s1649_s2 }
 0x9bf   :  { %697 = vrot.lane.b32.xlu1 %v695_v19, %s1649_s2 }
 0xa30   :  { %v725_v25 = vpop.permute.xlu0 %724 }
 0xa31   :  { %v1902_v27 = vadd.f32 %v725_v25, %v717_v24  ;;  %v698_v30 = vpop.permute.xlu1 %697 }
 0xa32   :  { %v700_v31 = vadd.f32 %v698_v30, %v690_v26 }
 0xa33   :  { %1580 = vtanh.f32 %v1902_v27  ;;  %v868_v6 = vrot.slane %v1902_v27, 2 }
 0xa34   :  { %1582 = vtanh.f32 %v700_v31  ;;  %v841_v4 = vrot.slane %v700_v31, 6 }
 0xa3d   :  { %v1581_v33 = vpop.eup %1580 }
 0xa3e   :  { %v1583_v34 = vpop.eup %1582  ;;  %730 = vrot.lane.b32.xlu0 %v1581_v33, %s1649_s2  ;;  %v976_v33 = vld [vmem:[#allocation2 + $0x10] sm:$0xc] }
 0xa3f   :  { %703 = vrot.lane.b32.xlu1 %v1583_v34, %s1649_s2 }
 0xab0   :  { %v731_v35 = vpop.permute.xlu0 %730 }
 0xab1   :  { %v1907_v36 = vmul.f32 %v1577_v11, %v731_v35  ;;  %v704_v37 = vpop.permute.xlu1 %703  ;;  %v981_v35 = vld [vmem:[#allocation2 + $0x8] sm:$0x30] }
 0xab2   :  { %v706_v38 = vmul.f32 %v1579_v14, %v704_v37 }
 0xab3   :  { %v746_v39 = vrot.slane %v1907_v36, 2 }
 0xab4   :  { %735 = vrot.lane.b32.xlu0 %v706_v38, %s1651_s7 }
 0xab5   :  { %747 = vrot.lane.b32.xlu1 %v746_v39, %s1650_s6 }
 0xb26   :  { %v736_v40 = vpop.permute.xlu0 %735 }
 0xb27   :  { %739 = vst.msk [vmem:[%s2056_s4] sm:$0xc0] %vm738_vm6, %v736_v40  ;;  %v748_v41 = vpop.permute.xlu1 %747 }
 0xb28   :  { %v750_v42 = vsel %vm285_vm2, %v736_v40, %v748_v41 }
 0xb29   :  { %v752_v43 = vrot.slane %v750_v42, 6 }
 0xb2b   :  { %1372 = vmatmul.mubr.msk.f32.vlgmr.msra.gmra.mrb[4].mxu1 %vm139_vm3, %v752_v43 }
 0xb2c   :  { %1487 = vmatpush1.bf16.msra.mxu1 %v1705_v12  ;;  %1123 = vmatprep.mubr.f32.mxu1 %v1648_v3 }
 0xb2d   :  { %1489 = vmatprep.subr.bf16.mxu1 %v1720_v17 }
 0xb30   :  { %1491 = vmatpush1.bf16.msra.mxu1 %v1729_v20 }
 0xb31   :  { %1493 = vmatprep.subr.bf16.mxu1 %v1736_v22 }
 0xb34   :  { %1495 = vmatpush1.bf16.msra.mxu1 %v1757_v28 }
 0xb35   :  { %1497 = vmatprep.subr.bf16.mxu1 %v1761_v29 }
 0xb38   :  { %1499 = vmatpush1.bf16.msra.mxu1 %v1773_v32 }
 0xbfe   :  { %v821_v44 = vpop.f32.mrb[4].mxu1 }
 0xbff   :  { %v827_v46 = vadd.f32 %v826_v45, %v821_v44  ;;  %v823_v47 = vpop.f32.mrb[5].mxu1 }
 0xc00   :  { %v830_v48 = vrot.slane %v823_v47, 2 }
 0xc01   :  { %1584 = vtanh.f32 %v827_v46  ;;  %v1373_v54 = vmul.f32 -1.442695, %v827_v46 }
 0xc02   :  { %v832_v50 = vadd.f32 %v830_v48, %v828_v49 }
 0xc04   :  { %1586 = vtanh.f32 %v832_v50  ;;  %v1374_v55 = vmul.f32 -1.442695, %v832_v50 }
 0xc05   :  { %1588 = vpow2.f32 %v1373_v54 }
 0xc06   :  { %1590 = vpow2.f32 %v1374_v55 }
 0xc0b   :  { %v1585_v51 = vpop.eup %1584 }
 0xc0c   :  { %845 = vrot.lane.b32.xlu1 %v1585_v51, %s1649_s2 }
 0xc0e   :  { %v1587_v53 = vpop.eup %1586 }
 0xc0f   :  { %872 = vrot.lane.b32.xlu0 %v1587_v53, %s1649_s2  ;;  %v1589_v56 = vpop.eup %1588 }
 0xc10   :  { %v1591_v57 = vpop.eup %1590  ;;  %v836_v58 = vadd.f32 1.0, %v1589_v56 }
 0xc11   :  { %v863_v59 = vadd.f32 1.0, %v1591_v57 }
 0xc12   :  { %1592 = vrcp.f32 %v836_v58 }
 0xc13   :  { %1594 = vrcp.f32 %v863_v59 }
 0xc1c   :  { %v1593_v60 = vpop.eup %1592 }
 0xc1d   :  { %v1595_v63 = vpop.eup %1594  ;;  %v843_v5 = vmul.f32 %v1593_v60, %v841_v4 }
 0xc1e   :  { %v870_v9 = vmul.f32 %v1595_v63, %v868_v6  ;;  %v1130_v6 = vld [vmem:[#allocation2 + $0x10] sm:$0x30] }
 0xc7e   :  { %v846_v61 = vpop.permute.xlu1 %845 }
 0xc7f   :  { %v848_v62 = vmul.f32 %v1593_v60, %v846_v61 }
 0xc81   :  { %850 = vrot.lane.b32.xlu1 %v848_v62, %s1649_s2  ;;  %v873_v0 = vpop.permute.xlu0 %872 }
 0xc82   :  { %v875_v2 = vmul.f32 %v1595_v63, %v873_v0 }
 0xc84   :  { %877 = vrot.lane.b32.xlu0 %v875_v2, %s1649_s2 }
 0xcf3   :  { %v851_v8 = vpop.permute.xlu1 %850 }
 0xcf4   :  { %v1931_v7 = vadd.f32 %v851_v8, %v843_v5 }
 0xcf6   :  { %1596 = vtanh.f32 %v1931_v7  ;;  %v878_v10 = vpop.permute.xlu0 %877  ;;  %v994_v45 = vrot.slane %v1931_v7, 6 }
 0xcf7   :  { %v880_v11 = vadd.f32 %v878_v10, %v870_v9  ;;  %v1135_v9 = vld [vmem:[#allocation2 + $0x8] sm:$0xc] }
 0xcf9   :  { %1598 = vtanh.f32 %v880_v11  ;;  %v1021_v46 = vrot.slane %v880_v11, 2 }
 0xd00   :  { %v1597_v13 = vpop.eup %1596 }
 0xd01   :  { %856 = vrot.lane.b32.xlu1 %v1597_v13, %s1649_s2 }
 0xd03   :  { %v1599_v14 = vpop.eup %1598 }
 0xd04   :  { %883 = vrot.lane.b32.xlu0 %v1599_v14, %s1649_s2 }
 0xd73   :  { %v857_v15 = vpop.permute.xlu1 %856 }
 0xd74   :  { %v859_v16 = vmul.f32 %v1593_v60, %v857_v15 }
 0xd76   :  { %888 = vrot.lane.b32.xlu0 %v859_v16, %s1651_s7  ;;  %v884_v19 = vpop.permute.xlu0 %883 }
 0xd77   :  { %v1937_v21 = vmul.f32 %v1595_v63, %v884_v19 }
 0xd79   :  { %v897_v23 = vrot.slane %v1937_v21, 6 }
 0xd7b   :  { %898 = vrot.lane.b32.xlu1 %v897_v23, %s1650_s6 }
 0xde8   :  { %v1941_v24 = vpop.permute.xlu0 %888 }
 0xded   :  { %v899_v25 = vpop.permute.xlu1 %898 }
 0xdee   :  { %v901_v26 = vsel %vm285_vm2, %v1941_v24, %v899_v25 }
 0xdef   :  { %1375 = vmatmul.mubr.msk.f32.vlgmr.msra.gmra.mrb[8].mxu0 %vm139_vm3, %v901_v26 }
 0xdf0   :  { %1503 = vmatpush1.bf16.msra.mxu0 %v1705_v12  ;;  %1277 = vmatprep.mubr.f32.mxu0 %v1648_v3 }
 0xdf1   :  { %1505 = vmatprep.subr.bf16.mxu0 %v1720_v17 }
 0xdf4   :  { %1507 = vmatpush1.bf16.msra.mxu0 %v1729_v20 }
 0xdf5   :  { %1509 = vmatprep.subr.bf16.mxu0 %v1736_v22 }
 0xdf8   :  { %1511 = vmatpush1.bf16.msra.mxu0 %v1757_v28 }
 0xdf9   :  { %1513 = vmatprep.subr.bf16.mxu0 %v1761_v29 }
 0xdfc   :  { %1515 = vmatpush1.bf16.msra.mxu0 %v1773_v32 }
 0xec2   :  { %v971_v27 = vpop.f32.mrb[8].mxu0 }
 0xec3   :  { %v978_v30 = vrot.slane %v971_v27, 6  ;;  %v973_v31 = vpop.f32.mrb[9].mxu0 }
 0xec4   :  { %v983_v34 = vrot.slane %v973_v31, 4 }
 0xec5   :  { %v980_v12 = vadd.f32 %v978_v30, %v976_v33 }
 0xec6   :  { %v985_v3 = vadd.f32 %v983_v34, %v981_v35 }
 0xec7   :  { %1600 = vtanh.f32 %v980_v12  ;;  %v1376_v22 = vmul.f32 -1.442695, %v980_v12 }
 0xec8   :  { %1602 = vtanh.f32 %v985_v3  ;;  %v1377_v28 = vmul.f32 -1.442695, %v985_v3 }
 0xec9   :  { %1604 = vpow2.f32 %v1376_v22 }
 0xeca   :  { %1606 = vpow2.f32 %v1377_v28 }
 0xed1   :  { %v1601_v17 = vpop.eup %1600 }
 0xed2   :  { %v1603_v20 = vpop.eup %1602  ;;  %998 = vrot.lane.b32.xlu1 %v1601_v17, %s1649_s2 }
 0xed3   :  { %1025 = vrot.lane.b32.xlu0 %v1603_v20, %s1649_s2  ;;  %v1605_v29 = vpop.eup %1604 }
 0xed4   :  { %v1607_v32 = vpop.eup %1606  ;;  %v989_v37 = vadd.f32 1.0, %v1605_v29 }
 0xed5   :  { %v1016_v38 = vadd.f32 1.0, %v1607_v32 }
 0xed6   :  { %1608 = vrcp.f32 %v989_v37 }
 0xed7   :  { %1610 = vrcp.f32 %v1016_v38 }
 0xee0   :  { %v1609_v39 = vpop.eup %1608 }
 0xee1   :  { %v1611_v41 = vpop.eup %1610  ;;  %v996_v47 = vmul.f32 %v1609_v39, %v994_v45 }
 0xee2   :  { %v1023_v49 = vmul.f32 %v1611_v41, %v1021_v46 }
 0xf44   :  { %v999_v40 = vpop.permute.xlu1 %998 }
 0xf45   :  { %v1001_v42 = vmul.f32 %v1609_v39, %v999_v40  ;;  %v1026_v43 = vpop.permute.xlu0 %1025 }
 0xf46   :  { %v1028_v44 = vmul.f32 %v1611_v41, %v1026_v43 }
 0xf47   :  { %1003 = vrot.lane.b32.xlu1 %v1001_v42, %s1649_s2 }
 0xf48   :  { %1030 = vrot.lane.b32.xlu0 %v1028_v44, %s1649_s2 }
 0xfb9   :  { %v1004_v48 = vpop.permute.xlu1 %1003 }
 0xfba   :  { %v1006_v50 = vadd.f32 %v1004_v48, %v996_v47  ;;  %v1031_v51 = vpop.permute.xlu0 %1030 }
 0xfbb   :  { %v1033_v53 = vadd.f32 %v1031_v51, %v1023_v49  ;;  %v1284_v51 = vld [vmem:[#allocation2 + $0x10] sm:$0xc0] }
 0xfbc   :  { %1612 = vtanh.f32 %v1006_v50  ;;  %v1148_v12 = vrot.slane %v1006_v50, 6  ;;  %v1289_v50 = vld [vmem:[#allocation2 + $0x8] sm:$0x3] }
 0xfbd   :  { %1614 = vtanh.f32 %v1033_v53  ;;  %v1175_v35 = vrot.slane %v1033_v53, 2 }
 0xfc6   :  { %v1613_v54 = vpop.eup %1612 }
 0xfc7   :  { %v1615_v55 = vpop.eup %1614  ;;  %1009 = vrot.lane.b32.xlu1 %v1613_v54, %s1649_s2 }
 0xfc8   :  { %1036 = vrot.lane.b32.xlu0 %v1615_v55, %s1649_s2 }
0x1039   :  { %v1010_v56 = vpop.permute.xlu1 %1009 }
0x103a   :  { %v1012_v57 = vmul.f32 %v1609_v39, %v1010_v56  ;;  %v1037_v58 = vpop.permute.xlu0 %1036 }
0x103b   :  { %v1961_v59 = vmul.f32 %v1611_v41, %v1037_v58 }
0x103c   :  { %1041 = vrot.lane.b32.xlu0 %v1012_v57, %s1651_s7 }
0x103d   :  { %v1050_v60 = vrot.slane %v1961_v59, 2 }
0x103f   :  { %1051 = vrot.lane.b32.xlu1 %v1050_v60, %s1650_s6 }
0x10ae   :  { %v1966_v61 = vpop.permute.xlu0 %1041 }
0x10b1   :  { %v1052_v62 = vpop.permute.xlu1 %1051 }
0x10b2   :  { %v1054_v63 = vsel %vm285_vm2, %v1966_v61, %v1052_v62 }
0x10b3   :  { %v1056_v0 = vrot.slane %v1054_v63, 2 }
0x10b5   :  { %1378 = vmatmul.mubr.msk.f32.vlgmr.msra.gmra.mrb[6].mxu1 %vm139_vm3, %v1056_v0 }
0x1188   :  { %v1125_v2 = vpop.f32.mrb[6].mxu1 }
0x1189   :  { %v1132_v4 = vrot.slane %v1125_v2, 4  ;;  %v1127_v5 = vpop.f32.mrb[7].mxu1 }
0x118a   :  { %v1137_v8 = vrot.slane %v1127_v5, 6 }
0x118b   :  { %v1134_v7 = vadd.f32 %v1132_v4, %v1130_v6 }
0x118c   :  { %v1139_v10 = vadd.f32 %v1137_v8, %v1135_v9 }
0x118d   :  { %1616 = vtanh.f32 %v1134_v7  ;;  %v1379_v14 = vmul.f32 -1.442695, %v1134_v7 }
0x118e   :  { %1618 = vtanh.f32 %v1139_v10  ;;  %v1380_v15 = vmul.f32 -1.442695, %v1139_v10 }
0x118f   :  { %1620 = vpow2.f32 %v1379_v14 }
0x1190   :  { %1622 = vpow2.f32 %v1380_v15 }
0x1197   :  { %v1617_v11 = vpop.eup %1616 }
0x1198   :  { %v1619_v13 = vpop.eup %1618  ;;  %1152 = vrot.lane.b32.xlu1 %v1617_v11, %s1649_s2 }
0x1199   :  { %1179 = vrot.lane.b32.xlu0 %v1619_v13, %s1649_s2  ;;  %v1621_v16 = vpop.eup %1620 }
0x119a   :  { %v1623_v19 = vpop.eup %1622  ;;  %v1143_v23 = vadd.f32 1.0, %v1621_v16 }
0x119b   :  { %v1170_v25 = vadd.f32 1.0, %v1623_v19 }
0x119c   :  { %1624 = vrcp.f32 %v1143_v23 }
0x119d   :  { %1626 = vrcp.f32 %v1170_v25 }
0x11a6   :  { %v1625_v26 = vpop.eup %1624 }
0x11a7   :  { %v1627_v30 = vpop.eup %1626  ;;  %v1150_v3 = vmul.f32 %v1625_v26, %v1148_v12 }
0x11a8   :  { %v1177_v20 = vmul.f32 %v1627_v30, %v1175_v35 }
0x120a   :  { %v1153_v27 = vpop.permute.xlu1 %1152 }
0x120b   :  { %v1155_v31 = vmul.f32 %v1625_v26, %v1153_v27  ;;  %v1180_v33 = vpop.permute.xlu0 %1179 }
0x120c   :  { %v1182_v34 = vmul.f32 %v1627_v30, %v1180_v33 }
0x120d   :  { %1157 = vrot.lane.b32.xlu1 %v1155_v31, %s1649_s2 }
0x120e   :  { %1184 = vrot.lane.b32.xlu0 %v1182_v34, %s1649_s2 }
0x127f   :  { %v1158_v17 = vpop.permute.xlu1 %1157 }
0x1280   :  { %v1160_v22 = vadd.f32 %v1158_v17, %v1150_v3  ;;  %v1185_v28 = vpop.permute.xlu0 %1184 }
0x1281   :  { %v1187_v29 = vadd.f32 %v1185_v28, %v1177_v20 }
0x1282   :  { %1628 = vtanh.f32 %v1160_v22  ;;  %v1299_v10 = vrot.slane %v1160_v22, 6 }
0x1283   :  { %1630 = vtanh.f32 %v1187_v29  ;;  %v1326_v9 = vrot.slane %v1187_v29, 2 }
0x128c   :  { %v1629_v32 = vpop.eup %1628 }
0x128d   :  { %v1631_v37 = vpop.eup %1630  ;;  %1163 = vrot.lane.b32.xlu1 %v1629_v32, %s1649_s2 }
0x128e   :  { %1190 = vrot.lane.b32.xlu0 %v1631_v37, %s1649_s2 }
0x12ff   :  { %v1164_v38 = vpop.permute.xlu1 %1163 }
0x1300   :  { %v1166_v39 = vmul.f32 %v1625_v26, %v1164_v38  ;;  %v1191_v40 = vpop.permute.xlu0 %1190 }
0x1301   :  { %v1193_v41 = vmul.f32 %v1627_v30, %v1191_v40 }
0x1302   :  { %1195 = vrot.lane.b32.xlu0 %v1166_v39, %s1651_s7 }
0x1303   :  { %v1204_v42 = vrot.slane %v1193_v41, 6 }
0x1305   :  { %1205 = vrot.lane.b32.xlu1 %v1204_v42, %s1650_s6 }
0x1374   :  { %v1979_v43 = vpop.permute.xlu0 %1195 }
0x1377   :  { %v1206_v44 = vpop.permute.xlu1 %1205 }
0x1378   :  { %v1208_v45 = vsel %vm285_vm2, %v1979_v43, %v1206_v44 }
0x1379   :  { %v1210_v46 = vrot.slane %v1208_v45, 4 }
0x137b   :  { %1381 = vmatmul.mubr.msk.f32.vlgmr.msra.gmra.mrb[10].mxu0 %vm139_vm3, %v1210_v46 }
0x144e   :  { %v1279_v47 = vpop.f32.mrb[10].mxu0 }
0x144f   :  { %v1286_v48 = vrot.slane %v1279_v47, 2  ;;  %v1281_v49 = vpop.f32.mrb[11].mxu0 }
0x1450   :  { %v1290_v53 = vadd.f32 %v1289_v50, %v1281_v49 }
0x1451   :  { %v1288_v54 = vadd.f32 %v1286_v48, %v1284_v51 }
0x1452   :  { %1632 = vtanh.f32 %v1290_v53  ;;  %v1383_v57 = vmul.f32 -1.442695, %v1290_v53 }
0x1453   :  { %1634 = vtanh.f32 %v1288_v54  ;;  %v1382_v58 = vmul.f32 -1.442695, %v1288_v54 }
0x1454   :  { %1636 = vpow2.f32 %v1383_v57 }
0x1455   :  { %1638 = vpow2.f32 %v1382_v58 }
0x145c   :  { %v1633_v55 = vpop.eup %1632 }
0x145d   :  { %v1635_v56 = vpop.eup %1634  ;;  %1330 = vrot.lane.b32.xlu1 %v1633_v55, %s1649_s2 }
0x145e   :  { %1303 = vrot.lane.b32.xlu0 %v1635_v56, %s1649_s2  ;;  %v1637_v60 = vpop.eup %1636 }
0x145f   :  { %v1639_v62 = vpop.eup %1638  ;;  %v1321_v63 = vadd.f32 1.0, %v1637_v60 }
0x1460   :  { %v1294_v0 = vadd.f32 1.0, %v1639_v62 }
0x1461   :  { %1640 = vrcp.f32 %v1321_v63 }
0x1462   :  { %1642 = vrcp.f32 %v1294_v0 }
0x146b   :  { %v1641_v2 = vpop.eup %1640 }
0x146c   :  { %v1643_v5 = vpop.eup %1642  ;;  %v1328_v11 = vmul.f32 %v1641_v2, %v1326_v9 }
0x146d   :  { %v1301_v14 = vmul.f32 %v1643_v5, %v1299_v10 }
0x14cf   :  { %v1331_v4 = vpop.permute.xlu1 %1330 }
0x14d0   :  { %v1333_v6 = vmul.f32 %v1641_v2, %v1331_v4  ;;  %v1304_v8 = vpop.permute.xlu0 %1303 }
0x14d1   :  { %v1306_v7 = vmul.f32 %v1643_v5, %v1304_v8 }
0x14d2   :  { %1335 = vrot.lane.b32.xlu1 %v1333_v6, %s1649_s2 }
0x14d3   :  { %1308 = vrot.lane.b32.xlu0 %v1306_v7, %s1649_s2 }
0x1544   :  { %v1336_v13 = vpop.permute.xlu1 %1335 }
0x1545   :  { %v1338_v15 = vadd.f32 %v1336_v13, %v1328_v11  ;;  %v1309_v16 = vpop.permute.xlu0 %1308 }
0x1546   :  { %v1311_v19 = vadd.f32 %v1309_v16, %v1301_v14 }
0x1547   :  { %1644 = vtanh.f32 %v1338_v15 }
0x1548   :  { %1646 = vtanh.f32 %v1311_v19 }
0x1551   :  { %v1645_v23 = vpop.eup %1644 }
0x1552   :  { %v1647_v25 = vpop.eup %1646  ;;  %1341 = vrot.lane.b32.xlu1 %v1645_v23, %s1649_s2 }
0x1553   :  { %1314 = vrot.lane.b32.xlu0 %v1647_v25, %s1649_s2 }
0x1556   :  { %432 = vrot.lane.b32.xlu1 %v1842_v1, %s1650_s6 }
0x1557   :  { %276 = vrot.lane.b32.xlu0 %v1808_v18, %s1650_s6 }
0x155a   :  { %741 = vrot.lane.b32.xlu1 %v1907_v36, %s1650_s6 }
0x155b   :  { %588 = vrot.lane.b32.xlu0 %v1876_v52, %s1650_s6 }
0x155e   :  { %1046 = vrot.lane.b32.xlu1 %v1961_v59, %s1650_s6 }
0x155f   :  { %893 = vrot.lane.b32.xlu0 %v1937_v21, %s1650_s6 }
0x1563   :  { %1200 = vrot.lane.b32.xlu0 %v1193_v41, %s1650_s6 }
0x15c4   :  { %v1342_v26 = vpop.permute.xlu1 %1341 }
0x15c5   :  { %v1344_v27 = vmul.f32 %v1641_v2, %v1342_v26  ;;  %v1315_v1 = vpop.permute.xlu0 %1314 }
0x15c6   :  { %v1317_v30 = vmul.f32 %v1643_v5, %v1315_v1 }
0x15c7   :  { %1351 = vrot.lane.b32.xlu0 %v1344_v27, %s1650_s6 }
0x15c8   :  { %1346 = vrot.lane.b32.xlu1 %v1317_v30, %s1651_s7  ;;  %v433_v18 = vpop.permute.xlu1 %432 }
0x15c9   :  { %436 = vst.msk [vmem:[%s2056_s4 + $0x8] sm:$0x30] %vm435_vm7, %v433_v18  ;;  %v277_v52 = vpop.permute.xlu0 %276 }
0x15ca   :  { %1198 = vst.msk [vmem:[%s2056_s4 + $0x8] sm:$0x30] %vm585_vm5, %v1979_v43 }
0x15cb   :  { %280 = vst.msk [vmem:[%s2056_s4 + $0x8] sm:$0xc0] %vm279_vm8, %v277_v52 }
0x15cc   :  { %v742_v36 = vpop.permute.xlu1 %741 }
0x15cd   :  { %745 = vst.msk [vmem:[%s2056_s4 + $0x8] sm:$0x3] %vm744_vm9, %v742_v36  ;;  %v589_v21 = vpop.permute.xlu0 %588 }
0x15ce   :  { %891 = vst.msk [vmem:[%s2056_s4 + $0x8] sm:$0x3] %vm273_vm1, %v1941_v24 }
0x15cf   :  { %592 = vst.msk [vmem:[%s2056_s4 + $0x8] sm:$0xc] %vm591_vm10, %v589_v21 }
0x15d0   :  { %1044 = vst.msk [vmem:[%s2056_s4 + $0x8] sm:$0xc] %vm429_vm4, %v1966_v61  ;;  %v1047_v59 = vpop.permute.xlu1 %1046 }
0x15d1   :  { %1049 = vst.msk [vmem:[%s2056_s4] sm:$0x30] %vm435_vm7, %v1047_v59  ;;  %v894_v31 = vpop.permute.xlu0 %893 }
0x15d2   :  { %896 = vst.msk [vmem:[%s2056_s4] sm:$0xc0] %vm279_vm8, %v894_v31 }
0x15d5   :  { %v1201_v24 = vpop.permute.xlu0 %1200 }
0x15d6   :  { %1203 = vst.msk [vmem:[%s2056_s4] sm:$0xc] %vm591_vm10, %v1201_v24 }
0x1639   :  { %v1352_v33 = vpop.permute.xlu0 %1351 }
0x163a   :  { %1354 = vst.msk [vmem:[%s2056_s4] sm:$0x3] %vm744_vm9, %v1352_v33  ;;  %v1347_v61 = vpop.permute.xlu1 %1346 }
0x163b   :  { %1349 = vst.msk [vmem:[%s2056_s4 + $0x8] sm:$0xc0] %vm738_vm6, %v1347_v61 }

</bundles_post_ra>
